<compile_context>
chip_gen: v5e
topology: v5e:2x2
jax: 0.10.0
libtpu: 0.0.40
codegen_flags: <defaults>
</compile_context>

<pallas_src>
import functools

import jax
import jax.numpy as jnp
from jax.experimental import pallas as pl
from jax.experimental.pallas import tpu as pltpu


def _double_conv_kernel(x_ref, w1_ref, b1_ref, w2_ref, b2_ref, m_ref, o_ref,
                        xg_ref, *, shifts, guard):
    # x_ref : (B, C_in, P)          batch block, P = H*W (lane-dense)
    # w1_ref: (C_out, 9*C_in)       tap-major conv1 weights (k = tap*C_in + ci)
    # b1_ref: (C_out, 1)
    # w2_ref: (C_out, 9*C_out)      tap-major conv2 weights
    # b2_ref: (C_out, 1)
    # m_ref : (9, P)                per-tap validity masks (zero-padding)
    # o_ref : (B, C_out, P)
    # xg_ref: (max(C_in, C_out), P + 2*guard) VMEM guard-padded flat image
    B, C_in, P = x_ref.shape
    C_out = o_ref.shape[1]
    Cg = xg_ref.shape[0]
    G = guard
    f32 = jnp.float32

    # Guard columns stay zero so row-out-of-bounds taps read zeros (= padding).
    # Two aligned, tiny stores; done every grid step (megacore-safe).
    zero_guard = jnp.zeros((Cg, G), f32)
    xg_ref[:, :G] = zero_guard
    xg_ref[:, G + P:] = zero_guard

    # Load the small operands once per grid step (no per-column ref reads).
    w1 = w1_ref[...]
    b1 = b1_ref[...]
    w2 = w2_ref[...]
    b2 = b2_ref[...]
    masks = m_ref[...]

    def conv3x3_relu(cin, w, b):
        # Consumes the image staged in xg_ref[:cin, G:G+P]; returns (C_out, P).
        # For these tiny channel counts the contraction is a VPU outer-product
        # FMA; for large C swap the inner loops for a jnp.dot on the MXU.
        acc = jnp.zeros((C_out, P), f32)
        for t, s in enumerate(shifts):
            # One shifted, lane-dense slab per tap.  Static slice is in-bounds
            # by construction (|s| <= W+1 <= G).  Column-invalid positions are
            # zeroed by the mask; row-invalid positions read the guard zeros.
            slab = xg_ref[:cin, G + s:G + s + P] * masks[t:t + 1, :]
            for c in range(cin):
                k = t * cin + c
                acc = acc + w[:, k:k + 1] * slab[c:c + 1, :]
        return jnp.maximum(acc + b, 0.0)

    for i in range(B):
        # ---- stage image i: one aligned slab store (guards untouched) -------
        xg_ref[:C_in, G:G + P] = x_ref[i].astype(f32)
        h1 = conv3x3_relu(C_in, w1, b1)            # conv1 + ReLU, stays on-chip
        # ---- stage the intermediate, run conv2 + ReLU, single writeback -----
        xg_ref[:C_out, G:G + P] = h1
        o_ref[i] = conv3x3_relu(C_out, w2, b2).astype(o_ref.dtype)


def _pick_batch_block(n: int) -> int:
    """Largest divisor of n (<= 8) that still leaves >= 2 grid steps."""
    best = 1
    for b in range(1, min(n // 2, 8) + 1):
        if n % b == 0:
            best = b
    return best


@jax.jit
def inconv_pallas(x, w1, b1, w2, b2):
    """InConv / DoubleConv forward.

    x  : (N, C_in, H, W) float32
    w1 : (C_out, C_in, 3, 3), b1 : (C_out,)
    w2 : (C_out, C_out, 3, 3), b2 : (C_out,)
    returns (N, C_out, H, W) float32
    """
    N, C_in, H, W = x.shape
    C_out = w1.shape[0]
    P = H * W
    G = max(128, ((W + 2 + 127) // 128) * 128)   # guard >= W+1, lane-aligned
    C_big = max(C_in, C_out)
    B = _pick_batch_block(N)

    # Flat tap shifts and validity masks for a 3x3 conv with padding=1.
    shifts = tuple((dy - 1) * W + (dx - 1) for dy in range(3) for dx in range(3))
    idx = jnp.arange(P, dtype=jnp.int32)
    h_idx, w_idx = idx // W, idx % W
    masks = jnp.stack([
        (((h_idx + dy - 1) >= 0) & ((h_idx + dy - 1) < H) &
         ((w_idx + dx - 1) >= 0) & ((w_idx + dx - 1) < W)).astype(jnp.float32)
        for dy in range(3) for dx in range(3)
    ])                                            # (9, P)

    # Tap-major weight matrices: column k = tap*C + c.
    w1_m = jnp.transpose(w1, (0, 2, 3, 1)).reshape(C_out, 9 * C_in).astype(jnp.float32)
    w2_m = jnp.transpose(w2, (0, 2, 3, 1)).reshape(C_out, 9 * C_out).astype(jnp.float32)
    b1_m = b1.reshape(C_out, 1).astype(jnp.float32)
    b2_m = b2.reshape(C_out, 1).astype(jnp.float32)

    x_flat = x.reshape(N, C_in, P)                # free: NCHW is contiguous

    kernel = functools.partial(_double_conv_kernel, shifts=shifts, guard=G)

    out_flat = pl.pallas_call(
        kernel,
        out_shape=jax.ShapeDtypeStruct((N, C_out, P), x.dtype),
        grid_spec=pltpu.PrefetchScalarGridSpec(
            num_scalar_prefetch=0,
            grid=(N // B,),
            in_specs=[
                pl.BlockSpec((B, C_in, P), lambda n: (n, 0, 0)),
                pl.BlockSpec((C_out, 9 * C_in), lambda n: (0, 0)),
                pl.BlockSpec((C_out, 1), lambda n: (0, 0)),
                pl.BlockSpec((C_out, 9 * C_out), lambda n: (0, 0)),
                pl.BlockSpec((C_out, 1), lambda n: (0, 0)),
                pl.BlockSpec((9, P), lambda n: (0, 0)),
            ],
            out_specs=pl.BlockSpec((B, C_out, P), lambda n: (n, 0, 0)),
            scratch_shapes=[pltpu.VMEM((C_big, P + 2 * G), jnp.float32)],
        ),
        compiler_params=pltpu.CompilerParams(
            dimension_semantics=("parallel",)),
    )(x_flat, w1_m, b1_m, w2_m, b2_m, masks)

    return out_flat.reshape(N, C_out, H, W)


if __name__ == "__main__":
    # Small shapes consistent with InConv(in_ch=4, out_ch=8)
    N, in_ch, out_ch, H, W = 2, 4, 8, 16, 16

    key = jax.random.PRNGKey(0)
    kx, kw1, kb1, kw2, kb2 = jax.random.split(key, 5)

    x = jax.random.normal(kx, (N, in_ch, H, W), dtype=jnp.float32)
    w1 = jax.random.normal(kw1, (out_ch, in_ch, 3, 3), dtype=jnp.float32) * 0.2
    b1 = jax.random.normal(kb1, (out_ch,), dtype=jnp.float32) * 0.1
    w2 = jax.random.normal(kw2, (out_ch, out_ch, 3, 3), dtype=jnp.float32) * 0.2
    b2 = jax.random.normal(kb2, (out_ch,), dtype=jnp.float32) * 0.1

    out = jax.block_until_ready(inconv_pallas(x, w1, b1, w2, b2))

    # Plain-JAX reference (same math as torch Conv2d(3x3, pad=1) -> ReLU, x2)
    def ref_block(v, w, b):
        y = jax.lax.conv_general_dilated(
            v, w, window_strides=(1, 1), padding=((1, 1), (1, 1)),
            dimension_numbers=("NCHW", "OIHW", "NCHW"),
            precision=jax.lax.Precision.HIGHEST)
        return jnp.maximum(y + b[None, :, None, None], 0.0)

    ref = ref_block(ref_block(x, w1, b1), w2, b2)

    assert out.shape == (N, out_ch, H, W)
    err = float(jnp.max(jnp.abs(out - ref)))
    assert bool(jnp.allclose(out, ref, atol=1e-4, rtol=1e-4)), f"max abs err {err}"

    print("KERNEL_OK")
</pallas_src>

<mosaic_0001>
module attributes {stable_mosaic.version = 11 : i64} {
  func.func @_double_conv_kernel(%arg0: i32, %arg1: memref<1x4x256xf32, #tpu.memory_space<vmem>>, %arg2: memref<8x36xf32, #tpu.memory_space<vmem>>, %arg3: memref<8x1xf32, #tpu.memory_space<vmem>>, %arg4: memref<8x72xf32, #tpu.memory_space<vmem>>, %arg5: memref<8x1xf32, #tpu.memory_space<vmem>>, %arg6: memref<9x256xf32, #tpu.memory_space<vmem>>, %arg7: memref<1x8x256xf32, #tpu.memory_space<vmem>>, %arg8: memref<8x512xf32, #tpu.memory_space<vmem>>) attributes {dimension_semantics = [#tpu.dimension_semantics<parallel>], iteration_bounds = array<i64: 2>, scalar_prefetch = 0 : i64, scratch_operands = 1 : i64, tpu.core_type = #tpu.core_type<tc>, window_params = [{transform_indices = @transform_0, window_bounds = array<i64: 1, 4, 256>}, {pipeline_mode = #tpu.pipeline_mode<synchronous>, transform_indices = @transform_1, window_bounds = array<i64: 8, 36>}, {pipeline_mode = #tpu.pipeline_mode<synchronous>, transform_indices = @transform_2, window_bounds = array<i64: 8, 1>}, {pipeline_mode = #tpu.pipeline_mode<synchronous>, transform_indices = @transform_3, window_bounds = array<i64: 8, 72>}, {pipeline_mode = #tpu.pipeline_mode<synchronous>, transform_indices = @transform_4, window_bounds = array<i64: 8, 1>}, {pipeline_mode = #tpu.pipeline_mode<synchronous>, transform_indices = @transform_5, window_bounds = array<i64: 9, 256>}, {transform_indices = @transform_6, window_bounds = array<i64: 1, 8, 256>}]} {
    %cst = arith.constant 0.000000e+00 : f32
    %0 = vector.broadcast %cst : f32 to vector<8x128xf32>
    %c0 = arith.constant 0 : index
    %c0_0 = arith.constant 0 : index
    %1 = vector.load %arg8[%c0, %c0_0] : memref<8x512xf32, #tpu.memory_space<vmem>>, vector<8x128xf32>
    tpu.vector_store %arg8[%c0, %c0_0], %0 {strides = array<i32>} : memref<8x512xf32, #tpu.memory_space<vmem>>, vector<8x128xf32>,
    %c0_1 = arith.constant 0 : index
    %c384 = arith.constant 384 : index
    %2 = vector.load %arg8[%c0_1, %c384] : memref<8x512xf32, #tpu.memory_space<vmem>>, vector<8x128xf32>
    tpu.vector_store %arg8[%c0_1, %c384], %0 {strides = array<i32>} : memref<8x512xf32, #tpu.memory_space<vmem>>, vector<8x128xf32>,
    %c0_2 = arith.constant 0 : index
    %c0_3 = arith.constant 0 : index
    %3 = vector.load %arg2[%c0_2, %c0_3] : memref<8x36xf32, #tpu.memory_space<vmem>>, vector<8x36xf32>
    %c0_4 = arith.constant 0 : index
    %c0_5 = arith.constant 0 : index
    %4 = vector.load %arg3[%c0_4, %c0_5] : memref<8x1xf32, #tpu.memory_space<vmem>>, vector<8x1xf32>
    %c0_6 = arith.constant 0 : index
    %c0_7 = arith.constant 0 : index
    %5 = vector.load %arg4[%c0_6, %c0_7] : memref<8x72xf32, #tpu.memory_space<vmem>>, vector<8x72xf32>
    %c0_8 = arith.constant 0 : index
    %c0_9 = arith.constant 0 : index
    %6 = vector.load %arg5[%c0_8, %c0_9] : memref<8x1xf32, #tpu.memory_space<vmem>>, vector<8x1xf32>
    %c0_10 = arith.constant 0 : index
    %c0_11 = arith.constant 0 : index
    %7 = vector.load %arg6[%c0_10, %c0_11] : memref<9x256xf32, #tpu.memory_space<vmem>>, vector<9x256xf32>
    %c0_12 = arith.constant 0 : index
    %c0_13 = arith.constant 0 : index
    %c0_14 = arith.constant 0 : index
    %8 = vector.load %arg1[%c0_12, %c0_13, %c0_14] : memref<1x4x256xf32, #tpu.memory_space<vmem>>, vector<1x4x256xf32>
    %9 = vector.shape_cast %8 : vector<1x4x256xf32> to vector<4x256xf32>
    %c0_15 = arith.constant 0 : index
    %c128 = arith.constant 128 : index
    %10 = vector.load %arg8[%c0_15, %c128] : memref<8x512xf32, #tpu.memory_space<vmem>>, vector<4x256xf32>
    tpu.vector_store %arg8[%c0_15, %c128], %9 {strides = array<i32>} : memref<8x512xf32, #tpu.memory_space<vmem>>, vector<4x256xf32>,
    %cst_16 = arith.constant 0.000000e+00 : f32
    %11 = vector.broadcast %cst_16 : f32 to vector<8x256xf32>
    %c0_17 = arith.constant 0 : index
    %c111 = arith.constant 111 : index
    %12 = vector.load %arg8[%c0_17, %c111] : memref<8x512xf32, #tpu.memory_space<vmem>>, vector<4x256xf32>
    %13 = vector.extract_strided_slice %7 {offsets = [0, 0], sizes = [1, 256], strides = [1, 1]} : vector<9x256xf32> to vector<1x256xf32>
    %14 = vector.broadcast %13 : vector<1x256xf32> to vector<4x256xf32>
    %15 = arith.mulf %12, %14 : vector<4x256xf32>
    %16 = vector.extract_strided_slice %3 {offsets = [0, 0], sizes = [8, 1], strides = [1, 1]} : vector<8x36xf32> to vector<8x1xf32>
    %17 = vector.extract_strided_slice %15 {offsets = [0, 0], sizes = [1, 256], strides = [1, 1]} : vector<4x256xf32> to vector<1x256xf32>
    %18 = vector.broadcast %16 : vector<8x1xf32> to vector<8x256xf32>
    %19 = vector.broadcast %17 : vector<1x256xf32> to vector<8x256xf32>
    %20 = arith.mulf %18, %19 : vector<8x256xf32>
    %21 = arith.addf %11, %20 : vector<8x256xf32>
    %22 = vector.extract_strided_slice %3 {offsets = [0, 1], sizes = [8, 1], strides = [1, 1]} : vector<8x36xf32> to vector<8x1xf32>
    %23 = vector.extract_strided_slice %15 {offsets = [1, 0], sizes = [1, 256], strides = [1, 1]} : vector<4x256xf32> to vector<1x256xf32>
    %24 = vector.broadcast %22 : vector<8x1xf32> to vector<8x256xf32>
    %25 = vector.broadcast %23 : vector<1x256xf32> to vector<8x256xf32>
    %26 = arith.mulf %24, %25 : vector<8x256xf32>
    %27 = arith.addf %21, %26 : vector<8x256xf32>
    %28 = vector.extract_strided_slice %3 {offsets = [0, 2], sizes = [8, 1], strides = [1, 1]} : vector<8x36xf32> to vector<8x1xf32>
    %29 = vector.extract_strided_slice %15 {offsets = [2, 0], sizes = [1, 256], strides = [1, 1]} : vector<4x256xf32> to vector<1x256xf32>
    %30 = vector.broadcast %28 : vector<8x1xf32> to vector<8x256xf32>
    %31 = vector.broadcast %29 : vector<1x256xf32> to vector<8x256xf32>
    %32 = arith.mulf %30, %31 : vector<8x256xf32>
    %33 = arith.addf %27, %32 : vector<8x256xf32>
    %34 = vector.extract_strided_slice %3 {offsets = [0, 3], sizes = [8, 1], strides = [1, 1]} : vector<8x36xf32> to vector<8x1xf32>
    %35 = vector.extract_strided_slice %15 {offsets = [3, 0], sizes = [1, 256], strides = [1, 1]} : vector<4x256xf32> to vector<1x256xf32>
    %36 = vector.broadcast %34 : vector<8x1xf32> to vector<8x256xf32>
    %37 = vector.broadcast %35 : vector<1x256xf32> to vector<8x256xf32>
    %38 = arith.mulf %36, %37 : vector<8x256xf32>
    %39 = arith.addf %33, %38 : vector<8x256xf32>
    %c0_18 = arith.constant 0 : index
    %c112 = arith.constant 112 : index
    %40 = vector.load %arg8[%c0_18, %c112] : memref<8x512xf32, #tpu.memory_space<vmem>>, vector<4x256xf32>
    %41 = vector.extract_strided_slice %7 {offsets = [1, 0], sizes = [1, 256], strides = [1, 1]} : vector<9x256xf32> to vector<1x256xf32>
    %42 = vector.broadcast %41 : vector<1x256xf32> to vector<4x256xf32>
    %43 = arith.mulf %40, %42 : vector<4x256xf32>
    %44 = vector.extract_strided_slice %3 {offsets = [0, 4], sizes = [8, 1], strides = [1, 1]} : vector<8x36xf32> to vector<8x1xf32>
    %45 = vector.extract_strided_slice %43 {offsets = [0, 0], sizes = [1, 256], strides = [1, 1]} : vector<4x256xf32> to vector<1x256xf32>
    %46 = vector.broadcast %44 : vector<8x1xf32> to vector<8x256xf32>
    %47 = vector.broadcast %45 : vector<1x256xf32> to vector<8x256xf32>
    %48 = arith.mulf %46, %47 : vector<8x256xf32>
    %49 = arith.addf %39, %48 : vector<8x256xf32>
    %50 = vector.extract_strided_slice %3 {offsets = [0, 5], sizes = [8, 1], strides = [1, 1]} : vector<8x36xf32> to vector<8x1xf32>
    %51 = vector.extract_strided_slice %43 {offsets = [1, 0], sizes = [1, 256], strides = [1, 1]} : vector<4x256xf32> to vector<1x256xf32>
    %52 = vector.broadcast %50 : vector<8x1xf32> to vector<8x256xf32>
    %53 = vector.broadcast %51 : vector<1x256xf32> to vector<8x256xf32>
    %54 = arith.mulf %52, %53 : vector<8x256xf32>
    %55 = arith.addf %49, %54 : vector<8x256xf32>
    %56 = vector.extract_strided_slice %3 {offsets = [0, 6], sizes = [8, 1], strides = [1, 1]} : vector<8x36xf32> to vector<8x1xf32>
    %57 = vector.extract_strided_slice %43 {offsets = [2, 0], sizes = [1, 256], strides = [1, 1]} : vector<4x256xf32> to vector<1x256xf32>
    %58 = vector.broadcast %56 : vector<8x1xf32> to vector<8x256xf32>
    %59 = vector.broadcast %57 : vector<1x256xf32> to vector<8x256xf32>
    %60 = arith.mulf %58, %59 : vector<8x256xf32>
    %61 = arith.addf %55, %60 : vector<8x256xf32>
    %62 = vector.extract_strided_slice %3 {offsets = [0, 7], sizes = [8, 1], strides = [1, 1]} : vector<8x36xf32> to vector<8x1xf32>
    %63 = vector.extract_strided_slice %43 {offsets = [3, 0], sizes = [1, 256], strides = [1, 1]} : vector<4x256xf32> to vector<1x256xf32>
    %64 = vector.broadcast %62 : vector<8x1xf32> to vector<8x256xf32>
    %65 = vector.broadcast %63 : vector<1x256xf32> to vector<8x256xf32>
    %66 = arith.mulf %64, %65 : vector<8x256xf32>
    %67 = arith.addf %61, %66 : vector<8x256xf32>
    %c0_19 = arith.constant 0 : index
    %c113 = arith.constant 113 : index
    %68 = vector.load %arg8[%c0_19, %c113] : memref<8x512xf32, #tpu.memory_space<vmem>>, vector<4x256xf32>
    %69 = vector.extract_strided_slice %7 {offsets = [2, 0], sizes = [1, 256], strides = [1, 1]} : vector<9x256xf32> to vector<1x256xf32>
    %70 = vector.broadcast %69 : vector<1x256xf32> to vector<4x256xf32>
    %71 = arith.mulf %68, %70 : vector<4x256xf32>
    %72 = vector.extract_strided_slice %3 {offsets = [0, 8], sizes = [8, 1], strides = [1, 1]} : vector<8x36xf32> to vector<8x1xf32>
    %73 = vector.extract_strided_slice %71 {offsets = [0, 0], sizes = [1, 256], strides = [1, 1]} : vector<4x256xf32> to vector<1x256xf32>
    %74 = vector.broadcast %72 : vector<8x1xf32> to vector<8x256xf32>
    %75 = vector.broadcast %73 : vector<1x256xf32> to vector<8x256xf32>
    %76 = arith.mulf %74, %75 : vector<8x256xf32>
    %77 = arith.addf %67, %76 : vector<8x256xf32>
    %78 = vector.extract_strided_slice %3 {offsets = [0, 9], sizes = [8, 1], strides = [1, 1]} : vector<8x36xf32> to vector<8x1xf32>
    %79 = vector.extract_strided_slice %71 {offsets = [1, 0], sizes = [1, 256], strides = [1, 1]} : vector<4x256xf32> to vector<1x256xf32>
    %80 = vector.broadcast %78 : vector<8x1xf32> to vector<8x256xf32>
    %81 = vector.broadcast %79 : vector<1x256xf32> to vector<8x256xf32>
    %82 = arith.mulf %80, %81 : vector<8x256xf32>
    %83 = arith.addf %77, %82 : vector<8x256xf32>
    %84 = vector.extract_strided_slice %3 {offsets = [0, 10], sizes = [8, 1], strides = [1, 1]} : vector<8x36xf32> to vector<8x1xf32>
    %85 = vector.extract_strided_slice %71 {offsets = [2, 0], sizes = [1, 256], strides = [1, 1]} : vector<4x256xf32> to vector<1x256xf32>
    %86 = vector.broadcast %84 : vector<8x1xf32> to vector<8x256xf32>
    %87 = vector.broadcast %85 : vector<1x256xf32> to vector<8x256xf32>
    %88 = arith.mulf %86, %87 : vector<8x256xf32>
    %89 = arith.addf %83, %88 : vector<8x256xf32>
    %90 = vector.extract_strided_slice %3 {offsets = [0, 11], sizes = [8, 1], strides = [1, 1]} : vector<8x36xf32> to vector<8x1xf32>
    %91 = vector.extract_strided_slice %71 {offsets = [3, 0], sizes = [1, 256], strides = [1, 1]} : vector<4x256xf32> to vector<1x256xf32>
    %92 = vector.broadcast %90 : vector<8x1xf32> to vector<8x256xf32>
    %93 = vector.broadcast %91 : vector<1x256xf32> to vector<8x256xf32>
    %94 = arith.mulf %92, %93 : vector<8x256xf32>
    %95 = arith.addf %89, %94 : vector<8x256xf32>
    %c0_20 = arith.constant 0 : index
    %c127 = arith.constant 127 : index
    %96 = vector.load %arg8[%c0_20, %c127] : memref<8x512xf32, #tpu.memory_space<vmem>>, vector<4x256xf32>
    %97 = vector.extract_strided_slice %7 {offsets = [3, 0], sizes = [1, 256], strides = [1, 1]} : vector<9x256xf32> to vector<1x256xf32>
    %98 = vector.broadcast %97 : vector<1x256xf32> to vector<4x256xf32>
    %99 = arith.mulf %96, %98 : vector<4x256xf32>
    %100 = vector.extract_strided_slice %3 {offsets = [0, 12], sizes = [8, 1], strides = [1, 1]} : vector<8x36xf32> to vector<8x1xf32>
    %101 = vector.extract_strided_slice %99 {offsets = [0, 0], sizes = [1, 256], strides = [1, 1]} : vector<4x256xf32> to vector<1x256xf32>
    %102 = vector.broadcast %100 : vector<8x1xf32> to vector<8x256xf32>
    %103 = vector.broadcast %101 : vector<1x256xf32> to vector<8x256xf32>
    %104 = arith.mulf %102, %103 : vector<8x256xf32>
    %105 = arith.addf %95, %104 : vector<8x256xf32>
    %106 = vector.extract_strided_slice %3 {offsets = [0, 13], sizes = [8, 1], strides = [1, 1]} : vector<8x36xf32> to vector<8x1xf32>
    %107 = vector.extract_strided_slice %99 {offsets = [1, 0], sizes = [1, 256], strides = [1, 1]} : vector<4x256xf32> to vector<1x256xf32>
    %108 = vector.broadcast %106 : vector<8x1xf32> to vector<8x256xf32>
    %109 = vector.broadcast %107 : vector<1x256xf32> to vector<8x256xf32>
    %110 = arith.mulf %108, %109 : vector<8x256xf32>
    %111 = arith.addf %105, %110 : vector<8x256xf32>
    %112 = vector.extract_strided_slice %3 {offsets = [0, 14], sizes = [8, 1], strides = [1, 1]} : vector<8x36xf32> to vector<8x1xf32>
    %113 = vector.extract_strided_slice %99 {offsets = [2, 0], sizes = [1, 256], strides = [1, 1]} : vector<4x256xf32> to vector<1x256xf32>
    %114 = vector.broadcast %112 : vector<8x1xf32> to vector<8x256xf32>
    %115 = vector.broadcast %113 : vector<1x256xf32> to vector<8x256xf32>
    %116 = arith.mulf %114, %115 : vector<8x256xf32>
    %117 = arith.addf %111, %116 : vector<8x256xf32>
    %118 = vector.extract_strided_slice %3 {offsets = [0, 15], sizes = [8, 1], strides = [1, 1]} : vector<8x36xf32> to vector<8x1xf32>
    %119 = vector.extract_strided_slice %99 {offsets = [3, 0], sizes = [1, 256], strides = [1, 1]} : vector<4x256xf32> to vector<1x256xf32>
    %120 = vector.broadcast %118 : vector<8x1xf32> to vector<8x256xf32>
    %121 = vector.broadcast %119 : vector<1x256xf32> to vector<8x256xf32>
    %122 = arith.mulf %120, %121 : vector<8x256xf32>
    %123 = arith.addf %117, %122 : vector<8x256xf32>
    %c0_21 = arith.constant 0 : index
    %c128_22 = arith.constant 128 : index
    %124 = vector.load %arg8[%c0_21, %c128_22] : memref<8x512xf32, #tpu.memory_space<vmem>>, vector<4x256xf32>
    %125 = vector.extract_strided_slice %7 {offsets = [4, 0], sizes = [1, 256], strides = [1, 1]} : vector<9x256xf32> to vector<1x256xf32>
    %126 = vector.broadcast %125 : vector<1x256xf32> to vector<4x256xf32>
    %127 = arith.mulf %124, %126 : vector<4x256xf32>
    %128 = vector.extract_strided_slice %3 {offsets = [0, 16], sizes = [8, 1], strides = [1, 1]} : vector<8x36xf32> to vector<8x1xf32>
    %129 = vector.extract_strided_slice %127 {offsets = [0, 0], sizes = [1, 256], strides = [1, 1]} : vector<4x256xf32> to vector<1x256xf32>
    %130 = vector.broadcast %128 : vector<8x1xf32> to vector<8x256xf32>
    %131 = vector.broadcast %129 : vector<1x256xf32> to vector<8x256xf32>
    %132 = arith.mulf %130, %131 : vector<8x256xf32>
    %133 = arith.addf %123, %132 : vector<8x256xf32>
    %134 = vector.extract_strided_slice %3 {offsets = [0, 17], sizes = [8, 1], strides = [1, 1]} : vector<8x36xf32> to vector<8x1xf32>
    %135 = vector.extract_strided_slice %127 {offsets = [1, 0], sizes = [1, 256], strides = [1, 1]} : vector<4x256xf32> to vector<1x256xf32>
    %136 = vector.broadcast %134 : vector<8x1xf32> to vector<8x256xf32>
    %137 = vector.broadcast %135 : vector<1x256xf32> to vector<8x256xf32>
    %138 = arith.mulf %136, %137 : vector<8x256xf32>
    %139 = arith.addf %133, %138 : vector<8x256xf32>
    %140 = vector.extract_strided_slice %3 {offsets = [0, 18], sizes = [8, 1], strides = [1, 1]} : vector<8x36xf32> to vector<8x1xf32>
    %141 = vector.extract_strided_slice %127 {offsets = [2, 0], sizes = [1, 256], strides = [1, 1]} : vector<4x256xf32> to vector<1x256xf32>
    %142 = vector.broadcast %140 : vector<8x1xf32> to vector<8x256xf32>
    %143 = vector.broadcast %141 : vector<1x256xf32> to vector<8x256xf32>
    %144 = arith.mulf %142, %143 : vector<8x256xf32>
    %145 = arith.addf %139, %144 : vector<8x256xf32>
    %146 = vector.extract_strided_slice %3 {offsets = [0, 19], sizes = [8, 1], strides = [1, 1]} : vector<8x36xf32> to vector<8x1xf32>
    %147 = vector.extract_strided_slice %127 {offsets = [3, 0], sizes = [1, 256], strides = [1, 1]} : vector<4x256xf32> to vector<1x256xf32>
    %148 = vector.broadcast %146 : vector<8x1xf32> to vector<8x256xf32>
    %149 = vector.broadcast %147 : vector<1x256xf32> to vector<8x256xf32>
    %150 = arith.mulf %148, %149 : vector<8x256xf32>
    %151 = arith.addf %145, %150 : vector<8x256xf32>
    %c0_23 = arith.constant 0 : index
    %c129 = arith.constant 129 : index
    %152 = vector.load %arg8[%c0_23, %c129] : memref<8x512xf32, #tpu.memory_space<vmem>>, vector<4x256xf32>
    %153 = vector.extract_strided_slice %7 {offsets = [5, 0], sizes = [1, 256], strides = [1, 1]} : vector<9x256xf32> to vector<1x256xf32>
    %154 = vector.broadcast %153 : vector<1x256xf32> to vector<4x256xf32>
    %155 = arith.mulf %152, %154 : vector<4x256xf32>
    %156 = vector.extract_strided_slice %3 {offsets = [0, 20], sizes = [8, 1], strides = [1, 1]} : vector<8x36xf32> to vector<8x1xf32>
    %157 = vector.extract_strided_slice %155 {offsets = [0, 0], sizes = [1, 256], strides = [1, 1]} : vector<4x256xf32> to vector<1x256xf32>
    %158 = vector.broadcast %156 : vector<8x1xf32> to vector<8x256xf32>
    %159 = vector.broadcast %157 : vector<1x256xf32> to vector<8x256xf32>
    %160 = arith.mulf %158, %159 : vector<8x256xf32>
    %161 = arith.addf %151, %160 : vector<8x256xf32>
    %162 = vector.extract_strided_slice %3 {offsets = [0, 21], sizes = [8, 1], strides = [1, 1]} : vector<8x36xf32> to vector<8x1xf32>
    %163 = vector.extract_strided_slice %155 {offsets = [1, 0], sizes = [1, 256], strides = [1, 1]} : vector<4x256xf32> to vector<1x256xf32>
    %164 = vector.broadcast %162 : vector<8x1xf32> to vector<8x256xf32>
    %165 = vector.broadcast %163 : vector<1x256xf32> to vector<8x256xf32>
    %166 = arith.mulf %164, %165 : vector<8x256xf32>
    %167 = arith.addf %161, %166 : vector<8x256xf32>
    %168 = vector.extract_strided_slice %3 {offsets = [0, 22], sizes = [8, 1], strides = [1, 1]} : vector<8x36xf32> to vector<8x1xf32>
    %169 = vector.extract_strided_slice %155 {offsets = [2, 0], sizes = [1, 256], strides = [1, 1]} : vector<4x256xf32> to vector<1x256xf32>
    %170 = vector.broadcast %168 : vector<8x1xf32> to vector<8x256xf32>
    %171 = vector.broadcast %169 : vector<1x256xf32> to vector<8x256xf32>
    %172 = arith.mulf %170, %171 : vector<8x256xf32>
    %173 = arith.addf %167, %172 : vector<8x256xf32>
    %174 = vector.extract_strided_slice %3 {offsets = [0, 23], sizes = [8, 1], strides = [1, 1]} : vector<8x36xf32> to vector<8x1xf32>
    %175 = vector.extract_strided_slice %155 {offsets = [3, 0], sizes = [1, 256], strides = [1, 1]} : vector<4x256xf32> to vector<1x256xf32>
    %176 = vector.broadcast %174 : vector<8x1xf32> to vector<8x256xf32>
    %177 = vector.broadcast %175 : vector<1x256xf32> to vector<8x256xf32>
    %178 = arith.mulf %176, %177 : vector<8x256xf32>
    %179 = arith.addf %173, %178 : vector<8x256xf32>
    %c0_24 = arith.constant 0 : index
    %c143 = arith.constant 143 : index
    %180 = vector.load %arg8[%c0_24, %c143] : memref<8x512xf32, #tpu.memory_space<vmem>>, vector<4x256xf32>
    %181 = vector.extract_strided_slice %7 {offsets = [6, 0], sizes = [1, 256], strides = [1, 1]} : vector<9x256xf32> to vector<1x256xf32>
    %182 = vector.broadcast %181 : vector<1x256xf32> to vector<4x256xf32>
    %183 = arith.mulf %180, %182 : vector<4x256xf32>
    %184 = vector.extract_strided_slice %3 {offsets = [0, 24], sizes = [8, 1], strides = [1, 1]} : vector<8x36xf32> to vector<8x1xf32>
    %185 = vector.extract_strided_slice %183 {offsets = [0, 0], sizes = [1, 256], strides = [1, 1]} : vector<4x256xf32> to vector<1x256xf32>
    %186 = vector.broadcast %184 : vector<8x1xf32> to vector<8x256xf32>
    %187 = vector.broadcast %185 : vector<1x256xf32> to vector<8x256xf32>
    %188 = arith.mulf %186, %187 : vector<8x256xf32>
    %189 = arith.addf %179, %188 : vector<8x256xf32>
    %190 = vector.extract_strided_slice %3 {offsets = [0, 25], sizes = [8, 1], strides = [1, 1]} : vector<8x36xf32> to vector<8x1xf32>
    %191 = vector.extract_strided_slice %183 {offsets = [1, 0], sizes = [1, 256], strides = [1, 1]} : vector<4x256xf32> to vector<1x256xf32>
    %192 = vector.broadcast %190 : vector<8x1xf32> to vector<8x256xf32>
    %193 = vector.broadcast %191 : vector<1x256xf32> to vector<8x256xf32>
    %194 = arith.mulf %192, %193 : vector<8x256xf32>
    %195 = arith.addf %189, %194 : vector<8x256xf32>
    %196 = vector.extract_strided_slice %3 {offsets = [0, 26], sizes = [8, 1], strides = [1, 1]} : vector<8x36xf32> to vector<8x1xf32>
    %197 = vector.extract_strided_slice %183 {offsets = [2, 0], sizes = [1, 256], strides = [1, 1]} : vector<4x256xf32> to vector<1x256xf32>
    %198 = vector.broadcast %196 : vector<8x1xf32> to vector<8x256xf32>
    %199 = vector.broadcast %197 : vector<1x256xf32> to vector<8x256xf32>
    %200 = arith.mulf %198, %199 : vector<8x256xf32>
    %201 = arith.addf %195, %200 : vector<8x256xf32>
    %202 = vector.extract_strided_slice %3 {offsets = [0, 27], sizes = [8, 1], strides = [1, 1]} : vector<8x36xf32> to vector<8x1xf32>
    %203 = vector.extract_strided_slice %183 {offsets = [3, 0], sizes = [1, 256], strides = [1, 1]} : vector<4x256xf32> to vector<1x256xf32>
    %204 = vector.broadcast %202 : vector<8x1xf32> to vector<8x256xf32>
    %205 = vector.broadcast %203 : vector<1x256xf32> to vector<8x256xf32>
    %206 = arith.mulf %204, %205 : vector<8x256xf32>
    %207 = arith.addf %201, %206 : vector<8x256xf32>
    %c0_25 = arith.constant 0 : index
    %c144 = arith.constant 144 : index
    %208 = vector.load %arg8[%c0_25, %c144] : memref<8x512xf32, #tpu.memory_space<vmem>>, vector<4x256xf32>
    %209 = vector.extract_strided_slice %7 {offsets = [7, 0], sizes = [1, 256], strides = [1, 1]} : vector<9x256xf32> to vector<1x256xf32>
    %210 = vector.broadcast %209 : vector<1x256xf32> to vector<4x256xf32>
    %211 = arith.mulf %208, %210 : vector<4x256xf32>
    %212 = vector.extract_strided_slice %3 {offsets = [0, 28], sizes = [8, 1], strides = [1, 1]} : vector<8x36xf32> to vector<8x1xf32>
    %213 = vector.extract_strided_slice %211 {offsets = [0, 0], sizes = [1, 256], strides = [1, 1]} : vector<4x256xf32> to vector<1x256xf32>
    %214 = vector.broadcast %212 : vector<8x1xf32> to vector<8x256xf32>
    %215 = vector.broadcast %213 : vector<1x256xf32> to vector<8x256xf32>
    %216 = arith.mulf %214, %215 : vector<8x256xf32>
    %217 = arith.addf %207, %216 : vector<8x256xf32>
    %218 = vector.extract_strided_slice %3 {offsets = [0, 29], sizes = [8, 1], strides = [1, 1]} : vector<8x36xf32> to vector<8x1xf32>
    %219 = vector.extract_strided_slice %211 {offsets = [1, 0], sizes = [1, 256], strides = [1, 1]} : vector<4x256xf32> to vector<1x256xf32>
    %220 = vector.broadcast %218 : vector<8x1xf32> to vector<8x256xf32>
    %221 = vector.broadcast %219 : vector<1x256xf32> to vector<8x256xf32>
    %222 = arith.mulf %220, %221 : vector<8x256xf32>
    %223 = arith.addf %217, %222 : vector<8x256xf32>
    %224 = vector.extract_strided_slice %3 {offsets = [0, 30], sizes = [8, 1], strides = [1, 1]} : vector<8x36xf32> to vector<8x1xf32>
    %225 = vector.extract_strided_slice %211 {offsets = [2, 0], sizes = [1, 256], strides = [1, 1]} : vector<4x256xf32> to vector<1x256xf32>
    %226 = vector.broadcast %224 : vector<8x1xf32> to vector<8x256xf32>
    %227 = vector.broadcast %225 : vector<1x256xf32> to vector<8x256xf32>
    %228 = arith.mulf %226, %227 : vector<8x256xf32>
    %229 = arith.addf %223, %228 : vector<8x256xf32>
    %230 = vector.extract_strided_slice %3 {offsets = [0, 31], sizes = [8, 1], strides = [1, 1]} : vector<8x36xf32> to vector<8x1xf32>
    %231 = vector.extract_strided_slice %211 {offsets = [3, 0], sizes = [1, 256], strides = [1, 1]} : vector<4x256xf32> to vector<1x256xf32>
    %232 = vector.broadcast %230 : vector<8x1xf32> to vector<8x256xf32>
    %233 = vector.broadcast %231 : vector<1x256xf32> to vector<8x256xf32>
    %234 = arith.mulf %232, %233 : vector<8x256xf32>
    %235 = arith.addf %229, %234 : vector<8x256xf32>
    %c0_26 = arith.constant 0 : index
    %c145 = arith.constant 145 : index
    %236 = vector.load %arg8[%c0_26, %c145] : memref<8x512xf32, #tpu.memory_space<vmem>>, vector<4x256xf32>
    %237 = vector.extract_strided_slice %7 {offsets = [8, 0], sizes = [1, 256], strides = [1, 1]} : vector<9x256xf32> to vector<1x256xf32>
    %238 = vector.broadcast %237 : vector<1x256xf32> to vector<4x256xf32>
    %239 = arith.mulf %236, %238 : vector<4x256xf32>
    %240 = vector.extract_strided_slice %3 {offsets = [0, 32], sizes = [8, 1], strides = [1, 1]} : vector<8x36xf32> to vector<8x1xf32>
    %241 = vector.extract_strided_slice %239 {offsets = [0, 0], sizes = [1, 256], strides = [1, 1]} : vector<4x256xf32> to vector<1x256xf32>
    %242 = vector.broadcast %240 : vector<8x1xf32> to vector<8x256xf32>
    %243 = vector.broadcast %241 : vector<1x256xf32> to vector<8x256xf32>
    %244 = arith.mulf %242, %243 : vector<8x256xf32>
    %245 = arith.addf %235, %244 : vector<8x256xf32>
    %246 = vector.extract_strided_slice %3 {offsets = [0, 33], sizes = [8, 1], strides = [1, 1]} : vector<8x36xf32> to vector<8x1xf32>
    %247 = vector.extract_strided_slice %239 {offsets = [1, 0], sizes = [1, 256], strides = [1, 1]} : vector<4x256xf32> to vector<1x256xf32>
    %248 = vector.broadcast %246 : vector<8x1xf32> to vector<8x256xf32>
    %249 = vector.broadcast %247 : vector<1x256xf32> to vector<8x256xf32>
    %250 = arith.mulf %248, %249 : vector<8x256xf32>
    %251 = arith.addf %245, %250 : vector<8x256xf32>
    %252 = vector.extract_strided_slice %3 {offsets = [0, 34], sizes = [8, 1], strides = [1, 1]} : vector<8x36xf32> to vector<8x1xf32>
    %253 = vector.extract_strided_slice %239 {offsets = [2, 0], sizes = [1, 256], strides = [1, 1]} : vector<4x256xf32> to vector<1x256xf32>
    %254 = vector.broadcast %252 : vector<8x1xf32> to vector<8x256xf32>
    %255 = vector.broadcast %253 : vector<1x256xf32> to vector<8x256xf32>
    %256 = arith.mulf %254, %255 : vector<8x256xf32>
    %257 = arith.addf %251, %256 : vector<8x256xf32>
    %258 = vector.extract_strided_slice %3 {offsets = [0, 35], sizes = [8, 1], strides = [1, 1]} : vector<8x36xf32> to vector<8x1xf32>
    %259 = vector.extract_strided_slice %239 {offsets = [3, 0], sizes = [1, 256], strides = [1, 1]} : vector<4x256xf32> to vector<1x256xf32>
    %260 = vector.broadcast %258 : vector<8x1xf32> to vector<8x256xf32>
    %261 = vector.broadcast %259 : vector<1x256xf32> to vector<8x256xf32>
    %262 = arith.mulf %260, %261 : vector<8x256xf32>
    %263 = arith.addf %257, %262 : vector<8x256xf32>
    %264 = vector.broadcast %4 : vector<8x1xf32> to vector<8x256xf32>
    %265 = arith.addf %263, %264 : vector<8x256xf32>
    %cst_27 = arith.constant 0.000000e+00 : f32
    %266 = vector.broadcast %cst_27 : f32 to vector<8x256xf32>
    %267 = arith.maximumf %265, %266 : vector<8x256xf32>
    %c0_28 = arith.constant 0 : index
    %c128_29 = arith.constant 128 : index
    %268 = vector.load %arg8[%c0_28, %c128_29] : memref<8x512xf32, #tpu.memory_space<vmem>>, vector<8x256xf32>
    tpu.vector_store %arg8[%c0_28, %c128_29], %267 {strides = array<i32>} : memref<8x512xf32, #tpu.memory_space<vmem>>, vector<8x256xf32>,
    %cst_30 = arith.constant 0.000000e+00 : f32
    %269 = vector.broadcast %cst_30 : f32 to vector<8x256xf32>
    %c0_31 = arith.constant 0 : index
    %c111_32 = arith.constant 111 : index
    %270 = vector.load %arg8[%c0_31, %c111_32] : memref<8x512xf32, #tpu.memory_space<vmem>>, vector<8x256xf32>
    %271 = vector.extract_strided_slice %7 {offsets = [0, 0], sizes = [1, 256], strides = [1, 1]} : vector<9x256xf32> to vector<1x256xf32>
    %272 = vector.broadcast %271 : vector<1x256xf32> to vector<8x256xf32>
    %273 = arith.mulf %270, %272 : vector<8x256xf32>
    %274 = vector.extract_strided_slice %5 {offsets = [0, 0], sizes = [8, 1], strides = [1, 1]} : vector<8x72xf32> to vector<8x1xf32>
    %275 = vector.extract_strided_slice %273 {offsets = [0, 0], sizes = [1, 256], strides = [1, 1]} : vector<8x256xf32> to vector<1x256xf32>
    %276 = vector.broadcast %274 : vector<8x1xf32> to vector<8x256xf32>
    %277 = vector.broadcast %275 : vector<1x256xf32> to vector<8x256xf32>
    %278 = arith.mulf %276, %277 : vector<8x256xf32>
    %279 = arith.addf %269, %278 : vector<8x256xf32>
    %280 = vector.extract_strided_slice %5 {offsets = [0, 1], sizes = [8, 1], strides = [1, 1]} : vector<8x72xf32> to vector<8x1xf32>
    %281 = vector.extract_strided_slice %273 {offsets = [1, 0], sizes = [1, 256], strides = [1, 1]} : vector<8x256xf32> to vector<1x256xf32>
    %282 = vector.broadcast %280 : vector<8x1xf32> to vector<8x256xf32>
    %283 = vector.broadcast %281 : vector<1x256xf32> to vector<8x256xf32>
    %284 = arith.mulf %282, %283 : vector<8x256xf32>
    %285 = arith.addf %279, %284 : vector<8x256xf32>
    %286 = vector.extract_strided_slice %5 {offsets = [0, 2], sizes = [8, 1], strides = [1, 1]} : vector<8x72xf32> to vector<8x1xf32>
    %287 = vector.extract_strided_slice %273 {offsets = [2, 0], sizes = [1, 256], strides = [1, 1]} : vector<8x256xf32> to vector<1x256xf32>
    %288 = vector.broadcast %286 : vector<8x1xf32> to vector<8x256xf32>
    %289 = vector.broadcast %287 : vector<1x256xf32> to vector<8x256xf32>
    %290 = arith.mulf %288, %289 : vector<8x256xf32>
    %291 = arith.addf %285, %290 : vector<8x256xf32>
    %292 = vector.extract_strided_slice %5 {offsets = [0, 3], sizes = [8, 1], strides = [1, 1]} : vector<8x72xf32> to vector<8x1xf32>
    %293 = vector.extract_strided_slice %273 {offsets = [3, 0], sizes = [1, 256], strides = [1, 1]} : vector<8x256xf32> to vector<1x256xf32>
    %294 = vector.broadcast %292 : vector<8x1xf32> to vector<8x256xf32>
    %295 = vector.broadcast %293 : vector<1x256xf32> to vector<8x256xf32>
    %296 = arith.mulf %294, %295 : vector<8x256xf32>
    %297 = arith.addf %291, %296 : vector<8x256xf32>
    %298 = vector.extract_strided_slice %5 {offsets = [0, 4], sizes = [8, 1], strides = [1, 1]} : vector<8x72xf32> to vector<8x1xf32>
    %299 = vector.extract_strided_slice %273 {offsets = [4, 0], sizes = [1, 256], strides = [1, 1]} : vector<8x256xf32> to vector<1x256xf32>
    %300 = vector.broadcast %298 : vector<8x1xf32> to vector<8x256xf32>
    %301 = vector.broadcast %299 : vector<1x256xf32> to vector<8x256xf32>
    %302 = arith.mulf %300, %301 : vector<8x256xf32>
    %303 = arith.addf %297, %302 : vector<8x256xf32>
    %304 = vector.extract_strided_slice %5 {offsets = [0, 5], sizes = [8, 1], strides = [1, 1]} : vector<8x72xf32> to vector<8x1xf32>
    %305 = vector.extract_strided_slice %273 {offsets = [5, 0], sizes = [1, 256], strides = [1, 1]} : vector<8x256xf32> to vector<1x256xf32>
    %306 = vector.broadcast %304 : vector<8x1xf32> to vector<8x256xf32>
    %307 = vector.broadcast %305 : vector<1x256xf32> to vector<8x256xf32>
    %308 = arith.mulf %306, %307 : vector<8x256xf32>
    %309 = arith.addf %303, %308 : vector<8x256xf32>
    %310 = vector.extract_strided_slice %5 {offsets = [0, 6], sizes = [8, 1], strides = [1, 1]} : vector<8x72xf32> to vector<8x1xf32>
    %311 = vector.extract_strided_slice %273 {offsets = [6, 0], sizes = [1, 256], strides = [1, 1]} : vector<8x256xf32> to vector<1x256xf32>
    %312 = vector.broadcast %310 : vector<8x1xf32> to vector<8x256xf32>
    %313 = vector.broadcast %311 : vector<1x256xf32> to vector<8x256xf32>
    %314 = arith.mulf %312, %313 : vector<8x256xf32>
    %315 = arith.addf %309, %314 : vector<8x256xf32>
    %316 = vector.extract_strided_slice %5 {offsets = [0, 7], sizes = [8, 1], strides = [1, 1]} : vector<8x72xf32> to vector<8x1xf32>
    %317 = vector.extract_strided_slice %273 {offsets = [7, 0], sizes = [1, 256], strides = [1, 1]} : vector<8x256xf32> to vector<1x256xf32>
    %318 = vector.broadcast %316 : vector<8x1xf32> to vector<8x256xf32>
    %319 = vector.broadcast %317 : vector<1x256xf32> to vector<8x256xf32>
    %320 = arith.mulf %318, %319 : vector<8x256xf32>
    %321 = arith.addf %315, %320 : vector<8x256xf32>
    %c0_33 = arith.constant 0 : index
    %c112_34 = arith.constant 112 : index
    %322 = vector.load %arg8[%c0_33, %c112_34] : memref<8x512xf32, #tpu.memory_space<vmem>>, vector<8x256xf32>
    %323 = vector.extract_strided_slice %7 {offsets = [1, 0], sizes = [1, 256], strides = [1, 1]} : vector<9x256xf32> to vector<1x256xf32>
    %324 = vector.broadcast %323 : vector<1x256xf32> to vector<8x256xf32>
    %325 = arith.mulf %322, %324 : vector<8x256xf32>
    %326 = vector.extract_strided_slice %5 {offsets = [0, 8], sizes = [8, 1], strides = [1, 1]} : vector<8x72xf32> to vector<8x1xf32>
    %327 = vector.extract_strided_slice %325 {offsets = [0, 0], sizes = [1, 256], strides = [1, 1]} : vector<8x256xf32> to vector<1x256xf32>
    %328 = vector.broadcast %326 : vector<8x1xf32> to vector<8x256xf32>
    %329 = vector.broadcast %327 : vector<1x256xf32> to vector<8x256xf32>
    %330 = arith.mulf %328, %329 : vector<8x256xf32>
    %331 = arith.addf %321, %330 : vector<8x256xf32>
    %332 = vector.extract_strided_slice %5 {offsets = [0, 9], sizes = [8, 1], strides = [1, 1]} : vector<8x72xf32> to vector<8x1xf32>
    %333 = vector.extract_strided_slice %325 {offsets = [1, 0], sizes = [1, 256], strides = [1, 1]} : vector<8x256xf32> to vector<1x256xf32>
    %334 = vector.broadcast %332 : vector<8x1xf32> to vector<8x256xf32>
    %335 = vector.broadcast %333 : vector<1x256xf32> to vector<8x256xf32>
    %336 = arith.mulf %334, %335 : vector<8x256xf32>
    %337 = arith.addf %331, %336 : vector<8x256xf32>
    %338 = vector.extract_strided_slice %5 {offsets = [0, 10], sizes = [8, 1], strides = [1, 1]} : vector<8x72xf32> to vector<8x1xf32>
    %339 = vector.extract_strided_slice %325 {offsets = [2, 0], sizes = [1, 256], strides = [1, 1]} : vector<8x256xf32> to vector<1x256xf32>
    %340 = vector.broadcast %338 : vector<8x1xf32> to vector<8x256xf32>
    %341 = vector.broadcast %339 : vector<1x256xf32> to vector<8x256xf32>
    %342 = arith.mulf %340, %341 : vector<8x256xf32>
    %343 = arith.addf %337, %342 : vector<8x256xf32>
    %344 = vector.extract_strided_slice %5 {offsets = [0, 11], sizes = [8, 1], strides = [1, 1]} : vector<8x72xf32> to vector<8x1xf32>
    %345 = vector.extract_strided_slice %325 {offsets = [3, 0], sizes = [1, 256], strides = [1, 1]} : vector<8x256xf32> to vector<1x256xf32>
    %346 = vector.broadcast %344 : vector<8x1xf32> to vector<8x256xf32>
    %347 = vector.broadcast %345 : vector<1x256xf32> to vector<8x256xf32>
    %348 = arith.mulf %346, %347 : vector<8x256xf32>
    %349 = arith.addf %343, %348 : vector<8x256xf32>
    %350 = vector.extract_strided_slice %5 {offsets = [0, 12], sizes = [8, 1], strides = [1, 1]} : vector<8x72xf32> to vector<8x1xf32>
    %351 = vector.extract_strided_slice %325 {offsets = [4, 0], sizes = [1, 256], strides = [1, 1]} : vector<8x256xf32> to vector<1x256xf32>
    %352 = vector.broadcast %350 : vector<8x1xf32> to vector<8x256xf32>
    %353 = vector.broadcast %351 : vector<1x256xf32> to vector<8x256xf32>
    %354 = arith.mulf %352, %353 : vector<8x256xf32>
    %355 = arith.addf %349, %354 : vector<8x256xf32>
    %356 = vector.extract_strided_slice %5 {offsets = [0, 13], sizes = [8, 1], strides = [1, 1]} : vector<8x72xf32> to vector<8x1xf32>
    %357 = vector.extract_strided_slice %325 {offsets = [5, 0], sizes = [1, 256], strides = [1, 1]} : vector<8x256xf32> to vector<1x256xf32>
    %358 = vector.broadcast %356 : vector<8x1xf32> to vector<8x256xf32>
    %359 = vector.broadcast %357 : vector<1x256xf32> to vector<8x256xf32>
    %360 = arith.mulf %358, %359 : vector<8x256xf32>
    %361 = arith.addf %355, %360 : vector<8x256xf32>
    %362 = vector.extract_strided_slice %5 {offsets = [0, 14], sizes = [8, 1], strides = [1, 1]} : vector<8x72xf32> to vector<8x1xf32>
    %363 = vector.extract_strided_slice %325 {offsets = [6, 0], sizes = [1, 256], strides = [1, 1]} : vector<8x256xf32> to vector<1x256xf32>
    %364 = vector.broadcast %362 : vector<8x1xf32> to vector<8x256xf32>
    %365 = vector.broadcast %363 : vector<1x256xf32> to vector<8x256xf32>
    %366 = arith.mulf %364, %365 : vector<8x256xf32>
    %367 = arith.addf %361, %366 : vector<8x256xf32>
    %368 = vector.extract_strided_slice %5 {offsets = [0, 15], sizes = [8, 1], strides = [1, 1]} : vector<8x72xf32> to vector<8x1xf32>
    %369 = vector.extract_strided_slice %325 {offsets = [7, 0], sizes = [1, 256], strides = [1, 1]} : vector<8x256xf32> to vector<1x256xf32>
    %370 = vector.broadcast %368 : vector<8x1xf32> to vector<8x256xf32>
    %371 = vector.broadcast %369 : vector<1x256xf32> to vector<8x256xf32>
    %372 = arith.mulf %370, %371 : vector<8x256xf32>
    %373 = arith.addf %367, %372 : vector<8x256xf32>
    %c0_35 = arith.constant 0 : index
    %c113_36 = arith.constant 113 : index
    %374 = vector.load %arg8[%c0_35, %c113_36] : memref<8x512xf32, #tpu.memory_space<vmem>>, vector<8x256xf32>
    %375 = vector.extract_strided_slice %7 {offsets = [2, 0], sizes = [1, 256], strides = [1, 1]} : vector<9x256xf32> to vector<1x256xf32>
    %376 = vector.broadcast %375 : vector<1x256xf32> to vector<8x256xf32>
    %377 = arith.mulf %374, %376 : vector<8x256xf32>
    %378 = vector.extract_strided_slice %5 {offsets = [0, 16], sizes = [8, 1], strides = [1, 1]} : vector<8x72xf32> to vector<8x1xf32>
    %379 = vector.extract_strided_slice %377 {offsets = [0, 0], sizes = [1, 256], strides = [1, 1]} : vector<8x256xf32> to vector<1x256xf32>
    %380 = vector.broadcast %378 : vector<8x1xf32> to vector<8x256xf32>
    %381 = vector.broadcast %379 : vector<1x256xf32> to vector<8x256xf32>
    %382 = arith.mulf %380, %381 : vector<8x256xf32>
    %383 = arith.addf %373, %382 : vector<8x256xf32>
    %384 = vector.extract_strided_slice %5 {offsets = [0, 17], sizes = [8, 1], strides = [1, 1]} : vector<8x72xf32> to vector<8x1xf32>
    %385 = vector.extract_strided_slice %377 {offsets = [1, 0], sizes = [1, 256], strides = [1, 1]} : vector<8x256xf32> to vector<1x256xf32>
    %386 = vector.broadcast %384 : vector<8x1xf32> to vector<8x256xf32>
    %387 = vector.broadcast %385 : vector<1x256xf32> to vector<8x256xf32>
    %388 = arith.mulf %386, %387 : vector<8x256xf32>
    %389 = arith.addf %383, %388 : vector<8x256xf32>
    %390 = vector.extract_strided_slice %5 {offsets = [0, 18], sizes = [8, 1], strides = [1, 1]} : vector<8x72xf32> to vector<8x1xf32>
    %391 = vector.extract_strided_slice %377 {offsets = [2, 0], sizes = [1, 256], strides = [1, 1]} : vector<8x256xf32> to vector<1x256xf32>
    %392 = vector.broadcast %390 : vector<8x1xf32> to vector<8x256xf32>
    %393 = vector.broadcast %391 : vector<1x256xf32> to vector<8x256xf32>
    %394 = arith.mulf %392, %393 : vector<8x256xf32>
    %395 = arith.addf %389, %394 : vector<8x256xf32>
    %396 = vector.extract_strided_slice %5 {offsets = [0, 19], sizes = [8, 1], strides = [1, 1]} : vector<8x72xf32> to vector<8x1xf32>
    %397 = vector.extract_strided_slice %377 {offsets = [3, 0], sizes = [1, 256], strides = [1, 1]} : vector<8x256xf32> to vector<1x256xf32>
    %398 = vector.broadcast %396 : vector<8x1xf32> to vector<8x256xf32>
    %399 = vector.broadcast %397 : vector<1x256xf32> to vector<8x256xf32>
    %400 = arith.mulf %398, %399 : vector<8x256xf32>
    %401 = arith.addf %395, %400 : vector<8x256xf32>
    %402 = vector.extract_strided_slice %5 {offsets = [0, 20], sizes = [8, 1], strides = [1, 1]} : vector<8x72xf32> to vector<8x1xf32>
    %403 = vector.extract_strided_slice %377 {offsets = [4, 0], sizes = [1, 256], strides = [1, 1]} : vector<8x256xf32> to vector<1x256xf32>
    %404 = vector.broadcast %402 : vector<8x1xf32> to vector<8x256xf32>
    %405 = vector.broadcast %403 : vector<1x256xf32> to vector<8x256xf32>
    %406 = arith.mulf %404, %405 : vector<8x256xf32>
    %407 = arith.addf %401, %406 : vector<8x256xf32>
    %408 = vector.extract_strided_slice %5 {offsets = [0, 21], sizes = [8, 1], strides = [1, 1]} : vector<8x72xf32> to vector<8x1xf32>
    %409 = vector.extract_strided_slice %377 {offsets = [5, 0], sizes = [1, 256], strides = [1, 1]} : vector<8x256xf32> to vector<1x256xf32>
    %410 = vector.broadcast %408 : vector<8x1xf32> to vector<8x256xf32>
    %411 = vector.broadcast %409 : vector<1x256xf32> to vector<8x256xf32>
    %412 = arith.mulf %410, %411 : vector<8x256xf32>
    %413 = arith.addf %407, %412 : vector<8x256xf32>
    %414 = vector.extract_strided_slice %5 {offsets = [0, 22], sizes = [8, 1], strides = [1, 1]} : vector<8x72xf32> to vector<8x1xf32>
    %415 = vector.extract_strided_slice %377 {offsets = [6, 0], sizes = [1, 256], strides = [1, 1]} : vector<8x256xf32> to vector<1x256xf32>
    %416 = vector.broadcast %414 : vector<8x1xf32> to vector<8x256xf32>
    %417 = vector.broadcast %415 : vector<1x256xf32> to vector<8x256xf32>
    %418 = arith.mulf %416, %417 : vector<8x256xf32>
    %419 = arith.addf %413, %418 : vector<8x256xf32>
    %420 = vector.extract_strided_slice %5 {offsets = [0, 23], sizes = [8, 1], strides = [1, 1]} : vector<8x72xf32> to vector<8x1xf32>
    %421 = vector.extract_strided_slice %377 {offsets = [7, 0], sizes = [1, 256], strides = [1, 1]} : vector<8x256xf32> to vector<1x256xf32>
    %422 = vector.broadcast %420 : vector<8x1xf32> to vector<8x256xf32>
    %423 = vector.broadcast %421 : vector<1x256xf32> to vector<8x256xf32>
    %424 = arith.mulf %422, %423 : vector<8x256xf32>
    %425 = arith.addf %419, %424 : vector<8x256xf32>
    %c0_37 = arith.constant 0 : index
    %c127_38 = arith.constant 127 : index
    %426 = vector.load %arg8[%c0_37, %c127_38] : memref<8x512xf32, #tpu.memory_space<vmem>>, vector<8x256xf32>
    %427 = vector.extract_strided_slice %7 {offsets = [3, 0], sizes = [1, 256], strides = [1, 1]} : vector<9x256xf32> to vector<1x256xf32>
    %428 = vector.broadcast %427 : vector<1x256xf32> to vector<8x256xf32>
    %429 = arith.mulf %426, %428 : vector<8x256xf32>
    %430 = vector.extract_strided_slice %5 {offsets = [0, 24], sizes = [8, 1], strides = [1, 1]} : vector<8x72xf32> to vector<8x1xf32>
    %431 = vector.extract_strided_slice %429 {offsets = [0, 0], sizes = [1, 256], strides = [1, 1]} : vector<8x256xf32> to vector<1x256xf32>
    %432 = vector.broadcast %430 : vector<8x1xf32> to vector<8x256xf32>
    %433 = vector.broadcast %431 : vector<1x256xf32> to vector<8x256xf32>
    %434 = arith.mulf %432, %433 : vector<8x256xf32>
    %435 = arith.addf %425, %434 : vector<8x256xf32>
    %436 = vector.extract_strided_slice %5 {offsets = [0, 25], sizes = [8, 1], strides = [1, 1]} : vector<8x72xf32> to vector<8x1xf32>
    %437 = vector.extract_strided_slice %429 {offsets = [1, 0], sizes = [1, 256], strides = [1, 1]} : vector<8x256xf32> to vector<1x256xf32>
    %438 = vector.broadcast %436 : vector<8x1xf32> to vector<8x256xf32>
    %439 = vector.broadcast %437 : vector<1x256xf32> to vector<8x256xf32>
    %440 = arith.mulf %438, %439 : vector<8x256xf32>
    %441 = arith.addf %435, %440 : vector<8x256xf32>
    %442 = vector.extract_strided_slice %5 {offsets = [0, 26], sizes = [8, 1], strides = [1, 1]} : vector<8x72xf32> to vector<8x1xf32>
    %443 = vector.extract_strided_slice %429 {offsets = [2, 0], sizes = [1, 256], strides = [1, 1]} : vector<8x256xf32> to vector<1x256xf32>
    %444 = vector.broadcast %442 : vector<8x1xf32> to vector<8x256xf32>
    %445 = vector.broadcast %443 : vector<1x256xf32> to vector<8x256xf32>
    %446 = arith.mulf %444, %445 : vector<8x256xf32>
    %447 = arith.addf %441, %446 : vector<8x256xf32>
    %448 = vector.extract_strided_slice %5 {offsets = [0, 27], sizes = [8, 1], strides = [1, 1]} : vector<8x72xf32> to vector<8x1xf32>
    %449 = vector.extract_strided_slice %429 {offsets = [3, 0], sizes = [1, 256], strides = [1, 1]} : vector<8x256xf32> to vector<1x256xf32>
    %450 = vector.broadcast %448 : vector<8x1xf32> to vector<8x256xf32>
    %451 = vector.broadcast %449 : vector<1x256xf32> to vector<8x256xf32>
    %452 = arith.mulf %450, %451 : vector<8x256xf32>
    %453 = arith.addf %447, %452 : vector<8x256xf32>
    %454 = vector.extract_strided_slice %5 {offsets = [0, 28], sizes = [8, 1], strides = [1, 1]} : vector<8x72xf32> to vector<8x1xf32>
    %455 = vector.extract_strided_slice %429 {offsets = [4, 0], sizes = [1, 256], strides = [1, 1]} : vector<8x256xf32> to vector<1x256xf32>
    %456 = vector.broadcast %454 : vector<8x1xf32> to vector<8x256xf32>
    %457 = vector.broadcast %455 : vector<1x256xf32> to vector<8x256xf32>
    %458 = arith.mulf %456, %457 : vector<8x256xf32>
    %459 = arith.addf %453, %458 : vector<8x256xf32>
    %460 = vector.extract_strided_slice %5 {offsets = [0, 29], sizes = [8, 1], strides = [1, 1]} : vector<8x72xf32> to vector<8x1xf32>
    %461 = vector.extract_strided_slice %429 {offsets = [5, 0], sizes = [1, 256], strides = [1, 1]} : vector<8x256xf32> to vector<1x256xf32>
    %462 = vector.broadcast %460 : vector<8x1xf32> to vector<8x256xf32>
    %463 = vector.broadcast %461 : vector<1x256xf32> to vector<8x256xf32>
    %464 = arith.mulf %462, %463 : vector<8x256xf32>
    %465 = arith.addf %459, %464 : vector<8x256xf32>
    %466 = vector.extract_strided_slice %5 {offsets = [0, 30], sizes = [8, 1], strides = [1, 1]} : vector<8x72xf32> to vector<8x1xf32>
    %467 = vector.extract_strided_slice %429 {offsets = [6, 0], sizes = [1, 256], strides = [1, 1]} : vector<8x256xf32> to vector<1x256xf32>
    %468 = vector.broadcast %466 : vector<8x1xf32> to vector<8x256xf32>
    %469 = vector.broadcast %467 : vector<1x256xf32> to vector<8x256xf32>
    %470 = arith.mulf %468, %469 : vector<8x256xf32>
    %471 = arith.addf %465, %470 : vector<8x256xf32>
    %472 = vector.extract_strided_slice %5 {offsets = [0, 31], sizes = [8, 1], strides = [1, 1]} : vector<8x72xf32> to vector<8x1xf32>
    %473 = vector.extract_strided_slice %429 {offsets = [7, 0], sizes = [1, 256], strides = [1, 1]} : vector<8x256xf32> to vector<1x256xf32>
    %474 = vector.broadcast %472 : vector<8x1xf32> to vector<8x256xf32>
    %475 = vector.broadcast %473 : vector<1x256xf32> to vector<8x256xf32>
    %476 = arith.mulf %474, %475 : vector<8x256xf32>
    %477 = arith.addf %471, %476 : vector<8x256xf32>
    %c0_39 = arith.constant 0 : index
    %c128_40 = arith.constant 128 : index
    %478 = vector.load %arg8[%c0_39, %c128_40] : memref<8x512xf32, #tpu.memory_space<vmem>>, vector<8x256xf32>
    %479 = vector.extract_strided_slice %7 {offsets = [4, 0], sizes = [1, 256], strides = [1, 1]} : vector<9x256xf32> to vector<1x256xf32>
    %480 = vector.broadcast %479 : vector<1x256xf32> to vector<8x256xf32>
    %481 = arith.mulf %478, %480 : vector<8x256xf32>
    %482 = vector.extract_strided_slice %5 {offsets = [0, 32], sizes = [8, 1], strides = [1, 1]} : vector<8x72xf32> to vector<8x1xf32>
    %483 = vector.extract_strided_slice %481 {offsets = [0, 0], sizes = [1, 256], strides = [1, 1]} : vector<8x256xf32> to vector<1x256xf32>
    %484 = vector.broadcast %482 : vector<8x1xf32> to vector<8x256xf32>
    %485 = vector.broadcast %483 : vector<1x256xf32> to vector<8x256xf32>
    %486 = arith.mulf %484, %485 : vector<8x256xf32>
    %487 = arith.addf %477, %486 : vector<8x256xf32>
    %488 = vector.extract_strided_slice %5 {offsets = [0, 33], sizes = [8, 1], strides = [1, 1]} : vector<8x72xf32> to vector<8x1xf32>
    %489 = vector.extract_strided_slice %481 {offsets = [1, 0], sizes = [1, 256], strides = [1, 1]} : vector<8x256xf32> to vector<1x256xf32>
    %490 = vector.broadcast %488 : vector<8x1xf32> to vector<8x256xf32>
    %491 = vector.broadcast %489 : vector<1x256xf32> to vector<8x256xf32>
    %492 = arith.mulf %490, %491 : vector<8x256xf32>
    %493 = arith.addf %487, %492 : vector<8x256xf32>
    %494 = vector.extract_strided_slice %5 {offsets = [0, 34], sizes = [8, 1], strides = [1, 1]} : vector<8x72xf32> to vector<8x1xf32>
    %495 = vector.extract_strided_slice %481 {offsets = [2, 0], sizes = [1, 256], strides = [1, 1]} : vector<8x256xf32> to vector<1x256xf32>
    %496 = vector.broadcast %494 : vector<8x1xf32> to vector<8x256xf32>
    %497 = vector.broadcast %495 : vector<1x256xf32> to vector<8x256xf32>
    %498 = arith.mulf %496, %497 : vector<8x256xf32>
    %499 = arith.addf %493, %498 : vector<8x256xf32>
    %500 = vector.extract_strided_slice %5 {offsets = [0, 35], sizes = [8, 1], strides = [1, 1]} : vector<8x72xf32> to vector<8x1xf32>
    %501 = vector.extract_strided_slice %481 {offsets = [3, 0], sizes = [1, 256], strides = [1, 1]} : vector<8x256xf32> to vector<1x256xf32>
    %502 = vector.broadcast %500 : vector<8x1xf32> to vector<8x256xf32>
    %503 = vector.broadcast %501 : vector<1x256xf32> to vector<8x256xf32>
    %504 = arith.mulf %502, %503 : vector<8x256xf32>
    %505 = arith.addf %499, %504 : vector<8x256xf32>
    %506 = vector.extract_strided_slice %5 {offsets = [0, 36], sizes = [8, 1], strides = [1, 1]} : vector<8x72xf32> to vector<8x1xf32>
    %507 = vector.extract_strided_slice %481 {offsets = [4, 0], sizes = [1, 256], strides = [1, 1]} : vector<8x256xf32> to vector<1x256xf32>
    %508 = vector.broadcast %506 : vector<8x1xf32> to vector<8x256xf32>
    %509 = vector.broadcast %507 : vector<1x256xf32> to vector<8x256xf32>
    %510 = arith.mulf %508, %509 : vector<8x256xf32>
    %511 = arith.addf %505, %510 : vector<8x256xf32>
    %512 = vector.extract_strided_slice %5 {offsets = [0, 37], sizes = [8, 1], strides = [1, 1]} : vector<8x72xf32> to vector<8x1xf32>
    %513 = vector.extract_strided_slice %481 {offsets = [5, 0], sizes = [1, 256], strides = [1, 1]} : vector<8x256xf32> to vector<1x256xf32>
    %514 = vector.broadcast %512 : vector<8x1xf32> to vector<8x256xf32>
    %515 = vector.broadcast %513 : vector<1x256xf32> to vector<8x256xf32>
    %516 = arith.mulf %514, %515 : vector<8x256xf32>
    %517 = arith.addf %511, %516 : vector<8x256xf32>
    %518 = vector.extract_strided_slice %5 {offsets = [0, 38], sizes = [8, 1], strides = [1, 1]} : vector<8x72xf32> to vector<8x1xf32>
    %519 = vector.extract_strided_slice %481 {offsets = [6, 0], sizes = [1, 256], strides = [1, 1]} : vector<8x256xf32> to vector<1x256xf32>
    %520 = vector.broadcast %518 : vector<8x1xf32> to vector<8x256xf32>
    %521 = vector.broadcast %519 : vector<1x256xf32> to vector<8x256xf32>
    %522 = arith.mulf %520, %521 : vector<8x256xf32>
    %523 = arith.addf %517, %522 : vector<8x256xf32>
    %524 = vector.extract_strided_slice %5 {offsets = [0, 39], sizes = [8, 1], strides = [1, 1]} : vector<8x72xf32> to vector<8x1xf32>
    %525 = vector.extract_strided_slice %481 {offsets = [7, 0], sizes = [1, 256], strides = [1, 1]} : vector<8x256xf32> to vector<1x256xf32>
    %526 = vector.broadcast %524 : vector<8x1xf32> to vector<8x256xf32>
    %527 = vector.broadcast %525 : vector<1x256xf32> to vector<8x256xf32>
    %528 = arith.mulf %526, %527 : vector<8x256xf32>
    %529 = arith.addf %523, %528 : vector<8x256xf32>
    %c0_41 = arith.constant 0 : index
    %c129_42 = arith.constant 129 : index
    %530 = vector.load %arg8[%c0_41, %c129_42] : memref<8x512xf32, #tpu.memory_space<vmem>>, vector<8x256xf32>
    %531 = vector.extract_strided_slice %7 {offsets = [5, 0], sizes = [1, 256], strides = [1, 1]} : vector<9x256xf32> to vector<1x256xf32>
    %532 = vector.broadcast %531 : vector<1x256xf32> to vector<8x256xf32>
    %533 = arith.mulf %530, %532 : vector<8x256xf32>
    %534 = vector.extract_strided_slice %5 {offsets = [0, 40], sizes = [8, 1], strides = [1, 1]} : vector<8x72xf32> to vector<8x1xf32>
    %535 = vector.extract_strided_slice %533 {offsets = [0, 0], sizes = [1, 256], strides = [1, 1]} : vector<8x256xf32> to vector<1x256xf32>
    %536 = vector.broadcast %534 : vector<8x1xf32> to vector<8x256xf32>
    %537 = vector.broadcast %535 : vector<1x256xf32> to vector<8x256xf32>
    %538 = arith.mulf %536, %537 : vector<8x256xf32>
    %539 = arith.addf %529, %538 : vector<8x256xf32>
    %540 = vector.extract_strided_slice %5 {offsets = [0, 41], sizes = [8, 1], strides = [1, 1]} : vector<8x72xf32> to vector<8x1xf32>
    %541 = vector.extract_strided_slice %533 {offsets = [1, 0], sizes = [1, 256], strides = [1, 1]} : vector<8x256xf32> to vector<1x256xf32>
    %542 = vector.broadcast %540 : vector<8x1xf32> to vector<8x256xf32>
    %543 = vector.broadcast %541 : vector<1x256xf32> to vector<8x256xf32>
    %544 = arith.mulf %542, %543 : vector<8x256xf32>
    %545 = arith.addf %539, %544 : vector<8x256xf32>
    %546 = vector.extract_strided_slice %5 {offsets = [0, 42], sizes = [8, 1], strides = [1, 1]} : vector<8x72xf32> to vector<8x1xf32>
    %547 = vector.extract_strided_slice %533 {offsets = [2, 0], sizes = [1, 256], strides = [1, 1]} : vector<8x256xf32> to vector<1x256xf32>
    %548 = vector.broadcast %546 : vector<8x1xf32> to vector<8x256xf32>
    %549 = vector.broadcast %547 : vector<1x256xf32> to vector<8x256xf32>
    %550 = arith.mulf %548, %549 : vector<8x256xf32>
    %551 = arith.addf %545, %550 : vector<8x256xf32>
    %552 = vector.extract_strided_slice %5 {offsets = [0, 43], sizes = [8, 1], strides = [1, 1]} : vector<8x72xf32> to vector<8x1xf32>
    %553 = vector.extract_strided_slice %533 {offsets = [3, 0], sizes = [1, 256], strides = [1, 1]} : vector<8x256xf32> to vector<1x256xf32>
    %554 = vector.broadcast %552 : vector<8x1xf32> to vector<8x256xf32>
    %555 = vector.broadcast %553 : vector<1x256xf32> to vector<8x256xf32>
    %556 = arith.mulf %554, %555 : vector<8x256xf32>
    %557 = arith.addf %551, %556 : vector<8x256xf32>
    %558 = vector.extract_strided_slice %5 {offsets = [0, 44], sizes = [8, 1], strides = [1, 1]} : vector<8x72xf32> to vector<8x1xf32>
    %559 = vector.extract_strided_slice %533 {offsets = [4, 0], sizes = [1, 256], strides = [1, 1]} : vector<8x256xf32> to vector<1x256xf32>
    %560 = vector.broadcast %558 : vector<8x1xf32> to vector<8x256xf32>
    %561 = vector.broadcast %559 : vector<1x256xf32> to vector<8x256xf32>
    %562 = arith.mulf %560, %561 : vector<8x256xf32>
    %563 = arith.addf %557, %562 : vector<8x256xf32>
    %564 = vector.extract_strided_slice %5 {offsets = [0, 45], sizes = [8, 1], strides = [1, 1]} : vector<8x72xf32> to vector<8x1xf32>
    %565 = vector.extract_strided_slice %533 {offsets = [5, 0], sizes = [1, 256], strides = [1, 1]} : vector<8x256xf32> to vector<1x256xf32>
    %566 = vector.broadcast %564 : vector<8x1xf32> to vector<8x256xf32>
    %567 = vector.broadcast %565 : vector<1x256xf32> to vector<8x256xf32>
    %568 = arith.mulf %566, %567 : vector<8x256xf32>
    %569 = arith.addf %563, %568 : vector<8x256xf32>
    %570 = vector.extract_strided_slice %5 {offsets = [0, 46], sizes = [8, 1], strides = [1, 1]} : vector<8x72xf32> to vector<8x1xf32>
    %571 = vector.extract_strided_slice %533 {offsets = [6, 0], sizes = [1, 256], strides = [1, 1]} : vector<8x256xf32> to vector<1x256xf32>
    %572 = vector.broadcast %570 : vector<8x1xf32> to vector<8x256xf32>
    %573 = vector.broadcast %571 : vector<1x256xf32> to vector<8x256xf32>
    %574 = arith.mulf %572, %573 : vector<8x256xf32>
    %575 = arith.addf %569, %574 : vector<8x256xf32>
    %576 = vector.extract_strided_slice %5 {offsets = [0, 47], sizes = [8, 1], strides = [1, 1]} : vector<8x72xf32> to vector<8x1xf32>
    %577 = vector.extract_strided_slice %533 {offsets = [7, 0], sizes = [1, 256], strides = [1, 1]} : vector<8x256xf32> to vector<1x256xf32>
    %578 = vector.broadcast %576 : vector<8x1xf32> to vector<8x256xf32>
    %579 = vector.broadcast %577 : vector<1x256xf32> to vector<8x256xf32>
    %580 = arith.mulf %578, %579 : vector<8x256xf32>
    %581 = arith.addf %575, %580 : vector<8x256xf32>
    %c0_43 = arith.constant 0 : index
    %c143_44 = arith.constant 143 : index
    %582 = vector.load %arg8[%c0_43, %c143_44] : memref<8x512xf32, #tpu.memory_space<vmem>>, vector<8x256xf32>
    %583 = vector.extract_strided_slice %7 {offsets = [6, 0], sizes = [1, 256], strides = [1, 1]} : vector<9x256xf32> to vector<1x256xf32>
    %584 = vector.broadcast %583 : vector<1x256xf32> to vector<8x256xf32>
    %585 = arith.mulf %582, %584 : vector<8x256xf32>
    %586 = vector.extract_strided_slice %5 {offsets = [0, 48], sizes = [8, 1], strides = [1, 1]} : vector<8x72xf32> to vector<8x1xf32>
    %587 = vector.extract_strided_slice %585 {offsets = [0, 0], sizes = [1, 256], strides = [1, 1]} : vector<8x256xf32> to vector<1x256xf32>
    %588 = vector.broadcast %586 : vector<8x1xf32> to vector<8x256xf32>
    %589 = vector.broadcast %587 : vector<1x256xf32> to vector<8x256xf32>
    %590 = arith.mulf %588, %589 : vector<8x256xf32>
    %591 = arith.addf %581, %590 : vector<8x256xf32>
    %592 = vector.extract_strided_slice %5 {offsets = [0, 49], sizes = [8, 1], strides = [1, 1]} : vector<8x72xf32> to vector<8x1xf32>
    %593 = vector.extract_strided_slice %585 {offsets = [1, 0], sizes = [1, 256], strides = [1, 1]} : vector<8x256xf32> to vector<1x256xf32>
    %594 = vector.broadcast %592 : vector<8x1xf32> to vector<8x256xf32>
    %595 = vector.broadcast %593 : vector<1x256xf32> to vector<8x256xf32>
    %596 = arith.mulf %594, %595 : vector<8x256xf32>
    %597 = arith.addf %591, %596 : vector<8x256xf32>
    %598 = vector.extract_strided_slice %5 {offsets = [0, 50], sizes = [8, 1], strides = [1, 1]} : vector<8x72xf32> to vector<8x1xf32>
    %599 = vector.extract_strided_slice %585 {offsets = [2, 0], sizes = [1, 256], strides = [1, 1]} : vector<8x256xf32> to vector<1x256xf32>
    %600 = vector.broadcast %598 : vector<8x1xf32> to vector<8x256xf32>
    %601 = vector.broadcast %599 : vector<1x256xf32> to vector<8x256xf32>
    %602 = arith.mulf %600, %601 : vector<8x256xf32>
    %603 = arith.addf %597, %602 : vector<8x256xf32>
    %604 = vector.extract_strided_slice %5 {offsets = [0, 51], sizes = [8, 1], strides = [1, 1]} : vector<8x72xf32> to vector<8x1xf32>
    %605 = vector.extract_strided_slice %585 {offsets = [3, 0], sizes = [1, 256], strides = [1, 1]} : vector<8x256xf32> to vector<1x256xf32>
    %606 = vector.broadcast %604 : vector<8x1xf32> to vector<8x256xf32>
    %607 = vector.broadcast %605 : vector<1x256xf32> to vector<8x256xf32>
    %608 = arith.mulf %606, %607 : vector<8x256xf32>
    %609 = arith.addf %603, %608 : vector<8x256xf32>
    %610 = vector.extract_strided_slice %5 {offsets = [0, 52], sizes = [8, 1], strides = [1, 1]} : vector<8x72xf32> to vector<8x1xf32>
    %611 = vector.extract_strided_slice %585 {offsets = [4, 0], sizes = [1, 256], strides = [1, 1]} : vector<8x256xf32> to vector<1x256xf32>
    %612 = vector.broadcast %610 : vector<8x1xf32> to vector<8x256xf32>
    %613 = vector.broadcast %611 : vector<1x256xf32> to vector<8x256xf32>
    %614 = arith.mulf %612, %613 : vector<8x256xf32>
    %615 = arith.addf %609, %614 : vector<8x256xf32>
    %616 = vector.extract_strided_slice %5 {offsets = [0, 53], sizes = [8, 1], strides = [1, 1]} : vector<8x72xf32> to vector<8x1xf32>
    %617 = vector.extract_strided_slice %585 {offsets = [5, 0], sizes = [1, 256], strides = [1, 1]} : vector<8x256xf32> to vector<1x256xf32>
    %618 = vector.broadcast %616 : vector<8x1xf32> to vector<8x256xf32>
    %619 = vector.broadcast %617 : vector<1x256xf32> to vector<8x256xf32>
    %620 = arith.mulf %618, %619 : vector<8x256xf32>
    %621 = arith.addf %615, %620 : vector<8x256xf32>
    %622 = vector.extract_strided_slice %5 {offsets = [0, 54], sizes = [8, 1], strides = [1, 1]} : vector<8x72xf32> to vector<8x1xf32>
    %623 = vector.extract_strided_slice %585 {offsets = [6, 0], sizes = [1, 256], strides = [1, 1]} : vector<8x256xf32> to vector<1x256xf32>
    %624 = vector.broadcast %622 : vector<8x1xf32> to vector<8x256xf32>
    %625 = vector.broadcast %623 : vector<1x256xf32> to vector<8x256xf32>
    %626 = arith.mulf %624, %625 : vector<8x256xf32>
    %627 = arith.addf %621, %626 : vector<8x256xf32>
    %628 = vector.extract_strided_slice %5 {offsets = [0, 55], sizes = [8, 1], strides = [1, 1]} : vector<8x72xf32> to vector<8x1xf32>
    %629 = vector.extract_strided_slice %585 {offsets = [7, 0], sizes = [1, 256], strides = [1, 1]} : vector<8x256xf32> to vector<1x256xf32>
    %630 = vector.broadcast %628 : vector<8x1xf32> to vector<8x256xf32>
    %631 = vector.broadcast %629 : vector<1x256xf32> to vector<8x256xf32>
    %632 = arith.mulf %630, %631 : vector<8x256xf32>
    %633 = arith.addf %627, %632 : vector<8x256xf32>
    %c0_45 = arith.constant 0 : index
    %c144_46 = arith.constant 144 : index
    %634 = vector.load %arg8[%c0_45, %c144_46] : memref<8x512xf32, #tpu.memory_space<vmem>>, vector<8x256xf32>
    %635 = vector.extract_strided_slice %7 {offsets = [7, 0], sizes = [1, 256], strides = [1, 1]} : vector<9x256xf32> to vector<1x256xf32>
    %636 = vector.broadcast %635 : vector<1x256xf32> to vector<8x256xf32>
    %637 = arith.mulf %634, %636 : vector<8x256xf32>
    %638 = vector.extract_strided_slice %5 {offsets = [0, 56], sizes = [8, 1], strides = [1, 1]} : vector<8x72xf32> to vector<8x1xf32>
    %639 = vector.extract_strided_slice %637 {offsets = [0, 0], sizes = [1, 256], strides = [1, 1]} : vector<8x256xf32> to vector<1x256xf32>
    %640 = vector.broadcast %638 : vector<8x1xf32> to vector<8x256xf32>
    %641 = vector.broadcast %639 : vector<1x256xf32> to vector<8x256xf32>
    %642 = arith.mulf %640, %641 : vector<8x256xf32>
    %643 = arith.addf %633, %642 : vector<8x256xf32>
    %644 = vector.extract_strided_slice %5 {offsets = [0, 57], sizes = [8, 1], strides = [1, 1]} : vector<8x72xf32> to vector<8x1xf32>
    %645 = vector.extract_strided_slice %637 {offsets = [1, 0], sizes = [1, 256], strides = [1, 1]} : vector<8x256xf32> to vector<1x256xf32>
    %646 = vector.broadcast %644 : vector<8x1xf32> to vector<8x256xf32>
    %647 = vector.broadcast %645 : vector<1x256xf32> to vector<8x256xf32>
    %648 = arith.mulf %646, %647 : vector<8x256xf32>
    %649 = arith.addf %643, %648 : vector<8x256xf32>
    %650 = vector.extract_strided_slice %5 {offsets = [0, 58], sizes = [8, 1], strides = [1, 1]} : vector<8x72xf32> to vector<8x1xf32>
    %651 = vector.extract_strided_slice %637 {offsets = [2, 0], sizes = [1, 256], strides = [1, 1]} : vector<8x256xf32> to vector<1x256xf32>
    %652 = vector.broadcast %650 : vector<8x1xf32> to vector<8x256xf32>
    %653 = vector.broadcast %651 : vector<1x256xf32> to vector<8x256xf32>
    %654 = arith.mulf %652, %653 : vector<8x256xf32>
    %655 = arith.addf %649, %654 : vector<8x256xf32>
    %656 = vector.extract_strided_slice %5 {offsets = [0, 59], sizes = [8, 1], strides = [1, 1]} : vector<8x72xf32> to vector<8x1xf32>
    %657 = vector.extract_strided_slice %637 {offsets = [3, 0], sizes = [1, 256], strides = [1, 1]} : vector<8x256xf32> to vector<1x256xf32>
    %658 = vector.broadcast %656 : vector<8x1xf32> to vector<8x256xf32>
    %659 = vector.broadcast %657 : vector<1x256xf32> to vector<8x256xf32>
    %660 = arith.mulf %658, %659 : vector<8x256xf32>
    %661 = arith.addf %655, %660 : vector<8x256xf32>
    %662 = vector.extract_strided_slice %5 {offsets = [0, 60], sizes = [8, 1], strides = [1, 1]} : vector<8x72xf32> to vector<8x1xf32>
    %663 = vector.extract_strided_slice %637 {offsets = [4, 0], sizes = [1, 256], strides = [1, 1]} : vector<8x256xf32> to vector<1x256xf32>
    %664 = vector.broadcast %662 : vector<8x1xf32> to vector<8x256xf32>
    %665 = vector.broadcast %663 : vector<1x256xf32> to vector<8x256xf32>
    %666 = arith.mulf %664, %665 : vector<8x256xf32>
    %667 = arith.addf %661, %666 : vector<8x256xf32>
    %668 = vector.extract_strided_slice %5 {offsets = [0, 61], sizes = [8, 1], strides = [1, 1]} : vector<8x72xf32> to vector<8x1xf32>
    %669 = vector.extract_strided_slice %637 {offsets = [5, 0], sizes = [1, 256], strides = [1, 1]} : vector<8x256xf32> to vector<1x256xf32>
    %670 = vector.broadcast %668 : vector<8x1xf32> to vector<8x256xf32>
    %671 = vector.broadcast %669 : vector<1x256xf32> to vector<8x256xf32>
    %672 = arith.mulf %670, %671 : vector<8x256xf32>
    %673 = arith.addf %667, %672 : vector<8x256xf32>
    %674 = vector.extract_strided_slice %5 {offsets = [0, 62], sizes = [8, 1], strides = [1, 1]} : vector<8x72xf32> to vector<8x1xf32>
    %675 = vector.extract_strided_slice %637 {offsets = [6, 0], sizes = [1, 256], strides = [1, 1]} : vector<8x256xf32> to vector<1x256xf32>
    %676 = vector.broadcast %674 : vector<8x1xf32> to vector<8x256xf32>
    %677 = vector.broadcast %675 : vector<1x256xf32> to vector<8x256xf32>
    %678 = arith.mulf %676, %677 : vector<8x256xf32>
    %679 = arith.addf %673, %678 : vector<8x256xf32>
    %680 = vector.extract_strided_slice %5 {offsets = [0, 63], sizes = [8, 1], strides = [1, 1]} : vector<8x72xf32> to vector<8x1xf32>
    %681 = vector.extract_strided_slice %637 {offsets = [7, 0], sizes = [1, 256], strides = [1, 1]} : vector<8x256xf32> to vector<1x256xf32>
    %682 = vector.broadcast %680 : vector<8x1xf32> to vector<8x256xf32>
    %683 = vector.broadcast %681 : vector<1x256xf32> to vector<8x256xf32>
    %684 = arith.mulf %682, %683 : vector<8x256xf32>
    %685 = arith.addf %679, %684 : vector<8x256xf32>
    %c0_47 = arith.constant 0 : index
    %c145_48 = arith.constant 145 : index
    %686 = vector.load %arg8[%c0_47, %c145_48] : memref<8x512xf32, #tpu.memory_space<vmem>>, vector<8x256xf32>
    %687 = vector.extract_strided_slice %7 {offsets = [8, 0], sizes = [1, 256], strides = [1, 1]} : vector<9x256xf32> to vector<1x256xf32>
    %688 = vector.broadcast %687 : vector<1x256xf32> to vector<8x256xf32>
    %689 = arith.mulf %686, %688 : vector<8x256xf32>
    %690 = vector.extract_strided_slice %5 {offsets = [0, 64], sizes = [8, 1], strides = [1, 1]} : vector<8x72xf32> to vector<8x1xf32>
    %691 = vector.extract_strided_slice %689 {offsets = [0, 0], sizes = [1, 256], strides = [1, 1]} : vector<8x256xf32> to vector<1x256xf32>
    %692 = vector.broadcast %690 : vector<8x1xf32> to vector<8x256xf32>
    %693 = vector.broadcast %691 : vector<1x256xf32> to vector<8x256xf32>
    %694 = arith.mulf %692, %693 : vector<8x256xf32>
    %695 = arith.addf %685, %694 : vector<8x256xf32>
    %696 = vector.extract_strided_slice %5 {offsets = [0, 65], sizes = [8, 1], strides = [1, 1]} : vector<8x72xf32> to vector<8x1xf32>
    %697 = vector.extract_strided_slice %689 {offsets = [1, 0], sizes = [1, 256], strides = [1, 1]} : vector<8x256xf32> to vector<1x256xf32>
    %698 = vector.broadcast %696 : vector<8x1xf32> to vector<8x256xf32>
    %699 = vector.broadcast %697 : vector<1x256xf32> to vector<8x256xf32>
    %700 = arith.mulf %698, %699 : vector<8x256xf32>
    %701 = arith.addf %695, %700 : vector<8x256xf32>
    %702 = vector.extract_strided_slice %5 {offsets = [0, 66], sizes = [8, 1], strides = [1, 1]} : vector<8x72xf32> to vector<8x1xf32>
    %703 = vector.extract_strided_slice %689 {offsets = [2, 0], sizes = [1, 256], strides = [1, 1]} : vector<8x256xf32> to vector<1x256xf32>
    %704 = vector.broadcast %702 : vector<8x1xf32> to vector<8x256xf32>
    %705 = vector.broadcast %703 : vector<1x256xf32> to vector<8x256xf32>
    %706 = arith.mulf %704, %705 : vector<8x256xf32>
    %707 = arith.addf %701, %706 : vector<8x256xf32>
    %708 = vector.extract_strided_slice %5 {offsets = [0, 67], sizes = [8, 1], strides = [1, 1]} : vector<8x72xf32> to vector<8x1xf32>
    %709 = vector.extract_strided_slice %689 {offsets = [3, 0], sizes = [1, 256], strides = [1, 1]} : vector<8x256xf32> to vector<1x256xf32>
    %710 = vector.broadcast %708 : vector<8x1xf32> to vector<8x256xf32>
    %711 = vector.broadcast %709 : vector<1x256xf32> to vector<8x256xf32>
    %712 = arith.mulf %710, %711 : vector<8x256xf32>
    %713 = arith.addf %707, %712 : vector<8x256xf32>
    %714 = vector.extract_strided_slice %5 {offsets = [0, 68], sizes = [8, 1], strides = [1, 1]} : vector<8x72xf32> to vector<8x1xf32>
    %715 = vector.extract_strided_slice %689 {offsets = [4, 0], sizes = [1, 256], strides = [1, 1]} : vector<8x256xf32> to vector<1x256xf32>
    %716 = vector.broadcast %714 : vector<8x1xf32> to vector<8x256xf32>
    %717 = vector.broadcast %715 : vector<1x256xf32> to vector<8x256xf32>
    %718 = arith.mulf %716, %717 : vector<8x256xf32>
    %719 = arith.addf %713, %718 : vector<8x256xf32>
    %720 = vector.extract_strided_slice %5 {offsets = [0, 69], sizes = [8, 1], strides = [1, 1]} : vector<8x72xf32> to vector<8x1xf32>
    %721 = vector.extract_strided_slice %689 {offsets = [5, 0], sizes = [1, 256], strides = [1, 1]} : vector<8x256xf32> to vector<1x256xf32>
    %722 = vector.broadcast %720 : vector<8x1xf32> to vector<8x256xf32>
    %723 = vector.broadcast %721 : vector<1x256xf32> to vector<8x256xf32>
    %724 = arith.mulf %722, %723 : vector<8x256xf32>
    %725 = arith.addf %719, %724 : vector<8x256xf32>
    %726 = vector.extract_strided_slice %5 {offsets = [0, 70], sizes = [8, 1], strides = [1, 1]} : vector<8x72xf32> to vector<8x1xf32>
    %727 = vector.extract_strided_slice %689 {offsets = [6, 0], sizes = [1, 256], strides = [1, 1]} : vector<8x256xf32> to vector<1x256xf32>
    %728 = vector.broadcast %726 : vector<8x1xf32> to vector<8x256xf32>
    %729 = vector.broadcast %727 : vector<1x256xf32> to vector<8x256xf32>
    %730 = arith.mulf %728, %729 : vector<8x256xf32>
    %731 = arith.addf %725, %730 : vector<8x256xf32>
    %732 = vector.extract_strided_slice %5 {offsets = [0, 71], sizes = [8, 1], strides = [1, 1]} : vector<8x72xf32> to vector<8x1xf32>
    %733 = vector.extract_strided_slice %689 {offsets = [7, 0], sizes = [1, 256], strides = [1, 1]} : vector<8x256xf32> to vector<1x256xf32>
    %734 = vector.broadcast %732 : vector<8x1xf32> to vector<8x256xf32>
    %735 = vector.broadcast %733 : vector<1x256xf32> to vector<8x256xf32>
    %736 = arith.mulf %734, %735 : vector<8x256xf32>
    %737 = arith.addf %731, %736 : vector<8x256xf32>
    %738 = vector.broadcast %6 : vector<8x1xf32> to vector<8x256xf32>
    %739 = arith.addf %737, %738 : vector<8x256xf32>
    %cst_49 = arith.constant 0.000000e+00 : f32
    %740 = vector.broadcast %cst_49 : f32 to vector<8x256xf32>
    %741 = arith.maximumf %739, %740 : vector<8x256xf32>
    %c0_50 = arith.constant 0 : index
    %c0_51 = arith.constant 0 : index
    %c0_52 = arith.constant 0 : index
    %742 = vector.load %arg7[%c0_50, %c0_51, %c0_52] : memref<1x8x256xf32, #tpu.memory_space<vmem>>, vector<1x8x256xf32>
    %743 = vector.shape_cast %742 : vector<1x8x256xf32> to vector<8x256xf32>
    %744 = vector.shape_cast %741 : vector<8x256xf32> to vector<1x8x256xf32>
    tpu.vector_store %arg7[%c0_50, %c0_51, %c0_52], %744 {strides = array<i32>} : memref<1x8x256xf32, #tpu.memory_space<vmem>>, vector<1x8x256xf32>,
    return
  }
  func.func @transform_0(%arg0: i32) -> (i32, i32, i32) {
    %c0_i32 = arith.constant 0 : i32
    %c0_i32_0 = arith.constant 0 : i32
    %c0_i32_1 = arith.constant 0 : i32
    return %arg0, %c0_i32, %c0_i32_0 : i32, i32, i32
  }
  func.func @transform_1(%arg0: i32) -> (i32, i32) {
    %c0_i32 = arith.constant 0 : i32
    %c0_i32_0 = arith.constant 0 : i32
    %c0_i32_1 = arith.constant 0 : i32
    return %c0_i32, %c0_i32_0 : i32, i32
  }
  func.func @transform_2(%arg0: i32) -> (i32, i32) {
    %c0_i32 = arith.constant 0 : i32
    %c0_i32_0 = arith.constant 0 : i32
    %c0_i32_1 = arith.constant 0 : i32
    return %c0_i32, %c0_i32_0 : i32, i32
  }
  func.func @transform_3(%arg0: i32) -> (i32, i32) {
    %c0_i32 = arith.constant 0 : i32
    %c0_i32_0 = arith.constant 0 : i32
    %c0_i32_1 = arith.constant 0 : i32
    return %c0_i32, %c0_i32_0 : i32, i32
  }
  func.func @transform_4(%arg0: i32) -> (i32, i32) {
    %c0_i32 = arith.constant 0 : i32
    %c0_i32_0 = arith.constant 0 : i32
    %c0_i32_1 = arith.constant 0 : i32
    return %c0_i32, %c0_i32_0 : i32, i32
  }
  func.func @transform_5(%arg0: i32) -> (i32, i32) {
    %c0_i32 = arith.constant 0 : i32
    %c0_i32_0 = arith.constant 0 : i32
    %c0_i32_1 = arith.constant 0 : i32
    return %c0_i32, %c0_i32_0 : i32, i32
  }
  func.func @transform_6(%arg0: i32) -> (i32, i32, i32) {
    %c0_i32 = arith.constant 0 : i32
    %c0_i32_0 = arith.constant 0 : i32
    %c0_i32_1 = arith.constant 0 : i32
    return %arg0, %c0_i32, %c0_i32_0 : i32, i32, i32
  }
}

</mosaic_0001>

<bundles_post_ra>
// kernel: inconv_pallas.1
= control target key start
LH: loop header
LB: loop body
LE: loop exit
PB: predicated region body
PF: predicated region fallthrough
CT: control target
= control target key end

     0   :  { %s3592_s21 = smov 0   ;;  %s5468_s0 = inlined_call_operand.vmem [shape: f32[2,4,256], index: 0, kind: input, shape index: {}]   ;;  %s5469_s1 = inlined_call_operand.vmem [shape: f32[8,36], index: 1, kind: input, shape index: {}]   ;;  %s5470_s2 = inlined_call_operand.vmem [shape: f32[8,1], index: 2, kind: input, shape index: {}]   ;;  %s5471_s3 = inlined_call_operand.vmem [shape: f32[8,72], index: 3, kind: input, shape index: {}]   ;;  %s5472_s4 = inlined_call_operand.vmem [shape: f32[8,1], index: 4, kind: input, shape index: {}]   ;;  %s5473_s5 = inlined_call_operand.vmem [shape: f32[9,256], index: 5, kind: input, shape index: {}]   ;;  %s5474_s6 = inlined_call_operand.vmem [shape: f32[2,8,256], index: 6, kind: output, shape index: {}]  }
   0x1 LB: > { %s3231_s22 = sadd.s32 4294967295, %s3469_s21   ;;  %p3235_p0 = scmp.ge.s32.totalorder %s3469_s21, 1  ;;  %s3469_s21 = sphi %s3592_s21, %s16_s21  }
   0x2   : > { %p212_p1 = scmp.lt.s32.totalorder %s3469_s21, 3 }
   0x4   : > { %p213_p2 = pnand %p3235_p0, %p212_p1 }
   0x6   : > { %216 = sbr.rel (%p213_p2) target bundleno = 8724 (0x2214), region = 44 }
   0xb   : > { %v3603_v0 = vld [vmem:[%s5469_s1] sm:$0xff]  ;;  %v5496_v2 = vmov 0   ;;  %v5495_v4 = vmov 2   ;;  %s3473_s27 = smov 111   ;;  %v3619_v5 = vld [vmem:[%s5473_s5 + $0x8] sm:$0xff]  ;;  %v5494_v6 = vmov 5  }
   0xc   : > { %v3608_v1 = vld [vmem:[%s5473_s5] sm:$0xff]  ;;  %3338 = vset.pattern.permute.xlu1 %v5496_v2  ;;  %3340 = vset.pattern.permute.xlu2 %v5495_v4  ;;  %5607 = vst [vmem:[#allocation4_spill] sm:$0xff] %v3619_v5  ;;  %v275_v7 = vperm.slane %v3619_v5, 0  ;;  %v5498_v8 = vmov 1   ;;  %v5493_v9 = vmov 3   ;;  %v344_v11 = vperm.slane %v3619_v5, 1 }
   0xd   : > { %5606 = vst [vmem:[#allocation3_spill] sm:$0xff] %v3608_v1  ;;  %v274_v3 = vperm.slane %v3608_v1, 0  ;;  %292 = vperm.xlu1 %3338, %v3603_v0   ;;  %318 = vperm.xlu2 %3340, %v3603_v0   ;;  %v343_v10 = vperm.slane %v3608_v1, 1  ;;  %s3477_s30 = smov 112   ;;  %v5492_v12 = vmov 4   ;;  %v5485_v13 = vmov 8  }
   0xe   : > { %3343 = vset.pattern.permute.xlu0 %v5494_v6  ;;  %v5489_v14 = vmov 6   ;;  %v594_v15 = vperm.slane %v3619_v5, 3  ;;  %v468_v16 = vperm.slane %v3608_v1, 2  ;;  %v5487_v17 = vmov 7   ;;  %s3482_s7 = smov 127   ;;  %s3483_s8 = smov 113  }
   0xf   : > { %278 = vrot.lane.b32.xlu0 %v274_v3, %s3473_s27  ;;  %v5484_v18 = vmov 9   ;;  %v469_v19 = vperm.slane %v3619_v5, 2  ;;  %v5490_v20 = vmov 10   ;;  %v5483_v21 = vmov 11   ;;  %p242_p3 = scmp.lt.s32.totalorder %s3231_s22, 1  ;;  %s3490_s13 = smov 126  }
  0x10   : > { %v593_v22 = vperm.slane %v3608_v1, 3  ;;  %v5482_v23 = vmov 12   ;;  %v3488_v24 = vmov 0.0   ;;  %v5477_v62 = vmov 13   ;;  %s3498_s14 = smov 1   ;;  %s3500_s15 = smov 110  }
  0x11   : > { %s5844_s22 = smov (!%p242_p3, %s3231_s22), 1  ;;  %252 = vst [vmem:[#allocation2 + $0x8] sm:$0xff] %v3488_v24  ;;  %vm476_vm0 = vcmask 924672   ;;  %vm351_vm1 = vcmask 916480   ;;  %vm378_vm2 = vcmask 1039360   ;;  %vm815_vm3 = vcmask 7168  }
  0x12   : > { %s3242_s9 = sshll.u32 %s5844_s22, 3  ;;  %253 = vst [vmem:[#allocation2] sm:$0xff] %v3488_v24  ;;  %s3504_s16 = smov 15   ;;  %vm940_vm4 = vcmask 121856   ;;  %vm1065_vm5 = vcmask 130048   ;;  %vm1190_vm6 = vcmask 138240  }
  0x13   : > { %s246_s12 = scalar_lea.vmem %s5468_s0, %s3242_s9  ;;  %s3506_s17 = smov 96   ;;  %vm282_vm7 = vcmask 908288   ;;  %vm503_vm8 = vcmask 1031168   ;;  %vm842_vm9 = vcmask 900096   ;;  %vm967_vm10 = vcmask 785408  }
  0x14   : > { %v262_v25 = vld [vmem:[%s246_s12] sm:$0xff]  ;;  %s3510_s18 = smov 16   ;;  %s3512_s19 = smov 95   ;;  %vm1092_vm11 = vcmask 777216   ;;  %vm1217_vm12 = vcmask 769024  }
  0x15   : > { %3339 = vset.pattern.permute.xlu1 %v5498_v8  ;;  %3341 = vset.pattern.permute.xlu2 %v5493_v9  ;;  %264 = vst [vmem:[#allocation1] ss:$2 sm:$0xff] %v262_v25  ;;  %s3516_s29 = smov 17  }
  0x16   : > { %305 = vperm.xlu1 %3339, %v3603_v0   ;;  %331 = vperm.xlu2 %3341, %v3603_v0  }
  0x17   : > { %280 = vrot.lane.b32.xlu0 %v275_v7, %s3473_s27 }
  0x18   : > { %v3681_v36 = vld [vmem:[#allocation2 + $0x8] sm:$0xf] }
  0x1c   : > { %v266_v26 = vld.sshfl [vmem:[#allocation1 + $0x8] sm:$0xff pattern:$0x75316420]  ;;  %v265_v27 = vld.sshfl [vmem:[#allocation1] sm:$0xff pattern:$0x75316420] }
  0x1d   : > { %270 = vst [vmem:[#allocation2 + $0x18] sm:$0xf] %v266_v26 }
  0x1e   : > { %349 = vrot.lane.b32.xlu1 %v344_v11, %s3477_s30  ;;  %3342 = vset.pattern.permute.xlu2 %v5492_v12  ;;  %269 = vst [vmem:[#allocation2 + $0x10] sm:$0xf] %v265_v27 }
  0x1f   : > { %347 = vrot.lane.b32.xlu0 %v343_v10, %s3477_s30  ;;  %3346 = vset.pattern.permute.xlu1 %v5485_v13 }
  0x20   : > { %360 = vperm.xlu2 %3342, %v3603_v0  }
  0x24   : > { %v3683_v37 = vld [vmem:[#allocation2 + $0x18] sm:$0xf] }
  0x25   : > { %v3733_v24 = vld [vmem:[#allocation2 + $0x10] sm:$0xf] }
  0x26   : > { %485 = vperm.xlu1 %3346, %v3603_v0   ;;  %v3925_v2 = vld [vmem:[#allocation2 + $0x10] sm:$0xf] }
  0x27   : > { %388 = vperm.xlu0 %3343, %v3603_v0  }
  0x28   : > { %3344 = vset.pattern.permute.xlu2 %v5489_v14 }
  0x29   : > { %415 = vperm.xlu2 %3344, %v3603_v0  }
  0x2e   : > { %599 = vrot.lane.b32.xlu1 %v594_v15, %s3482_s7 }
  0x2f   : > { %3345 = vset.pattern.permute.xlu0 %v5487_v17 }
  0x30   : > { %442 = vperm.xlu0 %3345, %v3603_v0  }
  0x31   : > { %472 = vrot.lane.b32.xlu2 %v468_v16, %s3483_s8 }
  0x32   : > { %3347 = vset.pattern.permute.xlu2 %v5484_v18 }
  0x38   : > { %474 = vrot.lane.b32.xlu0 %v469_v19, %s3483_s8  ;;  %s3518_s8 = smov 94  }
  0x39   : > { %3348 = vset.pattern.permute.xlu0 %v5490_v20  ;;  %513 = vperm.xlu2 %3347, %v3603_v0  }
  0x40   : > { %540 = vperm.xlu0 %3348, %v3603_v0  }
  0x41   : > { %3349 = vset.pattern.permute.xlu2 %v5483_v21 }
  0x42   : > { %567 = vperm.xlu2 %3349, %v3603_v0  }
  0x48   : > { %597 = vrot.lane.b32.xlu0 %v593_v22, %s3482_s7 }
  0x49   : > { %3351 = vset.pattern.permute.xlu0 %v5477_v62 }
  0x4a   : > { %3350 = vset.pattern.permute.xlu2 %v5482_v23 }
  0x4b   : > { %609 = vperm.xlu2 %3350, %v3603_v0  }
  0x67   : > { %v3665_v28 = vpop.permute.xlu2 %318 }
  0x70   : > { %v3667_v29 = vpop.permute.xlu2 %331 }
  0x7a   : > { %v3673_v32 = vpop.permute.xlu2 %360 }
  0x7f   : > { %v3669_v30 = vpop.permute.xlu1 %292 }
  0x81   : > { %v3671_v31 = vpop.permute.xlu0 %278 }
  0x82   : > { %5608 = vst [vmem:[#allocation5_spill] sm:$0xff] %v3671_v31 }
  0x83   : > { %v3679_v35 = vpop.permute.xlu2 %415 }
  0x88   : > { %v3677_v34 = vpop.permute.xlu1 %305 }
  0x89   : > { %v3675_v33 = vpop.permute.xlu0 %280 }
  0x8a   : > { %5609 = vst [vmem:[#allocation6_spill] sm:$0xff] %v3675_v33 }
  0x8b   : > { %v3695_v46 = vpop.permute.xlu2 %472 }
  0x8c   : > { %5612 = vst [vmem:[#allocation9_spill] sm:$0xff] %v3695_v46  ;;  %v3705_v52 = vmul.f32 %v3695_v46, %v3681_v36 }
  0x8e   : > { %v516_v59 = vperm.slane %v3705_v52, 1  ;;  %v488_v60 = vperm.slane %v3705_v52, 0  ;;  %v570_v15 = vperm.slane %v3705_v52, 3 }
  0x90   : > { %v3687_v39 = vpop.permute.xlu1 %349 }
  0x91   : > { %v3685_v38 = vpop.permute.xlu0 %347  ;;  %5611 = vst [vmem:[#allocation8_spill] sm:$0xff] %v3687_v39  ;;  %v358_v41 = vmul.f32 %v3687_v39, %v3683_v37 }
  0x92   : > { %5610 = vst [vmem:[#allocation7_spill] sm:$0xff] %v3685_v38  ;;  %v356_v40 = vmul.f32 %v3685_v38, %v3681_v36 }
  0x93   : > { %v365_v43 = vperm.slane %v358_v41, 0  ;;  %v420_v51 = vperm.slane %v358_v41, 2  ;;  %v393_v55 = vperm.slane %v358_v41, 1  ;;  %v3711_v56 = vpop.permute.xlu2 %513 }
  0x94   : > { %v363_v42 = vperm.slane %v356_v40, 0  ;;  %v391_v47 = vperm.slane %v356_v40, 1  ;;  %v418_v50 = vperm.slane %v356_v40, 2  ;;  %v519_v63 = vmul.f32 %v516_v59, %v3711_v56 }
  0x95   : > { %v368_v45 = vmul.f32 %v365_v43, %v3673_v32  ;;  %v423_v54 = vmul.f32 %v420_v51, %v3679_v35  ;;  %v445_v7 = vperm.slane %v356_v40, 3  ;;  %v447_v40 = vperm.slane %v358_v41, 3 }
  0x96   : > { %v366_v44 = vmul.f32 %v363_v42, %v3673_v32  ;;  %v421_v53 = vmul.f32 %v418_v50, %v3679_v35 }
  0x97   : > { %376 = vrot.lane.b32.xlu2 %v368_v45, %s3482_s7 }
  0x98   : > { %372 = vrot.lane.b32.xlu0 %v366_v44, %s3482_s7  ;;  %v486_v61 = vpop.permute.xlu1 %485 }
  0x99   : > { %v3699_v48 = vpop.permute.xlu0 %388  ;;  %v491_v3 = vmul.f32 %v488_v60, %v486_v61 }
  0x9a   : > { %v394_v49 = vmul.f32 %v391_v47, %v3699_v48  ;;  %v396_v58 = vmul.f32 %v393_v55, %v3699_v48 }
  0x9c   : > { %400 = vrot.lane.b32.xlu1 %v394_v49, %s3482_s7  ;;  %v3724_v16 = vpop.permute.xlu2 %567  ;;  %v3745_v49 = vsel %vm351_vm1, %v3685_v38, %v3687_v39 }
  0x9d   : > { %v573_v27 = vmul.f32 %v570_v15, %v3724_v16  ;;  %5615 = vst [vmem:[#allocation12_spill] sm:$0xff] %v3745_v49 }
  0x9f   : > { %431 = vrot.lane.b32.xlu2 %v423_v54, %s3482_s7 }
  0xa0   : > { %427 = vrot.lane.b32.xlu0 %v421_v53, %s3482_s7  ;;  %v357_v53 = vmul.f32 %v3745_v49, %v3733_v24 }
  0xa2   : > { %v443_v57 = vpop.permute.xlu0 %442 }
  0xa3   : > { %v448_v11 = vmul.f32 %v445_v7, %v443_v57  ;;  %v450_v44 = vmul.f32 %v447_v40, %v443_v57  ;;  %v3767_v40 = vpop.permute.xlu1 %599 }
  0xa4   : > { %404 = vrot.lane.b32.xlu1 %v396_v58, %s3482_s7  ;;  %5617 = vst [vmem:[#allocation14_spill] sm:$0xff] %v3767_v40 }
  0xa5   : > { %v610_v59 = vpop.permute.xlu2 %609 }
  0xa7   : > { %497 = vrot.lane.b32.xlu2 %v491_v3, %s3490_s13 }
  0xa8   : > { %525 = vrot.lane.b32.xlu0 %v519_v63, %s3490_s13  ;;  %v392_v63 = vperm.slane %v357_v53, 1 }
  0xaa   : > { %v3721_v10 = vpop.permute.xlu0 %474  ;;  %v395_v7 = vmul.f32 %v392_v63, %v3699_v48 }
  0xab   : > { %5613 = vst [vmem:[#allocation10_spill] sm:$0xff] %v3721_v10  ;;  %v3728_v19 = vsel %vm476_vm0, %v3695_v46, %v3721_v10  ;;  %v483_v22 = vmul.f32 %v3721_v10, %v3683_v37 }
  0xac   : > { %5614 = vst [vmem:[#allocation11_spill] sm:$0xff] %v3728_v19  ;;  %454 = vrot.lane.b32.xlu1 %v448_v11, %s3482_s7  ;;  %v482_v26 = vmul.f32 %v3728_v19, %v3733_v24  ;;  %v543_v11 = vperm.slane %v3705_v52, 2  ;;  %v364_v52 = vperm.slane %v357_v53, 0  ;;  %v3935_v19 = vld [vmem:[#allocation2] sm:$0xf] }
  0xad   : > { %v518_v25 = vperm.slane %v483_v22, 1  ;;  %v572_v47 = vperm.slane %v483_v22, 3  ;;  %v490_v41 = vperm.slane %v483_v22, 0 }
  0xae   : > { %v489_v45 = vperm.slane %v482_v26, 0  ;;  %v544_v48 = vperm.slane %v482_v26, 2 }
  0xaf   : > { %v521_v42 = vmul.f32 %v518_v25, %v3711_v56  ;;  %v575_v51 = vmul.f32 %v572_v47, %v3724_v16  ;;  %v493_v55 = vmul.f32 %v490_v41, %v486_v61  ;;  %v545_v25 = vperm.slane %v483_v22, 2 }
  0xb0   : > { %579 = vrot.lane.b32.xlu0 %v573_v27, %s3490_s13  ;;  %v492_v50 = vmul.f32 %v489_v45, %v486_v61  ;;  %v419_v45 = vperm.slane %v357_v53, 2  ;;  %v517_v41 = vperm.slane %v482_v26, 1 }
  0xb1   : > { %529 = vrot.lane.b32.xlu2 %v521_v42, %s3490_s13  ;;  %v3772_v42 = vmul.f32 %v3767_v40, %v3683_v37 }
  0xb2   : > { %v541_v43 = vpop.permute.xlu0 %540 }
  0xb3   : > { %v546_v61 = vmul.f32 %v543_v11, %v541_v43  ;;  %v548_v27 = vmul.f32 %v545_v25, %v541_v43  ;;  %v614_v22 = vperm.slane %v3772_v42, 0 }
  0xb4   : > { %458 = vrot.lane.b32.xlu1 %v450_v44, %s3482_s7  ;;  %v547_v44 = vmul.f32 %v544_v48, %v541_v43  ;;  %v571_v43 = vperm.slane %v482_v26, 3  ;;  %v641_v48 = vperm.slane %v3772_v42, 1 }
  0xb5   : > { %v617_v47 = vmul.f32 %v614_v22, %v610_v59 }
  0xb8   : > { %499 = vrot.lane.b32.xlu0 %v492_v50, %s3490_s13  ;;  %v422_v50 = vmul.f32 %v419_v45, %v3679_v35 }
  0xb9   : > { %583 = vrot.lane.b32.xlu2 %v575_v51, %s3490_s13  ;;  %v520_v51 = vmul.f32 %v517_v41, %v3711_v56  ;;  %v5475_v41 = vmov 15  }
  0xba   : > { %v3752_v54 = vpop.permute.xlu0 %597 }
  0xbb   : > { %5616 = vst [vmem:[#allocation13_spill] sm:$0xff] %v3752_v54  ;;  %v3756_v58 = vmul.f32 %v3752_v54, %v3681_v36  ;;  %v446_v36 = vperm.slane %v357_v53, 3 }
  0xbc   : > { %501 = vrot.lane.b32.xlu1 %v493_v55, %s3490_s13  ;;  %v574_v55 = vmul.f32 %v571_v43, %v3724_v16 }
  0xbd   : > { %v612_v60 = vperm.slane %v3756_v58, 0  ;;  %v449_v15 = vmul.f32 %v446_v36, %v443_v57  ;;  %v367_v57 = vmul.f32 %v364_v52, %v3673_v32  ;;  %v3786_v32 = vsel %vm378_vm2, %v3752_v54, %v3767_v40 }
  0xbe   : > { %5618 = vst [vmem:[#allocation15_spill] sm:$0xff] %v3786_v32  ;;  %v606_v53 = vmul.f32 %v3786_v32, %v3733_v24 }
  0xbf   : > { %v615_v3 = vmul.f32 %v612_v60, %v610_v59 }
  0xc0   : > { %v613_v35 = vperm.slane %v606_v53, 0 }
  0xc1   : > { %621 = vrot.lane.b32.xlu0 %v615_v3, %s3477_s30  ;;  %402 = vrot.lane.b32.xlu2 %v395_v7, %s3482_s7  ;;  %v5476_v7 = vmov 14  }
  0xc2   : > { %v616_v60 = vmul.f32 %v613_v35, %v610_v59  ;;  %3352 = vset.pattern.permute.xlu2 %v5476_v7  ;;  %v639_v59 = vperm.slane %v3756_v58, 1  ;;  %v668_v35 = vperm.slane %v3772_v42, 2  ;;  %v693_v7 = vperm.slane %v3756_v58, 3 }
  0xc4   : > { %552 = vrot.lane.b32.xlu1 %v546_v61, %s3490_s13  ;;  %v640_v61 = vperm.slane %v606_v53, 1 }
  0xc9   : > { %636 = vperm.xlu0 %3351, %v3603_v0   ;;  %456 = vrot.lane.b32.xlu2 %v449_v15, %s3482_s7 }
  0xcc   : > { %556 = vrot.lane.b32.xlu1 %v548_v27, %s3490_s13 }
  0xd1   : > { %554 = vrot.lane.b32.xlu2 %v547_v44, %s3490_s13  ;;  %3353 = vset.pattern.permute.xlu0 %v5475_v41  ;;  %v694_v41 = vperm.slane %v606_v53, 3 }
  0xd4   : > { %374 = vrot.lane.b32.xlu1 %v367_v57, %s3482_s7 }
  0xd9   : > { %625 = vrot.lane.b32.xlu2 %v617_v47, %s3477_s30 }
  0xdc   : > { %429 = vrot.lane.b32.xlu1 %v422_v50, %s3482_s7 }
  0xe4   : > { %527 = vrot.lane.b32.xlu1 %v520_v51, %s3490_s13 }
  0xec   : > { %581 = vrot.lane.b32.xlu1 %v574_v55, %s3490_s13 }
  0xf1   : > { %v3809_v27 = vpop.permute.xlu2 %376 }
  0xf4   : > { %623 = vrot.lane.b32.xlu1 %v616_v60, %s3477_s30  ;;  %v666_v60 = vperm.slane %v3756_v58, 2  ;;  %v5479_v58 = vmov 18  }
  0xf9   : > { %v3814_v44 = vpop.permute.xlu2 %431 }
 0x101   : > { %v3816_v57 = vpop.permute.xlu2 %497 }
 0x10a   : > { %v3793_v56 = vpop.permute.xlu0 %372 }
 0x10b   : > { %v3818_v22 = vpop.permute.xlu2 %529 }
 0x112   : > { %v3795_v63 = vpop.permute.xlu0 %427 }
 0x113   : > { %v3820_v45 = vpop.permute.xlu2 %583 }
 0x11a   : > { %v3797_v26 = vpop.permute.xlu0 %525 }
 0x11b   : > { %v3822_v47 = vpop.permute.xlu2 %402 }
 0x122   : > { %v3799_v3 = vpop.permute.xlu0 %579 }
 0x123   : > { %v3824_v50 = vpop.permute.xlu2 %456 }
 0x12a   : > { %v3802_v11 = vpop.permute.xlu0 %499 }
 0x12b   : > { %v3827_v51 = vpop.permute.xlu2 %554 }
 0x133   : > { %v3804_v16 = vpop.permute.xlu0 %621  ;;  %v3829_v43 = vpop.permute.xlu2 %625 }
 0x13b   : > { %v637_v36 = vpop.permute.xlu0 %636 }
 0x13c   : > { %v643_v15 = vmul.f32 %v640_v61, %v637_v36  ;;  %v642_v25 = vmul.f32 %v639_v59, %v637_v36  ;;  %v644_v52 = vmul.f32 %v641_v48, %v637_v36  ;;  %v667_v61 = vperm.slane %v606_v53, 2 }
 0x13d   : > { %v5481_v48 = vmov 16   ;;  %v5478_v53 = vmov 19  }
 0x13e   : > { %650 = vrot.lane.b32.xlu2 %v643_v15, %s3477_s30  ;;  %648 = vrot.lane.b32.xlu1 %v642_v25, %s3477_s30 }
 0x146   : > { %663 = vperm.xlu2 %3352, %v3603_v0   ;;  %652 = vrot.lane.b32.xlu1 %v644_v52, %s3477_s30 }
 0x14e   : > { %3354 = vset.pattern.permute.xlu2 %v5481_v48  ;;  %v5491_v48 = vmov 20  }
 0x14f   : > { %3358 = vset.pattern.permute.xlu1 %v5491_v48 }
 0x198   : > { %v3831_v55 = vpop.permute.xlu2 %650 }
 0x1a0   : > { %v664_v59 = vpop.permute.xlu2 %663 }
 0x1a1   : > { %v671_v36 = vmul.f32 %v668_v35, %v664_v59  ;;  %v669_v15 = vmul.f32 %v666_v60, %v664_v59  ;;  %v670_v25 = vmul.f32 %v667_v61, %v664_v59  ;;  %v695_v61 = vperm.slane %v3772_v42, 3 }
 0x1a3   : > { %679 = vrot.lane.b32.xlu2 %v671_v36, %s3477_s30  ;;  %675 = vrot.lane.b32.xlu0 %v669_v15, %s3477_s30  ;;  %v5480_v36 = vmov 17  }
 0x1a4   : > { %677 = vrot.lane.b32.xlu1 %v670_v25, %s3477_s30  ;;  %v5486_v25 = vperm.slane %v3608_v1, 4 }
 0x1ab   : > { %690 = vperm.xlu0 %3353, %v3603_v0  }
 0x215   : > { %v3840_v52 = vpop.permute.xlu0 %675 }
 0x21d   : > { %v691_v62 = vpop.permute.xlu0 %690 }
 0x21e   : > { %v697_v35 = vmul.f32 %v694_v41, %v691_v62  ;;  %v696_v60 = vmul.f32 %v693_v7, %v691_v62  ;;  %v698_v59 = vmul.f32 %v695_v61, %v691_v62  ;;  %v3854_v62 = vpop.permute.xlu1 %400  ;;  %v3860_v41 = vpop.permute.xlu2 %679  ;;  %v718_v61 = vmul.f32 %v5486_v25, %v3733_v24 }
 0x220   : > { %704 = vrot.lane.b32.xlu2 %v697_v35, %s3477_s30  ;;  %702 = vrot.lane.b32.xlu1 %v696_v60, %s3477_s30  ;;  %v5488_v35 = vperm.slane %v3619_v5, 4  ;;  %v745_v25 = vperm.slane %v718_v61, 1  ;;  %v787_v12 = vperm.slane %v718_v61, 3 }
 0x226   : > { %v3856_v42 = vpop.permute.xlu1 %404 }
 0x228   : > { %721 = vperm.xlu2 %3354, %v3603_v0   ;;  %706 = vrot.lane.b32.xlu1 %v698_v59, %s3477_s30  ;;  %v719_v59 = vmul.f32 %v5488_v35, %v3683_v37  ;;  %v807_v37 = vperm.slane %v3608_v1, 5 }
 0x22a   : > { %v746_v17 = vperm.slane %v719_v59, 1 }
 0x22e   : > { %v3858_v7 = vpop.permute.xlu1 %454 }
 0x230   : > { %3355 = vset.pattern.permute.xlu2 %v5480_v36  ;;  %v725_v36 = vperm.slane %v719_v59, 0 }
 0x231   : > { %742 = vperm.xlu2 %3355, %v3603_v0  }
 0x236   : > { %v3862_v15 = vpop.permute.xlu1 %458 }
 0x239   : > { %3356 = vset.pattern.permute.xlu2 %v5479_v58  ;;  %v724_v58 = vperm.slane %v718_v61, 0 }
 0x23a   : > { %763 = vperm.xlu2 %3356, %v3603_v0  }
 0x242   : > { %3357 = vset.pattern.permute.xlu2 %v5478_v53  ;;  %v3874_v53 = vpop.permute.xlu1 %501 }
 0x243   : > { %784 = vperm.xlu2 %3357, %v3603_v0  }
 0x24a   : > { %v3879_v13 = vpop.permute.xlu1 %552 }
 0x24b   : > { %811 = vrot.lane.b32.xlu2 %v807_v37, %s3498_s14  ;;  %v788_v37 = vperm.slane %v719_v59, 3 }
 0x27a   : > { %v3866_v60 = vpop.permute.xlu2 %704 }
 0x282   : > { %v722_v23 = vpop.permute.xlu2 %721 }
 0x283   : > { %v726_v21 = vmul.f32 %v724_v58, %v722_v23  ;;  %v727_v18 = vmul.f32 %v725_v36, %v722_v23  ;;  %v3884_v23 = vpop.permute.xlu1 %556  ;;  %v767_v36 = vperm.slane %v719_v59, 2 }
 0x285   : > { %730 = vrot.lane.b32.xlu0 %v726_v21, %s3473_s27  ;;  %732 = vrot.lane.b32.xlu1 %v727_v18, %s3473_s27  ;;  %v766_v21 = vperm.slane %v718_v61, 2 }
 0x28b   : > { %v743_v35 = vpop.permute.xlu2 %742  ;;  %v3888_v9 = vpop.permute.xlu1 %374 }
 0x28c   : > { %v747_v14 = vmul.f32 %v745_v25, %v743_v35  ;;  %v748_v20 = vmul.f32 %v746_v17, %v743_v35 }
 0x28e   : > { %751 = vrot.lane.b32.xlu0 %v747_v14, %s3473_s27  ;;  %753 = vrot.lane.b32.xlu1 %v748_v20, %s3473_s27  ;;  %v808_v20 = vperm.slane %v3619_v5, 5 }
 0x293   : > { %v3893_v35 = vpop.permute.xlu1 %429 }
 0x294   : > { %v764_v18 = vpop.permute.xlu2 %763 }
 0x295   : > { %v768_v58 = vmul.f32 %v766_v21, %v764_v18  ;;  %v769_v48 = vmul.f32 %v767_v36, %v764_v18 }
 0x297   : > { %772 = vrot.lane.b32.xlu0 %v768_v58, %s3473_s27  ;;  %774 = vrot.lane.b32.xlu1 %v769_v48, %s3473_s27 }
 0x29b   : > { %v3896_v21 = vpop.permute.xlu1 %527 }
 0x29d   : > { %v785_v17 = vpop.permute.xlu2 %784 }
 0x29e   : > { %v789_v25 = vmul.f32 %v787_v12, %v785_v17  ;;  %v790_v14 = vmul.f32 %v788_v37, %v785_v17 }
 0x2a0   : > { %793 = vrot.lane.b32.xlu0 %v789_v25, %s3473_s27  ;;  %795 = vrot.lane.b32.xlu1 %v790_v14, %s3473_s27 }
 0x2a3   : > { %v3898_v48 = vpop.permute.xlu1 %581 }
 0x2a5   : > { %v3927_v8 = vpop.permute.xlu2 %811 }
 0x2a6   : > { %5627 = vst [vmem:[#allocation24_spill] sm:$0xff] %v3927_v8  ;;  %v820_v54 = vmul.f32 %v3927_v8, %v3925_v2 }
 0x2a8   : > { %813 = vrot.lane.b32.xlu0 %v808_v20, %s3498_s14  ;;  %824 = vperm.xlu1 %3358, %v3603_v0   ;;  %v5504_v20 = vmov 21   ;;  %v827_v10 = vperm.slane %v820_v54, 0 }
 0x2a9   : > { %3359 = vset.pattern.permute.xlu2 %v5504_v20  ;;  %v3937_v20 = vld [vmem:[#allocation2 + $0x18] sm:$0xf] }
 0x2ab   : > { %v3900_v61 = vpop.permute.xlu1 %623 }
 0x2b3   : > { %v3902_v59 = vpop.permute.xlu1 %648 }
 0x2bb   : > { %v3904_v12 = vpop.permute.xlu1 %652 }
 0x2c3   : > { %v3906_v36 = vpop.permute.xlu1 %677 }
 0x2cb   : > { %v3908_v18 = vpop.permute.xlu1 %702 }
 0x2cc   : > { %5619 = vst [vmem:[#allocation16_spill] sm:$0xff] %v3908_v18 }
 0x2d3   : > { %v3910_v58 = vpop.permute.xlu1 %706 }
 0x2d4   : > { %5620 = vst [vmem:[#allocation17_spill] sm:$0xff] %v3910_v58 }
 0x2f7   : > { %v3912_v37 = vpop.permute.xlu0 %730  ;;  %v3914_v17 = vpop.permute.xlu1 %732 }
 0x2f8   : > { %5621 = vst [vmem:[#allocation18_spill] sm:$0xff] %v3912_v37  ;;  %v855_v37 = vperm.slane %v820_v54, 1 }
 0x2f9   : > { %5622 = vst [vmem:[#allocation19_spill] sm:$0xff] %v3914_v17 }
 0x300   : > { %v3916_v25 = vpop.permute.xlu0 %751  ;;  %v3918_v14 = vpop.permute.xlu1 %753 }
 0x301   : > { %5623 = vst [vmem:[#allocation20_spill] sm:$0xff] %v3916_v25 }
 0x302   : > { %5624 = vst [vmem:[#allocation21_spill] sm:$0xff] %v3918_v14 }
 0x309   : > { %v3921_v6 = vpop.permute.xlu0 %772  ;;  %v3923_v4 = vpop.permute.xlu1 %774 }
 0x30a   : > { %5625 = vst [vmem:[#allocation22_spill] sm:$0xff] %v3921_v6 }
 0x30b   : > { %5626 = vst [vmem:[#allocation23_spill] sm:$0xff] %v3923_v4 }
 0x312   : > { %v3929_v40 = vpop.permute.xlu0 %793  ;;  %v3931_v32 = vpop.permute.xlu1 %795 }
 0x313   : > { %5628 = vst [vmem:[#allocation25_spill] sm:$0xff] %v3929_v40 }
 0x314   : > { %5629 = vst [vmem:[#allocation26_spill] sm:$0xff] %v3931_v32 }
 0x31a   : > { %v3939_v46 = vpop.permute.xlu0 %813  ;;  %v825_v49 = vpop.permute.xlu1 %824 }
 0x31b   : > { %5630 = vst [vmem:[#allocation27_spill] sm:$0xff] %v3939_v46  ;;  %v3943_v39 = vsel %vm815_vm3, %v3927_v8, %v3939_v46  ;;  %v822_v38 = vmul.f32 %v3939_v46, %v3935_v19  ;;  %v830_v40 = vmul.f32 %v827_v10, %v825_v49  ;;  %v5522_v8 = vmov 22  }
 0x31c   : > { %5631 = vst [vmem:[#allocation28_spill] sm:$0xff] %v3943_v39  ;;  %v821_v32 = vmul.f32 %v3943_v39, %v3937_v20  ;;  %3360 = vset.pattern.permute.xlu0 %v5522_v8 }
 0x31d   : > { %836 = vrot.lane.b32.xlu2 %v830_v40, %s3500_s15  ;;  %v829_v6 = vperm.slane %v822_v38, 0  ;;  %v857_v46 = vperm.slane %v822_v38, 1  ;;  %v911_v8 = vperm.slane %v822_v38, 3 }
 0x31e   : > { %v828_v4 = vperm.slane %v821_v32, 0  ;;  %v856_v39 = vperm.slane %v821_v32, 1 }
 0x31f   : > { %v832_v25 = vmul.f32 %v829_v6, %v825_v49 }
 0x320   : > { %v831_v14 = vmul.f32 %v828_v4, %v825_v49  ;;  %v5521_v4 = vmov 23  }
 0x321   : > { %840 = vrot.lane.b32.xlu1 %v832_v25, %s3500_s15  ;;  %v883_v25 = vperm.slane %v821_v32, 2 }
 0x322   : > { %838 = vrot.lane.b32.xlu0 %v831_v14, %s3500_s15  ;;  %v882_v14 = vperm.slane %v820_v54, 2 }
 0x325   : > { %852 = vperm.xlu2 %3359, %v3603_v0  }
 0x32d   : > { %3361 = vset.pattern.permute.xlu2 %v5521_v4  ;;  %v5526_v4 = vmov 24  }
 0x377   : > { %v3954_v10 = vpop.permute.xlu2 %836 }
 0x378   : > { %5632 = vst [vmem:[#allocation29_spill] sm:$0xff] %v3954_v10 }
 0x37f   : > { %v853_v17 = vpop.permute.xlu2 %852 }
 0x380   : > { %v860_v40 = vmul.f32 %v857_v46, %v853_v17  ;;  %v859_v58 = vmul.f32 %v856_v39, %v853_v17  ;;  %v858_v18 = vmul.f32 %v855_v37, %v853_v17 }
 0x382   : > { %868 = vrot.lane.b32.xlu2 %v860_v40, %s3500_s15  ;;  %866 = vrot.lane.b32.xlu1 %v859_v58, %s3500_s15  ;;  %v884_v58 = vperm.slane %v822_v38, 2 }
 0x383   : > { %864 = vrot.lane.b32.xlu0 %v858_v18, %s3500_s15 }
 0x38b   : > { %879 = vperm.xlu0 %3360, %v3603_v0  }
 0x393   : > { %v3980_v38 = vpop.permute.xlu1 %840 }
 0x394   : > { %v3961_v6 = vpop.permute.xlu0 %838  ;;  %5636 = vst [vmem:[#allocation33_spill] sm:$0xff] %v3980_v38 }
 0x3dc   : > { %v3969_v17 = vpop.permute.xlu2 %868 }
 0x3dd   : > { %5634 = vst [vmem:[#allocation31_spill] sm:$0xff] %v3969_v17 }
 0x3f5   : > { %v3963_v49 = vpop.permute.xlu0 %864 }
 0x3f6   : > { %5633 = vst [vmem:[#allocation30_spill] sm:$0xff] %v3963_v49 }
 0x3fd   : > { %v880_v46 = vpop.permute.xlu0 %879 }
 0x3fe   : > { %v886_v39 = vmul.f32 %v883_v25, %v880_v46  ;;  %v885_v37 = vmul.f32 %v882_v14, %v880_v46  ;;  %v887_v18 = vmul.f32 %v884_v58, %v880_v46  ;;  %v909_v25 = vperm.slane %v820_v54, 3 }
 0x3ff   : > { %v910_v14 = vperm.slane %v821_v32, 3  ;;  %v932_v46 = vperm.slane %v3608_v1, 6  ;;  %v933_v58 = vperm.slane %v3619_v5, 6  ;;  %v5525_v32 = vmov 25  }
 0x400   : > { %893 = vrot.lane.b32.xlu2 %v886_v39, %s3500_s15  ;;  %891 = vrot.lane.b32.xlu1 %v885_v37, %s3500_s15 }
 0x401   : > { %3363 = vset.pattern.permute.xlu0 %v5525_v32 }
 0x408   : > { %906 = vperm.xlu2 %3361, %v3603_v0   ;;  %895 = vrot.lane.b32.xlu1 %v887_v18, %s3500_s15 }
 0x410   : > { %3362 = vset.pattern.permute.xlu2 %v5526_v4 }
 0x45a   : > { %v3971_v40 = vpop.permute.xlu2 %893 }
 0x45b   : > { %5635 = vst [vmem:[#allocation32_spill] sm:$0xff] %v3971_v40 }
 0x462   : > { %v907_v49 = vpop.permute.xlu2 %906 }
 0x463   : > { %v914_v39 = vmul.f32 %v911_v8, %v907_v49  ;;  %v912_v10 = vmul.f32 %v909_v25, %v907_v49  ;;  %v913_v37 = vmul.f32 %v910_v14, %v907_v49  ;;  %v3982_v8 = vpop.permute.xlu1 %866 }
 0x464   : > { %5637 = vst [vmem:[#allocation34_spill] sm:$0xff] %v3982_v8 }
 0x465   : > { %922 = vrot.lane.b32.xlu2 %v914_v39, %s3500_s15  ;;  %918 = vrot.lane.b32.xlu0 %v912_v10, %s3500_s15 }
 0x466   : > { %920 = vrot.lane.b32.xlu1 %v913_v37, %s3500_s15 }
 0x46d   : > { %936 = vrot.lane.b32.xlu0 %v932_v46, %s3504_s16  ;;  %949 = vperm.xlu2 %3362, %v3603_v0  }
 0x46e   : > { %938 = vrot.lane.b32.xlu1 %v933_v58, %s3504_s16  ;;  %s3243_s16 = sshll.u32 %s5844_s22, 4 }
 0x472   : > { %v3984_v54 = vpop.permute.xlu1 %891 }
 0x473   : > { %5638 = vst [vmem:[#allocation35_spill] sm:$0xff] %v3984_v54 }
 0x47a   : > { %v3987_v10 = vpop.permute.xlu1 %895 }
 0x47b   : > { %5639 = vst [vmem:[#allocation36_spill] sm:$0xff] %v3987_v10 }
 0x4bf   : > { %v3993_v25 = vpop.permute.xlu2 %922 }
 0x4c0   : > { %5642 = vst [vmem:[#allocation39_spill] sm:$0xff] %v3993_v25 }
 0x4c7   : > { %v950_v32 = vpop.permute.xlu2 %949 }
 0x4d7   : > { %v3989_v49 = vpop.permute.xlu0 %918 }
 0x4d8   : > { %5640 = vst [vmem:[#allocation37_spill] sm:$0xff] %v3989_v49  ;;  %v3991_v18 = vpop.permute.xlu1 %920 }
 0x4d9   : > { %5641 = vst [vmem:[#allocation38_spill] sm:$0xff] %v3991_v18 }
 0x4df   : > { %v3995_v14 = vpop.permute.xlu0 %936 }
 0x4e0   : > { %5643 = vst [vmem:[#allocation40_spill] sm:$0xff] %v3995_v14  ;;  %v945_v39 = vmul.f32 %v3995_v14, %v3925_v2  ;;  %v3999_v37 = vpop.permute.xlu1 %938 }
 0x4e1   : > { %5644 = vst [vmem:[#allocation41_spill] sm:$0xff] %v3999_v37  ;;  %v4003_v46 = vsel %vm940_vm4, %v3995_v14, %v3999_v37  ;;  %v947_v58 = vmul.f32 %v3999_v37, %v3935_v19  ;;  %v5534_v37 = vmov 26  }
 0x4e2   : > { %5645 = vst [vmem:[#allocation42_spill] sm:$0xff] %v4003_v46  ;;  %v946_v4 = vmul.f32 %v4003_v46, %v3937_v20  ;;  %v952_v25 = vperm.slane %v945_v39, 0  ;;  %3364 = vset.pattern.permute.xlu2 %v5534_v37  ;;  %v980_v54 = vperm.slane %v945_v39, 1 }
 0x4e3   : > { %v954_v10 = vperm.slane %v947_v58, 0  ;;  %v1009_v37 = vperm.slane %v947_v58, 2 }
 0x4e4   : > { %v955_v17 = vmul.f32 %v952_v25, %v950_v32  ;;  %v953_v38 = vperm.slane %v946_v4, 0  ;;  %v981_v46 = vperm.slane %v946_v4, 1 }
 0x4e5   : > { %v957_v49 = vmul.f32 %v954_v10, %v950_v32 }
 0x4e6   : > { %961 = vrot.lane.b32.xlu0 %v955_v17, %s3506_s17  ;;  %v956_v18 = vmul.f32 %v953_v38, %v950_v32  ;;  %v982_v17 = vperm.slane %v947_v58, 1  ;;  %v5537_v32 = vmov 27  }
 0x4e7   : > { %965 = vrot.lane.b32.xlu2 %v957_v49, %s3506_s17 }
 0x4e8   : > { %963 = vrot.lane.b32.xlu1 %v956_v18, %s3506_s17 }
 0x4ee   : > { %977 = vperm.xlu0 %3363, %v3603_v0  }
 0x4f6   : > { %3365 = vset.pattern.permute.xlu0 %v5537_v32 }
 0x541   : > { %v4021_v49 = vpop.permute.xlu2 %965 }
 0x542   : > { %5647 = vst [vmem:[#allocation44_spill] sm:$0xff] %v4021_v49 }
 0x558   : > { %v4014_v14 = vpop.permute.xlu0 %961 }
 0x559   : > { %5646 = vst [vmem:[#allocation43_spill] sm:$0xff] %v4014_v14 }
 0x560   : > { %v978_v25 = vpop.permute.xlu0 %977 }
 0x561   : > { %v984_v40 = vmul.f32 %v981_v46, %v978_v25  ;;  %v983_v10 = vmul.f32 %v980_v54, %v978_v25  ;;  %v985_v38 = vmul.f32 %v982_v17, %v978_v25  ;;  %v1007_v46 = vperm.slane %v945_v39, 2 }
 0x562   : > { %v1008_v54 = vperm.slane %v946_v4, 2  ;;  %v1058_v25 = vperm.slane %v3619_v5, 7  ;;  %v5539_v17 = vmov 28  }
 0x563   : > { %991 = vrot.lane.b32.xlu2 %v984_v40, %s3506_s17  ;;  %989 = vrot.lane.b32.xlu1 %v983_v10, %s3506_s17 }
 0x564   : > { %3366 = vset.pattern.permute.xlu1 %v5539_v17 }
 0x56b   : > { %1004 = vperm.xlu2 %3364, %v3603_v0   ;;  %993 = vrot.lane.b32.xlu1 %v985_v38, %s3506_s17 }
 0x5bd   : > { %v4023_v18 = vpop.permute.xlu2 %991 }
 0x5c5   : > { %v1005_v14 = vpop.permute.xlu2 %1004 }
 0x5c6   : > { %v1012_v40 = vmul.f32 %v1009_v37, %v1005_v14  ;;  %v1010_v8 = vmul.f32 %v1007_v46, %v1005_v14  ;;  %v1011_v10 = vmul.f32 %v1008_v54, %v1005_v14  ;;  %v1035_v37 = vperm.slane %v946_v4, 3  ;;  %v4039_v4 = vpop.permute.xlu1 %963 }
 0x5c7   : > { %v1034_v46 = vperm.slane %v945_v39, 3 }
 0x5c8   : > { %1020 = vrot.lane.b32.xlu2 %v1012_v40, %s3506_s17  ;;  %1016 = vrot.lane.b32.xlu0 %v1010_v8, %s3506_s17  ;;  %v1036_v8 = vperm.slane %v947_v58, 3 }
 0x5c9   : > { %1018 = vrot.lane.b32.xlu1 %v1011_v10, %s3506_s17  ;;  %v1057_v10 = vperm.slane %v3608_v1, 7 }
 0x5d0   : > { %1031 = vperm.xlu0 %3365, %v3603_v0  }
 0x5d5   : > { %v4041_v39 = vpop.permute.xlu1 %989 }
 0x5d6   : > { %5650 = vst [vmem:[#allocation46_spill] sm:$0xff] %v4041_v39 }
 0x5d8   : > { %1063 = vrot.lane.b32.xlu0 %v1058_v25, %s3510_s18  ;;  %v5649_v25 = vmov 1  }
 0x63a   : > { %v4031_v38 = vpop.permute.xlu0 %1016 }
 0x63b   : > { %5648 = vst [vmem:[#allocation45_spill] sm:$0xff] %v4031_v38 }
 0x642   : > { %v1032_v14 = vpop.permute.xlu0 %1031 }
 0x643   : > { %v1038_v54 = vmul.f32 %v1035_v37, %v1032_v14  ;;  %v1037_v40 = vmul.f32 %v1034_v46, %v1032_v14  ;;  %v1039_v32 = vmul.f32 %v1036_v8, %v1032_v14  ;;  %v4043_v37 = vpop.permute.xlu1 %993  ;;  %v4045_v46 = vpop.permute.xlu2 %1020 }
 0x644   : > { %5651 = vst [vmem:[#allocation47_spill] sm:$0xff] %v4043_v37 }
 0x645   : > { %1045 = vrot.lane.b32.xlu2 %v1038_v54, %s3506_s17  ;;  %1043 = vrot.lane.b32.xlu1 %v1037_v40, %s3506_s17  ;;  %5652 = vst [vmem:[#allocation48_spill] sm:$0xff] %v4045_v46  ;;  %v5538_v54 = vmov 29  }
 0x646   : > { %3367 = vset.pattern.permute.xlu2 %v5538_v54 }
 0x64a   : > { %v4056_v8 = vpop.permute.xlu0 %1063 }
 0x64b   : > { %v4048_v58 = vpop.permute.xlu1 %1018  ;;  %5657 = vst [vmem:[#allocation53_spill] sm:$0xff] %v4056_v8  ;;  %v1072_v5 = vmul.f32 %v4056_v8, %v3935_v19 }
 0x64c   : > { %5653 = vst [vmem:[#allocation49_spill] sm:$0xff] %v4048_v58 }
 0x64d   : > { %1047 = vrot.lane.b32.xlu1 %v1039_v32, %s3506_s17  ;;  %1061 = vrot.lane.b32.xlu2 %v1057_v10, %s3510_s18  ;;  %v1079_v1 = vperm.slane %v1072_v5, 0 }
 0x655   : > { %1074 = vperm.xlu1 %3366, %v3603_v0  }
 0x65d   : > { %3376 = vset.pattern.permute.xlu1 %v5649_v25 }
 0x69f   : > { %v4050_v14 = vpop.permute.xlu2 %1045 }
 0x6a0   : > { %5654 = vst [vmem:[#allocation50_spill] sm:$0xff] %v4050_v14 }
 0x6a7   : > { %v4054_v40 = vpop.permute.xlu2 %1061 }
 0x6a8   : > { %5656 = vst [vmem:[#allocation52_spill] sm:$0xff] %v4054_v40  ;;  %v4060_v10 = vsel %vm1065_vm5, %v4054_v40, %v4056_v8  ;;  %v1070_v54 = vmul.f32 %v4054_v40, %v3925_v2  ;;  %v1107_v40 = vperm.slane %v1072_v5, 1 }
 0x6a9   : > { %5658 = vst [vmem:[#allocation54_spill] sm:$0xff] %v4060_v10  ;;  %v1071_v17 = vmul.f32 %v4060_v10, %v3937_v20  ;;  %v5550_v10 = vmov 30  }
 0x6aa   : > { %v1077_v37 = vperm.slane %v1070_v54, 0  ;;  %3368 = vset.pattern.permute.xlu0 %v5550_v10  ;;  %v1105_v58 = vperm.slane %v1070_v54, 1 }
 0x6ab   : > { %v1078_v46 = vperm.slane %v1071_v17, 0 }
 0x6b7   : > { %v4052_v32 = vpop.permute.xlu1 %1043 }
 0x6b8   : > { %5655 = vst [vmem:[#allocation51_spill] sm:$0xff] %v4052_v32 }
 0x6bf   : > { %v4062_v25 = vpop.permute.xlu1 %1047 }
 0x6c0   : > { %5659 = vst [vmem:[#allocation55_spill] sm:$0xff] %v4062_v25  ;;  %v1106_v25 = vperm.slane %v1071_v17, 1 }
 0x6c7   : > { %v1075_v49 = vpop.permute.xlu1 %1074 }
 0x6c8   : > { %v1082_v32 = vmul.f32 %v1079_v1, %v1075_v49  ;;  %v1081_v14 = vmul.f32 %v1078_v46, %v1075_v49  ;;  %v1080_v38 = vmul.f32 %v1077_v37, %v1075_v49 }
 0x6ca   : > { %1090 = vrot.lane.b32.xlu1 %v1082_v32, %s3512_s19  ;;  %1088 = vrot.lane.b32.xlu0 %v1081_v14, %s3512_s19 }
 0x6cb   : > { %1086 = vrot.lane.b32.xlu2 %v1080_v38, %s3512_s19  ;;  %v5549_v38 = vmov 31  }
 0x6d3   : > { %1102 = vperm.xlu2 %3367, %v3603_v0   ;;  %v4083_v0 = vld [vmem:[%s5469_s1] sm:$0xff] }
 0x6db   : > { %3369 = vset.pattern.permute.xlu2 %v5549_v38 }
 0x725   : > { %v4075_v8 = vpop.permute.xlu2 %1086 }
 0x726   : > { %5660 = vst [vmem:[#allocation56_spill] sm:$0xff] %v4075_v8  ;;  %v1161_v8 = vperm.slane %v1072_v5, 3 }
 0x72d   : > { %v1103_v1 = vpop.permute.xlu2 %1102 }
 0x72e   : > { %v1110_v46 = vmul.f32 %v1107_v40, %v1103_v1  ;;  %v1109_v49 = vmul.f32 %v1106_v25, %v1103_v1  ;;  %v1108_v37 = vmul.f32 %v1105_v58, %v1103_v1  ;;  %v1133_v58 = vperm.slane %v1071_v17, 2 }
 0x72f   : > { %v1132_v40 = vperm.slane %v1070_v54, 2 }
 0x730   : > { %1118 = vrot.lane.b32.xlu2 %v1110_v46, %s3512_s19  ;;  %1116 = vrot.lane.b32.xlu1 %v1109_v49, %s3512_s19  ;;  %v1134_v49 = vperm.slane %v1072_v5, 2  ;;  %v3450_v5 = vld [vmem:[%s5473_s5 + $0x18] ss:$0 sm:$0xff] }
 0x731   : > { %1114 = vrot.lane.b32.xlu0 %v1108_v37, %s3512_s19 }
 0x739   : > { %1129 = vperm.xlu0 %3368, %v4083_v0  }
 0x73c   : > { %v4087_v14 = vpop.permute.xlu0 %1088 }
 0x73d   : > { %5661 = vst [vmem:[#allocation57_spill] sm:$0xff] %v4087_v14 }
 0x78a   : > { %v4095_v38 = vpop.permute.xlu2 %1118 }
 0x78b   : > { %5663 = vst [vmem:[#allocation59_spill] sm:$0xff] %v4095_v38 }
 0x7a3   : > { %v4089_v32 = vpop.permute.xlu0 %1114 }
 0x7a4   : > { %5662 = vst [vmem:[#allocation58_spill] sm:$0xff] %v4089_v32  ;;  %v5555_v32 = vmov 32  }
 0x7ab   : > { %v1130_v25 = vpop.permute.xlu0 %1129 }
 0x7ac   : > { %v1136_v1 = vmul.f32 %v1133_v58, %v1130_v25  ;;  %v1135_v46 = vmul.f32 %v1132_v40, %v1130_v25  ;;  %v1137_v37 = vmul.f32 %v1134_v49, %v1130_v25  ;;  %v1159_v58 = vperm.slane %v1070_v54, 3  ;;  %v3449_v25 = vld [vmem:[%s5473_s5 + $0x10] ss:$0 sm:$0xff] }
 0x7ad   : > { %v1160_v40 = vperm.slane %v1071_v17, 3  ;;  %v4112_v17 = vpop.permute.xlu1 %1090 }
 0x7ae   : > { %1143 = vrot.lane.b32.xlu2 %v1136_v1, %s3512_s19  ;;  %1141 = vrot.lane.b32.xlu1 %v1135_v46, %s3512_s19  ;;  %5665 = vst [vmem:[#allocation61_spill] sm:$0xff] %v4112_v17 }
 0x7b6   : > { %1156 = vperm.xlu2 %3369, %v4083_v0   ;;  %1145 = vrot.lane.b32.xlu1 %v1137_v37, %s3512_s19 }
 0x7be   : > { %3370 = vset.pattern.permute.xlu2 %v5555_v32 }
 0x808   : > { %v4097_v10 = vpop.permute.xlu2 %1143 }
 0x809   : > { %5664 = vst [vmem:[#allocation60_spill] sm:$0xff] %v4097_v10 }
 0x810   : > { %v1157_v14 = vpop.permute.xlu2 %1156 }
 0x811   : > { %v1164_v1 = vmul.f32 %v1161_v8, %v1157_v14  ;;  %v1162_v39 = vmul.f32 %v1159_v58, %v1157_v14  ;;  %v1163_v46 = vmul.f32 %v1160_v40, %v1157_v14  ;;  %v5556_v8 = vmov 33  }
 0x812   : > { %3371 = vset.pattern.permute.xlu0 %v5556_v8 }
 0x813   : > { %1172 = vrot.lane.b32.xlu2 %v1164_v1, %s3512_s19  ;;  %1168 = vrot.lane.b32.xlu0 %v1162_v39, %s3512_s19  ;;  %v4114_v39 = vpop.permute.xlu1 %1116 }
 0x814   : > { %1170 = vrot.lane.b32.xlu1 %v1163_v46, %s3512_s19  ;;  %5666 = vst [vmem:[#allocation62_spill] sm:$0xff] %v4114_v39 }
 0x81b   : > { %1186 = vrot.lane.b32.xlu0 %v3449_v25, %s3516_s29  ;;  %1199 = vperm.xlu2 %3370, %v4083_v0  }
 0x81c   : > { %1188 = vrot.lane.b32.xlu1 %v3450_v5, %s3516_s29 }
 0x820   : > { %v4116_v54 = vpop.permute.xlu1 %1141 }
 0x821   : > { %5667 = vst [vmem:[#allocation63_spill] sm:$0xff] %v4116_v54 }
 0x828   : > { %v4119_v14 = vpop.permute.xlu1 %1145 }
 0x829   : > { %5668 = vst [vmem:[#allocation64_spill] sm:$0xff] %v4119_v14 }
 0x86d   : > { %v4125_v58 = vpop.permute.xlu2 %1172 }
 0x86e   : > { %5671 = vst [vmem:[#allocation67_spill] sm:$0xff] %v4125_v58 }
 0x875   : > { %v1200_v32 = vpop.permute.xlu2 %1199 }
 0x885   : > { %v4121_v49 = vpop.permute.xlu0 %1168 }
 0x886   : > { %5669 = vst [vmem:[#allocation65_spill] sm:$0xff] %v4121_v49  ;;  %v4123_v37 = vpop.permute.xlu1 %1170 }
 0x887   : > { %5670 = vst [vmem:[#allocation66_spill] sm:$0xff] %v4123_v37 }
 0x88d   : > { %v4127_v40 = vpop.permute.xlu0 %1186 }
 0x88e   : > { %5672 = vst [vmem:[#allocation68_spill] sm:$0xff] %v4127_v40  ;;  %v1195_v1 = vmul.f32 %v4127_v40, %v3925_v2  ;;  %v4131_v46 = vpop.permute.xlu1 %1188 }
 0x88f   : > { %5673 = vst [vmem:[#allocation69_spill] sm:$0xff] %v4131_v46  ;;  %v4136_v25 = vsel %vm1190_vm6, %v4127_v40, %v4131_v46  ;;  %v1197_v5 = vmul.f32 %v4131_v46, %v3935_v19  ;;  %v5561_v19 = vmov 34  }
 0x890   : > { %5674 = vst [vmem:[#allocation70_spill] sm:$0xff] %v4136_v25  ;;  %v1196_v8 = vmul.f32 %v4136_v25, %v3937_v20  ;;  %v1202_v58 = vperm.slane %v1195_v1, 0  ;;  %3372 = vset.pattern.permute.xlu2 %v5561_v19  ;;  %v1230_v25 = vperm.slane %v1195_v1, 1 }
 0x891   : > { %v1204_v14 = vperm.slane %v1197_v5, 0 }
 0x892   : > { %v1205_v38 = vmul.f32 %v1202_v58, %v1200_v32  ;;  %v1203_v17 = vperm.slane %v1196_v8, 0  ;;  %v1231_v20 = vperm.slane %v1196_v8, 1 }
 0x893   : > { %v1207_v49 = vmul.f32 %v1204_v14, %v1200_v32 }
 0x894   : > { %1211 = vrot.lane.b32.xlu0 %v1205_v38, %s3518_s8  ;;  %v1206_v2 = vmul.f32 %v1203_v17, %v1200_v32  ;;  %v1232_v38 = vperm.slane %v1197_v5, 1  ;;  %v5676_v17 = vmov 0  }
 0x895   : > { %1215 = vrot.lane.b32.xlu2 %v1207_v49, %s3518_s8  ;;  %v5564_v49 = vmov 35  }
 0x896   : > { %1213 = vrot.lane.b32.xlu1 %v1206_v2, %s3518_s8 }
 0x89c   : > { %1227 = vperm.xlu0 %3371, %v4083_v0  }
 0x8a4   : > { %3373 = vset.pattern.permute.xlu0 %v5564_v49  ;;  %v1285_v49 = vperm.slane %v1196_v8, 3 }
 0x8ef   : > { %v4155_v2 = vpop.permute.xlu2 %1215 }
 0x8f0   : > { %5677 = vst [vmem:[#allocation72_spill] sm:$0xff] %v4155_v2 }
 0x906   : > { %v4147_v40 = vpop.permute.xlu0 %1211 }
 0x907   : > { %5675 = vst [vmem:[#allocation71_spill] sm:$0xff] %v4147_v40 }
 0x90e   : > { %v1228_v58 = vpop.permute.xlu0 %1227 }
 0x90f   : > { %v1234_v46 = vmul.f32 %v1231_v20, %v1228_v58  ;;  %v1233_v14 = vmul.f32 %v1230_v25, %v1228_v58  ;;  %v1235_v32 = vmul.f32 %v1232_v38, %v1228_v58  ;;  %v1258_v25 = vperm.slane %v1196_v8, 2 }
 0x910   : > { %v1259_v20 = vperm.slane %v1197_v5, 2  ;;  %v4176_v8 = vsel %vm282_vm7, %v3671_v31, %v3675_v33 }
 0x911   : > { %1241 = vrot.lane.b32.xlu2 %v1234_v46, %s3518_s8  ;;  %1239 = vrot.lane.b32.xlu1 %v1233_v14, %s3518_s8  ;;  %v1257_v46 = vperm.slane %v1195_v1, 2  ;;  %5681 = vst [vmem:[#allocation75_spill] sm:$0xff] %v4176_v8 }
 0x919   : > { %1254 = vperm.xlu2 %3372, %v4083_v0   ;;  %1243 = vrot.lane.b32.xlu1 %v1235_v32, %s3518_s8  ;;  %v1284_v32 = vperm.slane %v1195_v1, 3  ;;  %v3452_v1 = vld [vmem:[#allocation2 + $0x8] sm:$0xf] }
 0x921   : > { %3374 = vset.pattern.permute.xlu2 %v5676_v17 }
 0x96b   : > { %v4157_v19 = vpop.permute.xlu2 %1241 }
 0x96c   : > { %5678 = vst [vmem:[#allocation73_spill] sm:$0xff] %v4157_v19 }
 0x973   : > { %v1255_v40 = vpop.permute.xlu2 %1254 }
 0x974   : > { %v1261_v14 = vmul.f32 %v1258_v25, %v1255_v40  ;;  %v1262_v37 = vmul.f32 %v1259_v20, %v1255_v40  ;;  %v1260_v58 = vmul.f32 %v1257_v46, %v1255_v40  ;;  %v255_v40 = vld [vmem:[%s5470_s2] sm:$0xff] }
 0x976   : > { %1270 = vrot.lane.b32.xlu2 %v1262_v37, %s3518_s8  ;;  %1266 = vrot.lane.b32.xlu0 %v1260_v58, %s3518_s8  ;;  %v1286_v37 = vperm.slane %v1197_v5, 3  ;;  %v287_v5 = vmul.f32 %v3452_v1, %v3671_v31 }
 0x977   : > { %1268 = vrot.lane.b32.xlu1 %v1261_v14, %s3518_s8  ;;  %v3453_v14 = vld [vmem:[#allocation2 + $0x18] sm:$0xf] }
 0x978   : > { %v308_v20 = vperm.slane %v287_v5, 1  ;;  %v289_v58 = vmul.f32 %v3453_v14, %v3675_v33 }
 0x97a   : > { %v311_v46 = vmul.f32 %v308_v20, %v3677_v34  ;;  %v310_v1 = vperm.slane %v289_v58, 1  ;;  %v323_v33 = vperm.slane %v289_v58, 2 }
 0x97e   : > { %1281 = vperm.xlu0 %3373, %v4083_v0   ;;  %v5680_v0 = vmov 2  }
 0x986   : > { %3375 = vset.pattern.permute.xlu0 %v5676_v17  ;;  %v297_v17 = vperm.slane %v289_v58, 0 }
 0x988   : > { %v300_v14 = vmul.f32 %v297_v17, %v3669_v30  ;;  %v336_v17 = vperm.slane %v289_v58, 3 }
 0x9e8   : > { %v4164_v38 = vpop.permute.xlu0 %1266 }
 0x9e9   : > { %5679 = vst [vmem:[#allocation74_spill] sm:$0xff] %v4164_v38  ;;  %v334_v38 = vperm.slane %v287_v5, 3 }
 0x9f0   : > { %v1282_v2 = vpop.permute.xlu0 %1281 }
 0x9f1   : > { %v1287_v19 = vmul.f32 %v1284_v32, %v1282_v2  ;;  %v1288_v54 = vmul.f32 %v1285_v49, %v1282_v2  ;;  %v1289_v25 = vmul.f32 %v1286_v37, %v1282_v2  ;;  %v295_v2 = vperm.slane %v287_v5, 0 }
 0x9f3   : > { %1295 = vrot.lane.b32.xlu2 %v1288_v54, %s3518_s8  ;;  %1293 = vrot.lane.b32.xlu1 %v1287_v19, %s3518_s8  ;;  %v288_v54 = vmul.f32 %v4176_v8, %v3733_v24 }
 0x9f5   : > { %v296_v19 = vperm.slane %v288_v54, 0  ;;  %v309_v49 = vperm.slane %v288_v54, 1  ;;  %v322_v24 = vperm.slane %v288_v54, 2  ;;  %v335_v10 = vperm.slane %v288_v54, 3 }
 0x9f6   : > { %v380_v54 = vsel %vm378_vm2, %v3888_v9, %v3809_v27 }
 0x9f7   : > { %v299_v32 = vmul.f32 %v296_v19, %v3669_v30  ;;  %v312_v37 = vmul.f32 %v309_v49, %v3677_v34  ;;  %v325_v20 = vmul.f32 %v322_v24, %v3665_v28  ;;  %v313_v19 = vmul.f32 %v310_v1, %v3677_v34 }
 0x9f8   : > { %v326_v34 = vmul.f32 %v323_v33, %v3665_v28  ;;  %v339_v33 = vmul.f32 %v336_v17, %v3667_v29 }
 0x9f9   : > { %v315_v8 = vadd.f32 %v312_v37, %v299_v32  ;;  %v379_v32 = vsel %vm378_vm2, %v3793_v56, %v3888_v9  ;;  %v433_v56 = vsel %vm378_vm2, %v3795_v63, %v3893_v35  ;;  %v407_v9 = vsel %vm378_vm2, %v3822_v47, %v3856_v42 }
 0x9fa   : > { %v460_v63 = vsel %vm378_vm2, %v3858_v7, %v3824_v50  ;;  %v505_v7 = vsel %vm503_vm8, %v3802_v11, %v3874_v53 }
 0x9fb   : > { %1297 = vrot.lane.b32.xlu1 %v1289_v25, %s3518_s8  ;;  %1309 = vperm.xlu2 %3374, %v255_v40   ;;  %v298_v40 = vmul.f32 %v295_v2, %v3669_v30  ;;  %v321_v25 = vperm.slane %v287_v5, 2  ;;  %v328_v49 = vadd.f32 %v325_v20, %v315_v8  ;;  %v337_v2 = vmul.f32 %v334_v38, %v3667_v29 }
 0x9fd   : > { %v324_v31 = vmul.f32 %v321_v25, %v3665_v28  ;;  %v434_v28 = vsel %vm378_vm2, %v3893_v35, %v3814_v44 }
 0xa03   : > { %3377 = vset.pattern.permute.xlu2 %v5680_v0  ;;  %v314_v0 = vadd.f32 %v311_v46, %v298_v40  ;;  %v338_v46 = vmul.f32 %v335_v10, %v3667_v29  ;;  %v406_v10 = vsel %vm378_vm2, %v3854_v62, %v3822_v47  ;;  %v461_v47 = vsel %vm378_vm2, %v3824_v50, %v3862_v15 }
 0xa04   : > { %v504_v29 = vsel %vm503_vm8, %v3816_v57, %v3802_v11  ;;  %v532_v50 = vsel %vm503_vm8, %v3896_v21, %v3818_v22  ;;  %v585_v11 = vsel %vm503_vm8, %v3799_v3, %v3898_v48 }
 0xa05   : > { %v327_v39 = vadd.f32 %v324_v31, %v314_v0  ;;  %v316_v31 = vadd.f32 %v313_v19, %v300_v14  ;;  %v341_v5 = vadd.f32 %v338_v46, %v328_v49 }
 0xa07   : > { %v340_v37 = vadd.f32 %v337_v2, %v327_v39  ;;  %v385_v8 = vadd.f32 %v380_v54, %v341_v5  ;;  %v329_v38 = vadd.f32 %v326_v34, %v316_v31  ;;  %v681_v5 = vsel %vm351_vm1, %v3840_v52, %v3906_v36  ;;  %v5684_v52 = vld [vmem:[#allocation19_spill] sm:$0xff] }
 0xa09   : > { %v384_v30 = vadd.f32 %v379_v32, %v340_v37  ;;  %v412_v58 = vadd.f32 %v407_v9, %v385_v8  ;;  %v342_v25 = vadd.f32 %v339_v33, %v329_v38  ;;  %v5683_v8 = vld [vmem:[#allocation17_spill] sm:$0xff]  ;;  %v5687_v33 = vld [vmem:[#allocation20_spill] sm:$0xff] }
 0xa0b   : > { %v411_v39 = vadd.f32 %v406_v10, %v384_v30  ;;  %v439_v24 = vadd.f32 %v434_v28, %v412_v58  ;;  %v386_v62 = vadd.f32 %v3809_v27, %v342_v25  ;;  %v531_v27 = vsel %vm503_vm8, %v3797_v26, %v3896_v21  ;;  %v5686_v28 = vld [vmem:[#allocation21_spill] sm:$0xff] }
 0xa0c   : > { %v558_v26 = vsel %vm503_vm8, %v3879_v13, %v3827_v51  ;;  %v559_v21 = vsel %vm503_vm8, %v3827_v51, %v3884_v23  ;;  %v628_v13 = vsel %vm351_vm1, %v3900_v61, %v3829_v43  ;;  %v654_v51 = vsel %vm351_vm1, %v3902_v59, %v3831_v55  ;;  %v5682_v59 = vld [vmem:[#allocation16_spill] sm:$0xff] }
 0xa0d   : > { %v438_v40 = vadd.f32 %v433_v56, %v411_v39  ;;  %v413_v35 = vadd.f32 %v3856_v42, %v386_v62  ;;  %v466_v1 = vadd.f32 %v461_v47, %v439_v24  ;;  %v708_v34 = vsel %vm351_vm1, %v5682_v59, %v3866_v60  ;;  %v5685_v56 = vld [vmem:[#allocation18_spill] sm:$0xff]  ;;  %v5688_v24 = vld [vmem:[#allocation23_spill] sm:$0xff] }
 0xa0e   : > { %v734_v9 = vsel %vm282_vm7, %v5685_v56, %v5684_v52  ;;  %v755_v58 = vsel %vm282_vm7, %v5687_v33, %v5686_v28 }
 0xa0f   : > { %v465_v0 = vadd.f32 %v460_v63, %v438_v40  ;;  %v440_v42 = vadd.f32 %v3814_v44, %v413_v35  ;;  %v510_v14 = vadd.f32 %v505_v7, %v466_v1  ;;  %v5690_v1 = vld [vmem:[#allocation26_spill] sm:$0xff] }
 0xa11   : > { %v509_v20 = vadd.f32 %v504_v29, %v465_v0  ;;  %v467_v49 = vadd.f32 %v3862_v15, %v440_v42  ;;  %v537_v57 = vadd.f32 %v532_v50, %v510_v14  ;;  %v586_v15 = vsel %vm503_vm8, %v3898_v48, %v3820_v45  ;;  %v4287_v0 = vpop.permute.xlu1 %1213  ;;  %v5691_v29 = vld [vmem:[#allocation25_spill] sm:$0xff] }
 0xa12   : > { %v655_v48 = vsel %vm351_vm1, %v3831_v55, %v3904_v12  ;;  %v709_v55 = vsel %vm351_vm1, %v3866_v60, %v5683_v8  ;;  %v5692_v50 = vld [vmem:[#allocation29_spill] sm:$0xff] }
 0xa13   : > { %v536_v19 = vadd.f32 %v531_v27, %v509_v20  ;;  %v511_v2 = vadd.f32 %v3874_v53, %v467_v49  ;;  %v564_v46 = vadd.f32 %v559_v21, %v537_v57  ;;  %v627_v53 = vsel %vm351_vm1, %v3804_v16, %v3900_v61  ;;  %v5693_v49 = vld [vmem:[#allocation34_spill] sm:$0xff]  ;;  %v5695_v21 = vld [vmem:[#allocation32_spill] sm:$0xff] }
 0xa14   : > { %v797_v27 = vsel %vm282_vm7, %v5691_v29, %v5690_v1  ;;  %v843_v42 = vsel %vm842_vm9, %v5692_v50, %v3961_v6  ;;  %v5694_v57 = vld [vmem:[#allocation30_spill] sm:$0xff] }
 0xa15   : > { %v563_v44 = vadd.f32 %v558_v26, %v536_v19  ;;  %v538_v3 = vadd.f32 %v3818_v22, %v511_v2  ;;  %v591_v37 = vadd.f32 %v586_v15, %v564_v46  ;;  %v682_v22 = vsel %vm351_vm1, %v3906_v36, %v3860_v41 }
 0xa16   : > { %v870_v2 = vsel %vm842_vm9, %v5694_v57, %v5693_v49 }
 0xa17   : > { %v590_v32 = vadd.f32 %v585_v11, %v563_v44  ;;  %v565_v31 = vadd.f32 %v3884_v23, %v538_v3  ;;  %v633_v16 = vadd.f32 %v628_v13, %v591_v37  ;;  %v5696_v44 = vld [vmem:[#allocation35_spill] sm:$0xff]  ;;  %v5697_v3 = vld [vmem:[#allocation38_spill] sm:$0xff]  ;;  %v5698_v37 = vld [vmem:[#allocation37_spill] sm:$0xff] }
 0xa18   : > { %v897_v15 = vsel %vm842_vm9, %v5696_v44, %v5695_v21 }
 0xa19   : > { %v632_v54 = vadd.f32 %v627_v53, %v590_v32  ;;  %v660_v30 = vadd.f32 %v655_v48, %v633_v16  ;;  %v592_v23 = vadd.f32 %v3820_v45, %v565_v31  ;;  %v5689_v45 = vld [vmem:[#allocation22_spill] sm:$0xff]  ;;  %v4309_v32 = vpop.permute.xlu1 %1239  ;;  %v5699_v31 = vld [vmem:[#allocation33_spill] sm:$0xff] }
 0xa1a   : > { %v776_v62 = vsel %vm282_vm7, %v5689_v45, %v5688_v24  ;;  %v844_v16 = vsel %vm842_vm9, %v3961_v6, %v5699_v31 }
 0xa1b   : > { %v659_v61 = vadd.f32 %v654_v51, %v632_v54  ;;  %v687_v38 = vadd.f32 %v682_v22, %v660_v30  ;;  %v634_v40 = vadd.f32 %v3829_v43, %v592_v23  ;;  %v924_v51 = vsel %vm842_vm9, %v5698_v37, %v5697_v3 }
 0xa1d   : > { %v686_v17 = vadd.f32 %v681_v5, %v659_v61  ;;  %v714_v39 = vadd.f32 %v709_v55, %v687_v38  ;;  %v661_v63 = vadd.f32 %v3904_v12, %v634_v40  ;;  %v5700_v61 = vld [vmem:[#allocation43_spill] sm:$0xff]  ;;  %v5702_v55 = vld [vmem:[#allocation46_spill] sm:$0xff] }
 0xa1e   : > { %v968_v22 = vsel %vm967_vm10, %v5700_v61, %v4039_v4  ;;  %v995_v23 = vsel %vm967_vm10, %v5702_v55, %v4023_v18 }
 0xa1f   : > { %v713_v10 = vadd.f32 %v708_v34, %v686_v17  ;;  %v739_v25 = vadd.f32 %v734_v9, %v714_v39  ;;  %v688_v43 = vadd.f32 %v3860_v41, %v661_v63  ;;  %v5701_v34 = vld [vmem:[#allocation31_spill] sm:$0xff]  ;;  %v5704_v9 = vld [vmem:[#allocation49_spill] sm:$0xff] }
 0xa20   : > { %v871_v17 = vsel %vm842_vm9, %v5693_v49, %v5701_v34  ;;  %v5705_v39 = vld [vmem:[#allocation45_spill] sm:$0xff]  ;;  %v5713_v49 = vld [vmem:[#allocation62_spill] sm:$0xff]  ;;  %v5722_v34 = vld [vmem:[#allocation71_spill] sm:$0xff] }
 0xa21   : > { %v738_v36 = vadd.f32 %v5685_v56, %v713_v10  ;;  %v760_v47 = vadd.f32 %v755_v58, %v739_v25  ;;  %v715_v12 = vadd.f32 %v5683_v8, %v688_v43  ;;  %v5703_v10 = vld [vmem:[#allocation36_spill] sm:$0xff]  ;;  %v5706_v58 = vld [vmem:[#allocation39_spill] sm:$0xff]  ;;  %v5710_v43 = vld [vmem:[#allocation57_spill] sm:$0xff] }
 0xa22   : > { %v925_v40 = vsel %vm842_vm9, %v5697_v3, %v5706_v58 }
 0xa23   : > { %v759_v60 = vadd.f32 %v5687_v33, %v738_v36  ;;  %v781_v7 = vadd.f32 %v776_v62, %v760_v47  ;;  %v740_v26 = vadd.f32 %v5684_v52, %v715_v12  ;;  %v898_v52 = vsel %vm842_vm9, %v5695_v21, %v5703_v10  ;;  %v1244_v47 = vpop.permute.xlu1 %1243  ;;  %v5712_v12 = vld [vmem:[#allocation47_spill] sm:$0xff]  ;;  %v5724_v10 = vld [vmem:[#allocation73_spill] sm:$0xff] }
 0xa24   : > { %v1022_v36 = vsel %vm967_vm10, %v5705_v39, %v5704_v9 }
 0xa25   : > { %v780_v35 = vadd.f32 %v5689_v45, %v759_v60  ;;  %v802_v14 = vadd.f32 %v797_v27, %v781_v7  ;;  %v761_v46 = vadd.f32 %v5686_v28, %v740_v26  ;;  %v5707_v60 = vld [vmem:[#allocation50_spill] sm:$0xff]  ;;  %v5711_v7 = vld [vmem:[#allocation56_spill] sm:$0xff] }
 0xa27   : > { %v801_v20 = vadd.f32 %v5691_v29, %v780_v35  ;;  %v849_v11 = vadd.f32 %v843_v42, %v802_v14  ;;  %v782_v54 = vadd.f32 %v5688_v24, %v761_v46  ;;  %v5708_v24 = vld [vmem:[#allocation51_spill] sm:$0xff]  ;;  %v1271_v35 = vpop.permute.xlu2 %1270  ;;  %v996_v14 = vsel %vm967_vm10, %v4023_v18, %v5712_v12 }
 0xa28   : > { %v1049_v45 = vsel %vm967_vm10, %v5708_v24, %v5707_v60 }
 0xa29   : > { %v848_v19 = vadd.f32 %v5692_v50, %v801_v20  ;;  %v876_v53 = vadd.f32 %v870_v2, %v849_v11  ;;  %v803_v30 = vadd.f32 %v5690_v1, %v782_v54  ;;  %v5709_v1 = vld [vmem:[#allocation44_spill] sm:$0xff]  ;;  %v1093_v20 = vsel %vm1092_vm11, %v5711_v7, %v5710_v43  ;;  %v5720_v54 = vld [vmem:[#allocation65_spill] sm:$0xff] }
 0xa2a   : > { %v969_v29 = vsel %vm967_vm10, %v4039_v4, %v5709_v1  ;;  %v5715_v11 = vld [vmem:[#allocation48_spill] sm:$0xff] }
 0xa2b   : > { %v875_v41 = vadd.f32 %v5694_v57, %v848_v19  ;;  %v903_v48 = vadd.f32 %v897_v15, %v876_v53  ;;  %v850_v6 = vadd.f32 %v844_v16, %v803_v30  ;;  %v5714_v57 = vld [vmem:[#allocation58_spill] sm:$0xff]  ;;  %v5717_v15 = vld [vmem:[#allocation63_spill] sm:$0xff] }
 0xa2c   : > { %v1120_v2 = vsel %vm1092_vm11, %v5714_v57, %v5713_v49 }
 0xa2d   : > { %v902_v13 = vadd.f32 %v5696_v44, %v875_v41  ;;  %v930_v59 = vadd.f32 %v924_v51, %v903_v48  ;;  %v877_v28 = vadd.f32 %v871_v17, %v850_v6  ;;  %v1023_v41 = vsel %vm967_vm10, %v5704_v9, %v5715_v11  ;;  %v5716_v44 = vld [vmem:[#allocation60_spill] sm:$0xff]  ;;  %v5719_v51 = vld [vmem:[#allocation66_spill] sm:$0xff] }
 0xa2e   : > { %v1147_v46 = vsel %vm1092_vm11, %v5717_v15, %v5716_v44  ;;  %v1174_v48 = vsel %vm1092_vm11, %v5720_v54, %v5719_v51  ;;  %v1218_v17 = vsel %vm1217_vm12, %v5722_v34, %v4287_v0 }
 0xa2f   : > { %v929_v5 = vadd.f32 %v5698_v37, %v902_v13  ;;  %v974_v38 = vadd.f32 %v968_v22, %v930_v59  ;;  %v904_v62 = vadd.f32 %v898_v52, %v877_v28  ;;  %v5718_v13 = vld [vmem:[#allocation55_spill] sm:$0xff]  ;;  %v5721_v22 = vld [vmem:[#allocation61_spill] sm:$0xff]  ;;  %v1245_v52 = vsel %vm1217_vm12, %v4309_v32, %v5724_v10 }
 0xa30   : > { %v1050_v3 = vsel %vm967_vm10, %v5707_v60, %v5718_v13  ;;  %v1094_v30 = vsel %vm1092_vm11, %v5710_v43, %v5721_v22  ;;  %v5727_v60 = vld [vmem:[#allocation67_spill] sm:$0xff]  ;;  %v5735_v13 = vmov 7  }
 0xa31   : > { %v973_v8 = vadd.f32 %v5700_v61, %v929_v5  ;;  %v1001_v33 = vadd.f32 %v995_v23, %v974_v38  ;;  %v931_v50 = vadd.f32 %v925_v40, %v904_v62  ;;  %v1269_v5 = vpop.permute.xlu1 %1268  ;;  %v5723_v23 = vld [vmem:[#allocation59_spill] sm:$0xff] }
 0xa32   : > { %v1121_v6 = vsel %vm1092_vm11, %v5713_v49, %v5723_v23  ;;  %v1273_v49 = vsel %vm1217_vm12, %v1269_v5, %v1271_v35  ;;  %v5730_v35 = vmov 5   ;;  %v5743_v23 = vld [vmem:[#allocation12_spill] sm:$0xff] }
 0xa33   : > { %v1000_v56 = vadd.f32 %v5702_v55, %v973_v8  ;;  %v1028_v63 = vadd.f32 %v1022_v36, %v1001_v33  ;;  %v975_v26 = vadd.f32 %v969_v29, %v931_v50  ;;  %v5726_v33 = vld [vmem:[#allocation74_spill] sm:$0xff] }
 0xa34   : > { %v1272_v58 = vsel %vm1217_vm12, %v5726_v33, %v1269_v5 }
 0xa35   : > { %v1027_v25 = vadd.f32 %v5705_v39, %v1000_v56  ;;  %v1055_v42 = vadd.f32 %v1049_v45, %v1028_v63  ;;  %v1002_v53 = vadd.f32 %v996_v14, %v975_v26  ;;  %v5725_v39 = vld [vmem:[#allocation64_spill] sm:$0xff] }
 0xa36   : > { %v1148_v36 = vsel %vm1092_vm11, %v5716_v44, %v5725_v39 }
 0xa37   : > { %v1054_v27 = vadd.f32 %v5708_v24, %v1027_v25  ;;  %v1099_v4 = vadd.f32 %v1093_v20, %v1055_v42  ;;  %v1029_v31 = vadd.f32 %v1023_v41, %v1002_v53  ;;  %v1175_v24 = vsel %vm1092_vm11, %v5719_v51, %v5727_v60 }
 0xa38   : > { %v1246_v42 = vsel %vm1217_vm12, %v5724_v10, %v1244_v47  ;;  %v4410_v47 = vld [vmem:[%s5471_s3] sm:$0xff]  ;;  %v5733_v53 = vmov 10   ;;  %v5738_v51 = vmov 33  }
 0xa39   : > { %v1098_v19 = vadd.f32 %v5711_v7, %v1054_v27  ;;  %v1126_v18 = vadd.f32 %v1120_v2, %v1099_v4  ;;  %v1056_v8 = vadd.f32 %v1050_v3, %v1029_v31  ;;  %v5728_v27 = vld [vmem:[#allocation72_spill] sm:$0xff]  ;;  %5729 = vst [vmem:[#allocation16_spill] sm:$0xff] %v4410_v47  ;;  %v5736_v3 = vmov 8  }
 0xa3a   : > { %v1219_v43 = vsel %vm1217_vm12, %v4287_v0, %v5728_v27  ;;  %v5746_v27 = vmov 12  }
 0xa3b   : > { %v1125_v21 = vadd.f32 %v5714_v57, %v1098_v19  ;;  %v1153_v16 = vadd.f32 %v1147_v46, %v1126_v18  ;;  %v1100_v56 = vadd.f32 %v1094_v30, %v1056_v8  ;;  %v5732_v46 = vmov 4   ;;  %v5742_v8 = vld [vmem:[#allocation8_spill] sm:$0xff] }
 0xa3c   : > { %v5734_v18 = vmov 6  }
 0xa3d   : > { %v1152_v37 = vadd.f32 %v5717_v15, %v1125_v21  ;;  %v1180_v55 = vadd.f32 %v1174_v48, %v1153_v16  ;;  %v1127_v40 = vadd.f32 %v1121_v6, %v1100_v56  ;;  %v5731_v15 = vmov 3  }
 0xa3f   : > { %v1179_v59 = vadd.f32 %v5720_v54, %v1152_v37  ;;  %v1224_v9 = vadd.f32 %v1218_v17, %v1180_v55  ;;  %v1154_v62 = vadd.f32 %v1148_v36, %v1127_v40  ;;  %v5737_v37 = vmov 9  }
 0xa41   : > { %v1223_v38 = vadd.f32 %v5722_v34, %v1179_v59  ;;  %v1251_v25 = vadd.f32 %v1245_v52, %v1224_v9  ;;  %v1181_v20 = vadd.f32 %v1175_v24, %v1154_v62  ;;  %v4445_v59 = vld [vmem:[#allocation2 + $0x8] sm:$0xff]  ;;  %v5741_v34 = vld [vmem:[#allocation7_spill] sm:$0xff] }
 0xa42   : > { %v4449_v17 = vmul.f32 %v4445_v59, %v5741_v34 }
 0xa43   : > { %v1250_v28 = vadd.f32 %v4309_v32, %v1223_v38  ;;  %v1278_v63 = vadd.f32 %v1272_v58, %v1251_v25  ;;  %v1225_v14 = vadd.f32 %v1219_v43, %v1181_v20 }
 0xa44   : > { %v1451_v38 = vperm.slane %v4449_v17, 0 }
 0xa45   : > { %v1277_v45 = vadd.f32 %v5726_v33, %v1250_v28  ;;  %v1252_v2 = vadd.f32 %v1246_v42, %v1225_v14  ;;  %v5744_v28 = vmov 11  }
 0xa47   : > { %v1279_v4 = vadd.f32 %v1273_v49, %v1252_v2  ;;  %v5747_v2 = vmov 13  }
 0xa4d   : > { %v1296_v61 = vpop.permute.xlu2 %1295 }
 0xa55   : > { %v1310_v29 = vpop.permute.xlu2 %1309 }
 0xa65   : > { %v1294_v1 = vpop.permute.xlu1 %1293 }
 0xa66   : > { %v1299_v32 = vsel %vm1217_vm12, %v1294_v1, %v1296_v61  ;;  %v1304_v7 = vadd.f32 %v1294_v1, %v1277_v45  ;;  %v1478_v45 = vperm.slane %v4449_v17, 1 }
 0xa67   : > { %v1305_v50 = vadd.f32 %v1299_v32, %v1278_v63 }
 0xa68   : > { %v1312_v12 = vadd.f32 %v1310_v29, %v1304_v7 }
 0xa69   : > { %v1313_v19 = vadd.f32 %v1310_v29, %v1305_v50  ;;  %v1505_v50 = vperm.slane %v4449_v17, 2 }
 0xa6a   : > { %v1315_v57 = vmax.f32 %v1312_v12, 0.0 }
 0xa6b   : > { %v1316_v26 = vmax.f32 %v1313_v19, 0.0 }
 0xa6c   : > { %1321 = vrot.lane.b32.xlu0 %v1315_v57, %s3516_s29 }
 0xa6d   : > { %v1298_v0 = vpop.permute.xlu1 %1297  ;;  %1323 = vrot.lane.b32.xlu1 %v1316_v26, %s3516_s29 }
 0xa6e   : > { %v1300_v11 = vsel %vm1217_vm12, %v1296_v61, %v1298_v0 }
 0xa6f   : > { %v1306_v41 = vadd.f32 %v1300_v11, %v1279_v4 }
 0xa71   : > { %v1314_v21 = vadd.f32 %v1310_v29, %v1306_v41  ;;  %v1532_v41 = vperm.slane %v4449_v17, 3 }
 0xa73   : > { %v1317_v44 = vmax.f32 %v1314_v21, 0.0 }
 0xa74   : > { %1341 = vperm.xlu0 %3375, %v4410_v47  }
 0xa75   : > { %1325 = vrot.lane.b32.xlu2 %v1317_v44, %s3516_s29  ;;  %1354 = vperm.xlu1 %3376, %v4410_v47  }
 0xa7c   : > { %3380 = vset.pattern.permute.xlu0 %v5730_v35 }
 0xa7d   : > { %1406 = vperm.xlu0 %3380, %v4410_v47   ;;  %1367 = vperm.xlu2 %3377, %v4410_v47  }
 0xa7e   : > { %3378 = vset.pattern.permute.xlu1 %v5731_v15 }
 0xa7f   : > { %1380 = vperm.xlu1 %3378, %v4410_v47  }
 0xa85   : > { %3379 = vset.pattern.permute.xlu2 %v5732_v46  ;;  %3385 = vset.pattern.permute.xlu0 %v5733_v53  ;;  %v5749_v46 = vmov 14  }
 0xa86   : > { %1393 = vperm.xlu2 %3379, %v4410_v47  }
 0xa87   : > { %3381 = vset.pattern.permute.xlu1 %v5734_v18  ;;  %v1559_v18 = vperm.slane %v4449_v17, 4 }
 0xa88   : > { %1419 = vperm.xlu1 %3381, %v4410_v47  }
 0xa8e   : > { %3382 = vset.pattern.permute.xlu2 %v5735_v13 }
 0xa8f   : > { %1432 = vperm.xlu2 %3382, %v4410_v47  }
 0xa90   : > { %3383 = vset.pattern.permute.xlu1 %v5736_v3 }
 0xa91   : > { %1448 = vperm.xlu1 %3383, %v4410_v47  }
 0xa97   : > { %3384 = vset.pattern.permute.xlu2 %v5737_v37 }
 0xa99   : > { %3408 = vset.pattern.permute.xlu1 %v5738_v51 }
 0xacf   : > { %v1326_v48 = vpop.permute.xlu2 %1325 }
 0xad7   : > { %v4467_v33 = vpop.permute.xlu2 %1367 }
 0xad8   : > { %5745 = vst [vmem:[#allocation18_spill] sm:$0xff] %v4467_v33 }
 0xade   : > { %v1322_v54 = vpop.permute.xlu0 %1321 }
 0xadf   : > { %v1324_v31 = vpop.permute.xlu1 %1323 }
 0xae0   : > { %v4432_v16 = vsel %vm1190_vm6, %v1322_v54, %v1324_v31  ;;  %v4435_v5 = vsel %vm1190_vm6, %v1324_v31, %v1326_v48  ;;  %v4469_v58 = vpop.permute.xlu2 %1393  ;;  %v5750_v31 = vmov 15  }
 0xae1   : > { %5739 = vst [vmem:[#allocation17_spill] sm:$0xff] %v4432_v16  ;;  %v4453_v55 = vmul.f32 %v4435_v5, %v5742_v8  ;;  %v4457_v6 = vmul.f32 %v4432_v16, %v5743_v23  ;;  %v1586_v23 = vperm.slane %v4449_v17, 5 }
 0xae2   : > { %5740 = vst [vmem:[#allocation19_spill] sm:$0xff] %v4435_v5 }
 0xae3   : > { %1331 = vst [vmem:[#allocation2 + $0x10] sm:$0xff] %v4432_v16  ;;  %v1453_v10 = vperm.slane %v4453_v55, 0  ;;  %v1452_v52 = vperm.slane %v4457_v6, 0  ;;  %v1479_v60 = vperm.slane %v4457_v6, 1  ;;  %v1480_v24 = vperm.slane %v4453_v55, 1 }
 0xae4   : > { %1332 = vst [vmem:[#allocation2 + $0x18] sm:$0xff] %v4435_v5  ;;  %v1506_v42 = vperm.slane %v4457_v6, 2  ;;  %v1507_v49 = vperm.slane %v4453_v55, 2  ;;  %v1533_v0 = vperm.slane %v4457_v6, 3  ;;  %v1534_v11 = vperm.slane %v4453_v55, 3 }
 0xae5   : > { %v1560_v13 = vperm.slane %v4457_v6, 4  ;;  %v1561_v54 = vperm.slane %v4453_v55, 4 }
 0xae6   : > { %v4483_v43 = vpop.permute.xlu0 %1341 }
 0xae7   : > { %v4439_v61 = vpop.permute.xlu1 %1354 }
 0xae9   : > { %v4471_v40 = vpop.permute.xlu2 %1432 }
 0xaef   : > { %v4485_v32 = vpop.permute.xlu0 %1406 }
 0xaf1   : > { %v4441_v22 = vpop.permute.xlu1 %1380 }
 0xafa   : > { %v4443_v30 = vpop.permute.xlu1 %1419 }
 0xb03   : > { %v1449_v56 = vpop.permute.xlu1 %1448 }
 0xb04   : > { %v1454_v9 = vmul.f32 %v1451_v38, %v1449_v56  ;;  %v1456_v39 = vmul.f32 %v1453_v10, %v1449_v56  ;;  %v1455_v36 = vmul.f32 %v1452_v52, %v1449_v56  ;;  %v1587_v38 = vperm.slane %v4457_v6, 5 }
 0xb05   : > { %v1588_v10 = vperm.slane %v4453_v55, 5 }
 0xb06   : > { %1464 = vrot.lane.b32.xlu1 %v1456_v39, %s3482_s7  ;;  %1462 = vrot.lane.b32.xlu0 %v1455_v36, %s3482_s7  ;;  %v5752_v36 = vmov 16  }
 0xb07   : > { %1460 = vrot.lane.b32.xlu2 %v1454_v9, %s3482_s7 }
 0xb0f   : > { %1475 = vperm.xlu2 %3384, %v4410_v47  }
 0xb17   : > { %3386 = vset.pattern.permute.xlu2 %v5744_v28 }
 0xb61   : > { %v4473_v25 = vpop.permute.xlu2 %1460 }
 0xb69   : > { %v1476_v62 = vpop.permute.xlu2 %1475 }
 0xb6a   : > { %v1482_v63 = vmul.f32 %v1479_v60, %v1476_v62  ;;  %v1483_v1 = vmul.f32 %v1480_v24, %v1476_v62  ;;  %v1481_v29 = vmul.f32 %v1478_v45, %v1476_v62  ;;  %v1613_v60 = vperm.slane %v4449_v17, 6 }
 0xb6b   : > { %v1614_v24 = vperm.slane %v4457_v6, 6 }
 0xb6c   : > { %1491 = vrot.lane.b32.xlu2 %v1483_v1, %s3482_s7  ;;  %1489 = vrot.lane.b32.xlu1 %v1482_v63, %s3482_s7  ;;  %v1615_v1 = vperm.slane %v4453_v55, 6 }
 0xb6d   : > { %1487 = vrot.lane.b32.xlu0 %v1481_v29, %s3482_s7 }
 0xb75   : > { %1502 = vperm.xlu0 %3385, %v4410_v47  }
 0xb78   : > { %v4487_v7 = vpop.permute.xlu0 %1462 }
 0xb7d   : > { %3387 = vset.pattern.permute.xlu0 %v5746_v27  ;;  %v5753_v27 = vmov 17  }
 0xbc6   : > { %v4499_v26 = vpop.permute.xlu2 %1491 }
 0xbc7   : > { %5748 = vst [vmem:[#allocation21_spill] sm:$0xff] %v4499_v26 }
 0xbdf   : > { %v4489_v20 = vpop.permute.xlu0 %1487 }
 0xbe7   : > { %v1503_v12 = vpop.permute.xlu0 %1502 }
 0xbe8   : > { %v1508_v14 = vmul.f32 %v1505_v50, %v1503_v12  ;;  %v1509_v19 = vmul.f32 %v1506_v42, %v1503_v12  ;;  %v1510_v57 = vmul.f32 %v1507_v49, %v1503_v12  ;;  %v1640_v12 = vperm.slane %v4449_v17, 7  ;;  %v5756_v17 = vld [vmem:[#allocation9_spill] sm:$0xff] }
 0xbea   : > { %1516 = vrot.lane.b32.xlu2 %v1509_v19, %s3482_s7  ;;  %1514 = vrot.lane.b32.xlu1 %v1508_v14, %s3482_s7  ;;  %v1641_v14 = vperm.slane %v4457_v6, 7  ;;  %v1642_v19 = vperm.slane %v4453_v55, 7  ;;  %v4559_v6 = vmul.f32 %v4445_v59, %v5756_v17  ;;  %v5757_v55 = vld [vmem:[#allocation11_spill] sm:$0xff] }
 0xbf2   : > { %1529 = vperm.xlu2 %3386, %v4410_v47   ;;  %1518 = vrot.lane.b32.xlu1 %v1510_v57, %s3482_s7 }
 0xbfa   : > { %3388 = vset.pattern.permute.xlu2 %v5747_v2 }
 0xc44   : > { %v4501_v4 = vpop.permute.xlu2 %1516 }
 0xc4c   : > { %v1530_v21 = vpop.permute.xlu2 %1529 }
 0xc4d   : > { %v1536_v44 = vmul.f32 %v1533_v0, %v1530_v21  ;;  %v1537_v35 = vmul.f32 %v1534_v11, %v1530_v21  ;;  %v1535_v15 = vmul.f32 %v1532_v41, %v1530_v21  ;;  %v5755_v11 = vmov 18  }
 0xc4e   : > { %v4563_v21 = vmul.f32 %v4432_v16, %v5757_v55 }
 0xc4f   : > { %1545 = vrot.lane.b32.xlu2 %v1537_v35, %s3482_s7  ;;  %1541 = vrot.lane.b32.xlu0 %v1535_v15, %s3482_s7 }
 0xc50   : > { %1543 = vrot.lane.b32.xlu1 %v1536_v44, %s3482_s7  ;;  %v1670_v44 = vperm.slane %v4559_v6, 0  ;;  %v1671_v35 = vperm.slane %v4563_v21, 0 }
 0xc57   : > { %1556 = vperm.xlu0 %3387, %v4410_v47  }
 0xc5f   : > { %3389 = vset.pattern.permute.xlu0 %v5749_v46 }
 0xca9   : > { %v4521_v34 = vpop.permute.xlu2 %1545 }
 0xcaa   : > { %5751 = vst [vmem:[#allocation20_spill] sm:$0xff] %v4521_v34 }
 0xcc1   : > { %v4511_v53 = vpop.permute.xlu0 %1541 }
 0xcc9   : > { %v1557_v3 = vpop.permute.xlu0 %1556 }
 0xcca   : > { %v1562_v37 = vmul.f32 %v1559_v18, %v1557_v3  ;;  %v1563_v51 = vmul.f32 %v1560_v13, %v1557_v3  ;;  %v1564_v48 = vmul.f32 %v1561_v54, %v1557_v3  ;;  %v5758_v13 = vld [vmem:[#allocation10_spill] sm:$0xff]  ;;  %v5759_v54 = vmov 19  }
 0xccb   : > { %v4569_v3 = vmul.f32 %v4435_v5, %v5758_v13 }
 0xccc   : > { %1570 = vrot.lane.b32.xlu2 %v1563_v51, %s3482_s7  ;;  %1568 = vrot.lane.b32.xlu1 %v1562_v37, %s3482_s7 }
 0xccd   : > { %v1672_v37 = vperm.slane %v4569_v3, 0 }
 0xcd4   : > { %1583 = vperm.xlu2 %3388, %v4410_v47   ;;  %1572 = vrot.lane.b32.xlu1 %v1564_v48, %s3482_s7 }
 0xcdc   : > { %3390 = vset.pattern.permute.xlu2 %v5750_v31 }
 0xd26   : > { %v4523_v8 = vpop.permute.xlu2 %1570 }
 0xd2e   : > { %v1584_v52 = vpop.permute.xlu2 %1583 }
 0xd2f   : > { %v1589_v56 = vmul.f32 %v1586_v23, %v1584_v52  ;;  %v1590_v9 = vmul.f32 %v1587_v38, %v1584_v52  ;;  %v1591_v39 = vmul.f32 %v1588_v10, %v1584_v52  ;;  %v1697_v23 = vperm.slane %v4559_v6, 1 }
 0xd30   : > { %v1698_v38 = vperm.slane %v4563_v21, 1  ;;  %v1699_v10 = vperm.slane %v4569_v3, 1 }
 0xd31   : > { %1599 = vrot.lane.b32.xlu2 %v1591_v39, %s3482_s7  ;;  %1595 = vrot.lane.b32.xlu0 %v1589_v56, %s3482_s7 }
 0xd32   : > { %1597 = vrot.lane.b32.xlu1 %v1590_v9, %s3482_s7 }
 0xd39   : > { %1610 = vperm.xlu0 %3389, %v4410_v47  }
 0xd41   : > { %3391 = vset.pattern.permute.xlu0 %v5752_v36  ;;  %v5761_v36 = vmov 20  }
 0xd8b   : > { %v4543_v50 = vpop.permute.xlu2 %1599 }
 0xd8c   : > { %5754 = vst [vmem:[#allocation23_spill] sm:$0xff] %v4543_v50  ;;  %v5792_v50 = vmov 32  }
 0xda3   : > { %v4533_v28 = vpop.permute.xlu0 %1595 }
 0xdab   : > { %v1611_v45 = vpop.permute.xlu0 %1610 }
 0xdac   : > { %v1616_v62 = vmul.f32 %v1613_v60, %v1611_v45  ;;  %v1617_v63 = vmul.f32 %v1614_v24, %v1611_v45  ;;  %v1618_v29 = vmul.f32 %v1615_v1, %v1611_v45  ;;  %v1724_v24 = vperm.slane %v4559_v6, 2 }
 0xdad   : > { %v1725_v45 = vperm.slane %v4563_v21, 2 }
 0xdae   : > { %1624 = vrot.lane.b32.xlu2 %v1617_v63, %s3482_s7  ;;  %1622 = vrot.lane.b32.xlu1 %v1616_v62, %s3482_s7 }
 0xdb6   : > { %1637 = vperm.xlu2 %3390, %v4410_v47   ;;  %1626 = vrot.lane.b32.xlu1 %v1618_v29, %s3482_s7  ;;  %v1726_v29 = vperm.slane %v4569_v3, 2 }
 0xdbe   : > { %3392 = vset.pattern.permute.xlu2 %v5753_v27 }
 0xe08   : > { %v4545_v42 = vpop.permute.xlu2 %1624 }
 0xe10   : > { %v1638_v49 = vpop.permute.xlu2 %1637 }
 0xe11   : > { %v1643_v57 = vmul.f32 %v1640_v12, %v1638_v49  ;;  %v1644_v2 = vmul.f32 %v1641_v14, %v1638_v49  ;;  %v1645_v0 = vmul.f32 %v1642_v19, %v1638_v49  ;;  %v5762_v12 = vmov 21  }
 0xe12   : > { %v1751_v49 = vperm.slane %v4559_v6, 3 }
 0xe13   : > { %1653 = vrot.lane.b32.xlu2 %v1645_v0, %s3482_s7  ;;  %1649 = vrot.lane.b32.xlu0 %v1643_v57, %s3482_s7  ;;  %v1752_v57 = vperm.slane %v4563_v21, 3 }
 0xe14   : > { %1651 = vrot.lane.b32.xlu1 %v1644_v2, %s3482_s7  ;;  %v1753_v2 = vperm.slane %v4569_v3, 3 }
 0xe1b   : > { %1667 = vperm.xlu0 %3391, %v4410_v47  }
 0xe23   : > { %3393 = vset.pattern.permute.xlu0 %v5755_v11 }
 0xe6d   : > { %v4577_v48 = vpop.permute.xlu2 %1653 }
 0xe6e   : > { %5760 = vst [vmem:[#allocation22_spill] sm:$0xff] %v4577_v48 }
 0xe85   : > { %v4555_v41 = vpop.permute.xlu0 %1649 }
 0xe8d   : > { %v1668_v15 = vpop.permute.xlu0 %1667 }
 0xe8e   : > { %v1673_v46 = vmul.f32 %v1670_v44, %v1668_v15  ;;  %v1674_v18 = vmul.f32 %v1671_v35, %v1668_v15  ;;  %v1675_v51 = vmul.f32 %v1672_v37, %v1668_v15  ;;  %v5764_v44 = vmov 22  }
 0xe8f   : > { %v1778_v15 = vperm.slane %v4559_v6, 4 }
 0xe90   : > { %1681 = vrot.lane.b32.xlu2 %v1674_v18, %s3490_s13  ;;  %1679 = vrot.lane.b32.xlu1 %v1673_v46, %s3490_s13  ;;  %v1779_v46 = vperm.slane %v4563_v21, 4 }
 0xe98   : > { %1694 = vperm.xlu2 %3392, %v4410_v47   ;;  %1683 = vrot.lane.b32.xlu1 %v1675_v51, %s3490_s13  ;;  %v1780_v51 = vperm.slane %v4569_v3, 4 }
 0xea0   : > { %3394 = vset.pattern.permute.xlu2 %v5759_v54 }
 0xeea   : > { %v4579_v31 = vpop.permute.xlu2 %1681 }
 0xef2   : > { %v1695_v52 = vpop.permute.xlu2 %1694 }
 0xef3   : > { %v1700_v56 = vmul.f32 %v1697_v23, %v1695_v52  ;;  %v1701_v9 = vmul.f32 %v1698_v38, %v1695_v52  ;;  %v1702_v39 = vmul.f32 %v1699_v10, %v1695_v52  ;;  %v5765_v23 = vmov 23  }
 0xef4   : > { %v1805_v52 = vperm.slane %v4559_v6, 5 }
 0xef5   : > { %1710 = vrot.lane.b32.xlu2 %v1702_v39, %s3490_s13  ;;  %1706 = vrot.lane.b32.xlu0 %v1700_v56, %s3490_s13  ;;  %v1806_v56 = vperm.slane %v4563_v21, 5 }
 0xef6   : > { %1708 = vrot.lane.b32.xlu1 %v1701_v9, %s3490_s13  ;;  %v1807_v9 = vperm.slane %v4569_v3, 5 }
 0xefd   : > { %1721 = vperm.xlu0 %3393, %v4410_v47  }
 0xf05   : > { %3395 = vset.pattern.permute.xlu0 %v5761_v36 }
 0xf4f   : > { %v4599_v14 = vpop.permute.xlu2 %1710 }
 0xf50   : > { %5763 = vst [vmem:[#allocation26_spill] sm:$0xff] %v4599_v14 }
 0xf67   : > { %v4589_v60 = vpop.permute.xlu0 %1706 }
 0xf6f   : > { %v1722_v62 = vpop.permute.xlu0 %1721 }
 0xf70   : > { %v1727_v63 = vmul.f32 %v1724_v24, %v1722_v62  ;;  %v1728_v1 = vmul.f32 %v1725_v45, %v1722_v62  ;;  %v1729_v27 = vmul.f32 %v1726_v29, %v1722_v62  ;;  %v5767_v62 = vmov 24  }
 0xf71   : > { %v1833_v29 = vperm.slane %v4563_v21, 6 }
 0xf72   : > { %1735 = vrot.lane.b32.xlu2 %v1728_v1, %s3490_s13  ;;  %1733 = vrot.lane.b32.xlu1 %v1727_v63, %s3490_s13  ;;  %v1832_v1 = vperm.slane %v4559_v6, 6 }
 0xf7a   : > { %1748 = vperm.xlu2 %3394, %v4410_v47   ;;  %1737 = vrot.lane.b32.xlu1 %v1729_v27, %s3490_s13 }
 0xf82   : > { %3396 = vset.pattern.permute.xlu2 %v5762_v12 }
 0xfcc   : > { %v4601_v19 = vpop.permute.xlu2 %1735 }
 0xfd4   : > { %v1749_v0 = vpop.permute.xlu2 %1748 }
 0xfd5   : > { %v1754_v11 = vmul.f32 %v1751_v49, %v1749_v0  ;;  %v1755_v17 = vmul.f32 %v1752_v57, %v1749_v0  ;;  %v1756_v55 = vmul.f32 %v1753_v2, %v1749_v0  ;;  %v1834_v57 = vperm.slane %v4569_v3, 6 }
 0xfd6   : > { %v5768_v0 = vmov 25  }
 0xfd7   : > { %1764 = vrot.lane.b32.xlu2 %v1756_v55, %s3490_s13  ;;  %1760 = vrot.lane.b32.xlu0 %v1754_v11, %s3490_s13  ;;  %v1859_v55 = vperm.slane %v4559_v6, 7  ;;  %v5771_v6 = vld [vmem:[#allocation13_spill] sm:$0xff] }
 0xfd8   : > { %1762 = vrot.lane.b32.xlu1 %v1755_v17, %s3490_s13 }
 0xfdf   : > { %1775 = vperm.xlu0 %3395, %v4410_v47  }
 0xfe7   : > { %3397 = vset.pattern.permute.xlu0 %v5764_v44  ;;  %v1860_v44 = vperm.slane %v4563_v21, 7  ;;  %v4659_v21 = vmul.f32 %v4445_v59, %v5771_v6 }
 0xfe9   : > { %5772 = vst [vmem:[#allocation34_spill] sm:$0xff] %v4659_v21 }
0x1031   : > { %v4621_v38 = vpop.permute.xlu2 %1764 }
0x1032   : > { %5766 = vst [vmem:[#allocation25_spill] sm:$0xff] %v4621_v38 }
0x1049   : > { %v4611_v35 = vpop.permute.xlu0 %1760 }
0x1051   : > { %v1776_v18 = vpop.permute.xlu0 %1775 }
0x1052   : > { %v1781_v13 = vmul.f32 %v1778_v15, %v1776_v18  ;;  %v1782_v37 = vmul.f32 %v1779_v46, %v1776_v18  ;;  %v1783_v54 = vmul.f32 %v1780_v51, %v1776_v18  ;;  %v1861_v15 = vperm.slane %v4569_v3, 7  ;;  %v5773_v3 = vld [vmem:[#allocation15_spill] sm:$0xff] }
0x1053   : > { %v5770_v51 = vmov 26  }
0x1054   : > { %1789 = vrot.lane.b32.xlu2 %v1782_v37, %s3490_s13  ;;  %1787 = vrot.lane.b32.xlu1 %v1781_v13, %s3490_s13 }
0x105c   : > { %1802 = vperm.xlu2 %3396, %v4410_v47   ;;  %1791 = vrot.lane.b32.xlu1 %v1783_v54, %s3490_s13 }
0x1064   : > { %3398 = vset.pattern.permute.xlu2 %v5765_v23  ;;  %v4663_v23 = vmul.f32 %v4432_v16, %v5773_v3 }
0x1066   : > { %5774 = vst [vmem:[#allocation30_spill] sm:$0xff] %v4663_v23 }
0x10ae   : > { %v4623_v10 = vpop.permute.xlu2 %1789 }
0x10b6   : > { %v1803_v39 = vpop.permute.xlu2 %1802 }
0x10b7   : > { %v1808_v36 = vmul.f32 %v1805_v52, %v1803_v39  ;;  %v1809_v24 = vmul.f32 %v1806_v56, %v1803_v39  ;;  %v1810_v45 = vmul.f32 %v1807_v9, %v1803_v39  ;;  %v1889_v52 = vperm.slane %v4659_v21, 0 }
0x10b8   : > { %v1890_v56 = vperm.slane %v4663_v23, 0 }
0x10b9   : > { %1818 = vrot.lane.b32.xlu2 %v1810_v45, %s3490_s13  ;;  %1814 = vrot.lane.b32.xlu0 %v1808_v36, %s3490_s13 }
0x10ba   : > { %1816 = vrot.lane.b32.xlu1 %v1809_v24, %s3490_s13  ;;  %v5775_v24 = vld [vmem:[#allocation14_spill] sm:$0xff] }
0x10bb   : > { %v4669_v45 = vmul.f32 %v4435_v5, %v5775_v24  ;;  %v1970_v24 = vperm.slane %v4659_v21, 3 }
0x10bd   : > { %5776 = vst [vmem:[#allocation32_spill] sm:$0xff] %v4669_v45  ;;  %v2026_v38 = vperm.slane %v4669_v45, 5 }
0x10c1   : > { %1829 = vperm.xlu0 %3397, %v4410_v47  }
0x10c9   : > { %3399 = vset.pattern.permute.xlu0 %v5767_v62  ;;  %v1891_v62 = vperm.slane %v4669_v45, 0 }
0x1113   : > { %v4643_v11 = vpop.permute.xlu2 %1818 }
0x1114   : > { %5769 = vst [vmem:[#allocation29_spill] sm:$0xff] %v4643_v11  ;;  %v2025_v11 = vperm.slane %v4663_v23, 5 }
0x112b   : > { %v4633_v63 = vpop.permute.xlu0 %1814 }
0x1133   : > { %v1830_v27 = vpop.permute.xlu0 %1829 }
0x1134   : > { %v1835_v12 = vmul.f32 %v1832_v1, %v1830_v27  ;;  %v1836_v49 = vmul.f32 %v1833_v29, %v1830_v27  ;;  %v1837_v2 = vmul.f32 %v1834_v57, %v1830_v27  ;;  %v5777_v29 = vmov 27  }
0x1135   : > { %v1917_v57 = vperm.slane %v4663_v23, 1 }
0x1136   : > { %1843 = vrot.lane.b32.xlu2 %v1836_v49, %s3490_s13  ;;  %1841 = vrot.lane.b32.xlu1 %v1835_v12, %s3490_s13  ;;  %v1916_v49 = vperm.slane %v4659_v21, 1 }
0x113e   : > { %1856 = vperm.xlu2 %3398, %v4410_v47   ;;  %1845 = vrot.lane.b32.xlu1 %v1837_v2, %s3490_s13  ;;  %v1918_v2 = vperm.slane %v4669_v45, 1 }
0x1146   : > { %3400 = vset.pattern.permute.xlu2 %v5768_v0 }
0x1190   : > { %v4645_v17 = vpop.permute.xlu2 %1843 }
0x1198   : > { %v1857_v46 = vpop.permute.xlu2 %1856 }
0x1199   : > { %v1862_v18 = vmul.f32 %v1859_v55, %v1857_v46  ;;  %v1863_v13 = vmul.f32 %v1860_v44, %v1857_v46  ;;  %v1864_v37 = vmul.f32 %v1861_v15, %v1857_v46  ;;  %v5779_v46 = vmov 28  }
0x119b   : > { %1872 = vrot.lane.b32.xlu2 %v1864_v37, %s3490_s13  ;;  %1868 = vrot.lane.b32.xlu0 %v1862_v18, %s3490_s13  ;;  %v1944_v37 = vperm.slane %v4663_v23, 2 }
0x119c   : > { %1870 = vrot.lane.b32.xlu1 %v1863_v13, %s3490_s13  ;;  %v1943_v13 = vperm.slane %v4659_v21, 2 }
0x11a3   : > { %1886 = vperm.xlu0 %3399, %v4410_v47  }
0x11ab   : > { %3401 = vset.pattern.permute.xlu0 %v5770_v51 }
0x11f5   : > { %v4677_v27 = vpop.permute.xlu2 %1872 }
0x11f6   : > { %5778 = vst [vmem:[#allocation35_spill] sm:$0xff] %v4677_v27  ;;  %v2024_v27 = vperm.slane %v4659_v21, 5 }
0x120d   : > { %v4655_v54 = vpop.permute.xlu0 %1868 }
0x1215   : > { %v1887_v9 = vpop.permute.xlu0 %1886 }
0x1216   : > { %v1892_v39 = vmul.f32 %v1889_v52, %v1887_v9  ;;  %v1893_v36 = vmul.f32 %v1890_v56, %v1887_v9  ;;  %v1894_v1 = vmul.f32 %v1891_v62, %v1887_v9  ;;  %v1945_v52 = vperm.slane %v4669_v45, 2 }
0x1217   : > { %v5780_v9 = vmov 29   ;;  %v1971_v62 = vperm.slane %v4663_v23, 3 }
0x1218   : > { %1900 = vrot.lane.b32.xlu2 %v1893_v36, %s3477_s30  ;;  %1898 = vrot.lane.b32.xlu1 %v1892_v39, %s3477_s30 }
0x1220   : > { %1913 = vperm.xlu2 %3400, %v4410_v47   ;;  %1902 = vrot.lane.b32.xlu1 %v1894_v1, %s3477_s30  ;;  %v1972_v1 = vperm.slane %v4669_v45, 3 }
0x1228   : > { %3402 = vset.pattern.permute.xlu2 %v5777_v29 }
0x1272   : > { %v4679_v12 = vpop.permute.xlu2 %1900 }
0x127a   : > { %v1914_v0 = vpop.permute.xlu2 %1913 }
0x127b   : > { %v1919_v55 = vmul.f32 %v1916_v49, %v1914_v0  ;;  %v1920_v44 = vmul.f32 %v1917_v57, %v1914_v0  ;;  %v1921_v15 = vmul.f32 %v1918_v2, %v1914_v0  ;;  %v5782_v0 = vmov 30  }
0x127d   : > { %1929 = vrot.lane.b32.xlu2 %v1921_v15, %s3477_s30  ;;  %1925 = vrot.lane.b32.xlu0 %v1919_v55, %s3477_s30  ;;  %v4711_v55 = vpop.permute.xlu1 %1464 }
0x127e   : > { %1927 = vrot.lane.b32.xlu1 %v1920_v44, %s3477_s30  ;;  %5783 = vst [vmem:[#allocation37_spill] sm:$0xff] %v4711_v55 }
0x1285   : > { %1940 = vperm.xlu0 %3401, %v4410_v47   ;;  %v4713_v44 = vpop.permute.xlu1 %1489 }
0x128d   : > { %3403 = vset.pattern.permute.xlu0 %v5779_v46  ;;  %v4715_v15 = vpop.permute.xlu1 %1514 }
0x1295   : > { %v4717_v46 = vpop.permute.xlu1 %1518 }
0x1296   : > { %5784 = vst [vmem:[#allocation33_spill] sm:$0xff] %v4717_v46 }
0x12d7   : > { %v4699_v39 = vpop.permute.xlu2 %1929 }
0x12d8   : > { %5781 = vst [vmem:[#allocation38_spill] sm:$0xff] %v4699_v39 }
0x12ef   : > { %v4689_v18 = vpop.permute.xlu0 %1925 }
0x12f7   : > { %v1941_v51 = vpop.permute.xlu0 %1940 }
0x12f8   : > { %v1946_v6 = vmul.f32 %v1943_v13, %v1941_v51  ;;  %v1947_v3 = vmul.f32 %v1944_v37, %v1941_v51  ;;  %v1948_v56 = vmul.f32 %v1945_v52, %v1941_v51  ;;  %v4719_v13 = vpop.permute.xlu1 %1543 }
0x12fa   : > { %1954 = vrot.lane.b32.xlu2 %v1947_v3, %s3477_s30  ;;  %1952 = vrot.lane.b32.xlu1 %v1946_v6, %s3477_s30  ;;  %v1997_v6 = vperm.slane %v4659_v21, 4  ;;  %v1998_v3 = vperm.slane %v4663_v23, 4 }
0x1300   : > { %v4723_v51 = vpop.permute.xlu1 %1568 }
0x1302   : > { %1967 = vperm.xlu2 %3402, %v4410_v47   ;;  %1956 = vrot.lane.b32.xlu1 %v1948_v56, %s3477_s30 }
0x130a   : > { %3404 = vset.pattern.permute.xlu2 %v5780_v9 }
0x1354   : > { %v4701_v36 = vpop.permute.xlu2 %1954 }
0x135c   : > { %v1968_v29 = vpop.permute.xlu2 %1967 }
0x135d   : > { %v1973_v49 = vmul.f32 %v1970_v24, %v1968_v29  ;;  %v1974_v57 = vmul.f32 %v1971_v62, %v1968_v29  ;;  %v1975_v2 = vmul.f32 %v1972_v1, %v1968_v29  ;;  %v4727_v24 = vpop.permute.xlu1 %1572  ;;  %v1999_v62 = vperm.slane %v4669_v45, 4 }
0x135e   : > { %5785 = vst [vmem:[#allocation43_spill] sm:$0xff] %v4727_v24 }
0x135f   : > { %1983 = vrot.lane.b32.xlu2 %v1975_v2, %s3477_s30  ;;  %1979 = vrot.lane.b32.xlu0 %v1973_v49, %s3477_s30 }
0x1360   : > { %1981 = vrot.lane.b32.xlu1 %v1974_v57, %s3477_s30  ;;  %v5786_v57 = vmov 31  }
0x1365   : > { %v4732_v29 = vpop.permute.xlu1 %1597 }
0x1367   : > { %1994 = vperm.xlu0 %3403, %v4410_v47  }
0x136d   : > { %v4736_v49 = vpop.permute.xlu1 %1622 }
0x136f   : > { %3405 = vset.pattern.permute.xlu0 %v5782_v0 }
0x1375   : > { %v4739_v2 = vpop.permute.xlu1 %1626 }
0x1376   : > { %5787 = vst [vmem:[#allocation31_spill] sm:$0xff] %v4739_v2 }
0x137d   : > { %v4741_v0 = vpop.permute.xlu1 %1651 }
0x13d1   : > { %v4721_v37 = vpop.permute.xlu0 %1979 }
0x13d9   : > { %v1995_v52 = vpop.permute.xlu0 %1994 }
0x13da   : > { %v2000_v56 = vmul.f32 %v1997_v6, %v1995_v52  ;;  %v2001_v9 = vmul.f32 %v1998_v3, %v1995_v52  ;;  %v2002_v1 = vmul.f32 %v1999_v62, %v1995_v52  ;;  %v4743_v6 = vpop.permute.xlu1 %1679  ;;  %v4753_v62 = vpop.permute.xlu2 %1983 }
0x13db   : > { %5790 = vst [vmem:[#allocation49_spill] sm:$0xff] %v4753_v62 }
0x13dc   : > { %2008 = vrot.lane.b32.xlu2 %v2001_v9, %s3477_s30  ;;  %2006 = vrot.lane.b32.xlu1 %v2000_v56, %s3477_s30 }
0x13e2   : > { %v4745_v3 = vpop.permute.xlu1 %1683 }
0x13e3   : > { %5788 = vst [vmem:[#allocation46_spill] sm:$0xff] %v4745_v3 }
0x13e4   : > { %2021 = vperm.xlu2 %3404, %v4410_v47   ;;  %2010 = vrot.lane.b32.xlu1 %v2002_v1, %s3477_s30 }
0x13ea   : > { %v4747_v56 = vpop.permute.xlu1 %1708 }
0x13ec   : > { %3406 = vset.pattern.permute.xlu2 %v5786_v57 }
0x13f2   : > { %v4749_v52 = vpop.permute.xlu1 %1733 }
0x13fa   : > { %v4751_v9 = vpop.permute.xlu1 %1737 }
0x13fb   : > { %5789 = vst [vmem:[#allocation36_spill] sm:$0xff] %v4751_v9 }
0x1402   : > { %v4755_v1 = vpop.permute.xlu1 %1762 }
0x140a   : > { %v4759_v57 = vpop.permute.xlu1 %1787 }
0x1412   : > { %v4767_v62 = vpop.permute.xlu1 %1791 }
0x1413   : > { %5791 = vst [vmem:[#allocation45_spill] sm:$0xff] %v4767_v62 }
0x141a   : > { %v4770_v9 = vpop.permute.xlu1 %1816 }
0x1422   : > { %v1842_v24 = vpop.permute.xlu1 %1841 }
0x142a   : > { %v4773_v34 = vpop.permute.xlu1 %1845 }
0x142b   : > { %5793 = vst [vmem:[#allocation39_spill] sm:$0xff] %v4773_v34 }
0x1436   : > { %v4757_v39 = vpop.permute.xlu2 %2008 }
0x143e   : > { %v2022_v14 = vpop.permute.xlu2 %2021 }
0x143f   : > { %v2027_v3 = vmul.f32 %v2024_v27, %v2022_v14  ;;  %v2028_v48 = vmul.f32 %v2025_v11, %v2022_v14  ;;  %v2029_v2 = vmul.f32 %v2026_v38, %v2022_v14  ;;  %v4775_v27 = vpop.permute.xlu1 %1870  ;;  %v5794_v14 = vld [vmem:[#allocation5_spill] sm:$0xff] }
0x1440   : > { %v1336_v38 = vmul.f32 %v4445_v59, %v5794_v14 }
0x1441   : > { %2037 = vrot.lane.b32.xlu2 %v2029_v2, %s3477_s30  ;;  %2033 = vrot.lane.b32.xlu0 %v2027_v3, %s3477_s30 }
0x1442   : > { %2035 = vrot.lane.b32.xlu1 %v2028_v48, %s3477_s30  ;;  %v1344_v2 = vperm.slane %v1336_v38, 0  ;;  %v1357_v3 = vperm.slane %v1336_v38, 1  ;;  %v1370_v46 = vperm.slane %v1336_v38, 2  ;;  %v1383_v26 = vperm.slane %v1336_v38, 3 }
0x1443   : > { %v1409_v14 = vperm.slane %v1336_v38, 5  ;;  %v1422_v23 = vperm.slane %v1336_v38, 6 }
0x1444   : > { %v1347_v48 = vmul.f32 %v1344_v2, %v4483_v43  ;;  %v1360_v62 = vmul.f32 %v1357_v3, %v4439_v61  ;;  %v1386_v5 = vmul.f32 %v1383_v26, %v4441_v22 }
0x1445   : > { %v1412_v3 = vmul.f32 %v1409_v14, %v4485_v32 }
0x1446   : > { %v1363_v55 = vadd.f32 %v1360_v62, %v1347_v48  ;;  %v1425_v62 = vmul.f32 %v1422_v23, %v4443_v30  ;;  %v1520_v23 = vsel %vm378_vm2, %v4715_v15, %v4501_v4  ;;  %v1628_v15 = vsel %vm378_vm2, %v4736_v49, %v4545_v42 }
0x1447   : > { %v1899_v11 = vpop.permute.xlu1 %1898  ;;  %v1739_v49 = vsel %vm503_vm8, %v4749_v52, %v4601_v19  ;;  %v1847_v52 = vsel %vm503_vm8, %v1842_v24, %v4645_v17 }
0x1449   : > { %2048 = vperm.xlu0 %3405, %v4410_v47   ;;  %v1396_v47 = vperm.slane %v1336_v38, 4 }
0x144b   : > { %v1399_v59 = vmul.f32 %v1396_v47, %v4469_v58 }
0x144f   : > { %v4783_v34 = vpop.permute.xlu1 %1902 }
0x1450   : > { %5795 = vst [vmem:[#allocation50_spill] sm:$0xff] %v4783_v34 }
0x1451   : > { %3407 = vset.pattern.permute.xlu0 %v5792_v50  ;;  %v1373_v50 = vmul.f32 %v1370_v46, %v4467_v33  ;;  %v1435_v46 = vperm.slane %v1336_v38, 7 }
0x1453   : > { %v1376_v16 = vadd.f32 %v1373_v50, %v1363_v55  ;;  %v1438_v26 = vmul.f32 %v1435_v46, %v4471_v40  ;;  %v1547_v55 = vsel %vm378_vm2, %v4511_v53, %v4719_v13  ;;  %v1655_v53 = vsel %vm378_vm2, %v4555_v41, %v4741_v0 }
0x1454   : > { %v1766_v41 = vsel %vm503_vm8, %v4611_v35, %v4755_v1  ;;  %v1874_v35 = vsel %vm503_vm8, %v4655_v54, %v4775_v27 }
0x1455   : > { %v1389_v45 = vadd.f32 %v1386_v5, %v1376_v16  ;;  %v1466_v16 = vsel %vm378_vm2, %v4473_v25, %v4487_v7  ;;  %v1493_v5 = vsel %vm378_vm2, %v4489_v20, %v4713_v44  ;;  %v1574_v25 = vsel %vm378_vm2, %v4723_v51, %v4523_v8 }
0x1456   : > { %v1601_v20 = vsel %vm378_vm2, %v4533_v28, %v4732_v29  ;;  %v1685_v51 = vsel %vm503_vm8, %v4743_v6, %v4579_v31  ;;  %v1712_v28 = vsel %vm503_vm8, %v4589_v60, %v4747_v56  ;;  %v1793_v6 = vsel %vm503_vm8, %v4759_v57, %v4623_v10 }
0x1457   : > { %v1402_v21 = vadd.f32 %v1399_v59, %v1389_v45  ;;  %v4786_v2 = vpop.permute.xlu1 %1927  ;;  %v1820_v60 = vsel %vm503_vm8, %v4633_v63, %v4770_v9 }
0x1459   : > { %v1415_v48 = vadd.f32 %v1412_v3, %v1402_v21 }
0x145b   : > { %v1428_v33 = vadd.f32 %v1425_v62, %v1415_v48 }
0x145d   : > { %v1441_v47 = vadd.f32 %v1438_v26, %v1428_v33 }
0x145f   : > { %v1953_v34 = vpop.permute.xlu1 %1952  ;;  %v1471_v45 = vadd.f32 %v1466_v16, %v1441_v47 }
0x1460   : > { %v1958_v24 = vsel %vm351_vm1, %v1953_v34, %v4701_v36 }
0x1461   : > { %v1498_v21 = vadd.f32 %v1493_v5, %v1471_v45 }
0x1463   : > { %v1525_v38 = vadd.f32 %v1520_v23, %v1498_v21 }
0x1465   : > { %v1552_v33 = vadd.f32 %v1547_v55, %v1525_v38  ;;  %v1904_v55 = vsel %vm351_vm1, %v1899_v11, %v4679_v12  ;;  %v1931_v38 = vsel %vm351_vm1, %v4689_v18, %v4786_v2 }
0x1467   : > { %v4806_v50 = vpop.permute.xlu1 %1956  ;;  %v1579_v59 = vadd.f32 %v1574_v25, %v1552_v33 }
0x1469   : > { %v1606_v14 = vadd.f32 %v1601_v20, %v1579_v59 }
0x146b   : > { %v1633_v3 = vadd.f32 %v1628_v15, %v1606_v14 }
0x146d   : > { %v1660_v62 = vadd.f32 %v1655_v53, %v1633_v3 }
0x146f   : > { %v4820_v48 = vpop.permute.xlu1 %1981  ;;  %v1690_v46 = vadd.f32 %v1685_v51, %v1660_v62  ;;  %v5796_v51 = vld [vmem:[#allocation34_spill] sm:$0xff] }
0x1470   : > { %v1985_v54 = vsel %vm351_vm1, %v4721_v37, %v4820_v48  ;;  %v2051_v34 = vperm.slane %v5796_v51, 6  ;;  %v5797_v62 = vld [vmem:[#allocation30_spill] sm:$0xff] }
0x1471   : > { %v1717_v26 = vadd.f32 %v1712_v28, %v1690_v46  ;;  %v2052_v28 = vperm.slane %v5797_v62, 6 }
0x1473   : > { %v1744_v16 = vadd.f32 %v1739_v49, %v1717_v26  ;;  %v5798_v26 = vld [vmem:[#allocation32_spill] sm:$0xff] }
0x1475   : > { %v1771_v47 = vadd.f32 %v1766_v41, %v1744_v16  ;;  %v2053_v41 = vperm.slane %v5798_v26, 6 }
0x1477   : > { %v2007_v5 = vpop.permute.xlu1 %2006  ;;  %v1798_v45 = vadd.f32 %v1793_v6, %v1771_v47  ;;  %v5799_v6 = vld [vmem:[#allocation16_spill] sm:$0xff] }
0x1478   : > { %v2012_v11 = vsel %vm351_vm1, %v2007_v5, %v4757_v39 }
0x1479   : > { %v1825_v23 = vadd.f32 %v1820_v60, %v1798_v45  ;;  %v2078_v60 = vperm.slane %v5796_v51, 7  ;;  %v2079_v45 = vperm.slane %v5797_v62, 7  ;;  %v5803_v51 = vld [vmem:[#allocation4_spill] sm:$0xff]  ;;  %v5805_v62 = vld [vmem:[#allocation19_spill] sm:$0xff] }
0x147b   : > { %v1852_v21 = vadd.f32 %v1847_v52, %v1825_v23  ;;  %v2080_v52 = vperm.slane %v5798_v26, 7 }
0x147d   : > { %v1879_v57 = vadd.f32 %v1874_v35, %v1852_v21 }
0x147f   : > { %v1909_v25 = vadd.f32 %v1904_v55, %v1879_v57  ;;  %v4847_v63 = vpop.permute.xlu1 %2010 }
0x1481   : > { %v1936_v33 = vadd.f32 %v1931_v38, %v1909_v25 }
0x1483   : > { %v1963_v20 = vadd.f32 %v1958_v24, %v1936_v33 }
0x1485   : > { %v1990_v59 = vadd.f32 %v1985_v54, %v1963_v20 }
0x1487   : > { %v2017_v14 = vadd.f32 %v2012_v11, %v1990_v59  ;;  %v5800_v59 = vld [vmem:[#allocation3_spill] sm:$0xff] }
0x149b   : > { %v4867_v47 = vpop.permute.xlu2 %2037 }
0x14b3   : > { %v2034_v15 = vpop.permute.xlu0 %2033 }
0x14b4   : > { %v4856_v53 = vpop.permute.xlu1 %2035 }
0x14b5   : > { %v2039_v18 = vsel %vm351_vm1, %v2034_v15, %v4856_v53  ;;  %v5801_v15 = vperm.slane %v5800_v59, 4 }
0x14b6   : > { %v2044_v3 = vadd.f32 %v2039_v18, %v2017_v14  ;;  %v5802_v14 = vld [vmem:[#allocation17_spill] sm:$0xff] }
0x14b7   : > { %v4891_v18 = vmul.f32 %v5802_v14, %v5801_v15 }
0x14bb   : > { %v2049_v46 = vpop.permute.xlu0 %2048 }
0x14bc   : > { %v2054_v49 = vmul.f32 %v2051_v34, %v2049_v46  ;;  %v2055_v37 = vmul.f32 %v2052_v28, %v2049_v46  ;;  %v2056_v16 = vmul.f32 %v2053_v41, %v2049_v46  ;;  %v5804_v34 = vperm.slane %v5803_v51, 4 }
0x14bd   : > { %v2107_v46 = vperm.slane %v4891_v18, 0  ;;  %v5806_v41 = vmov 34   ;;  %v2170_v51 = vperm.slane %v4891_v18, 3 }
0x14be   : > { %2062 = vrot.lane.b32.xlu2 %v2055_v37, %s3477_s30  ;;  %2060 = vrot.lane.b32.xlu1 %v2054_v49, %s3477_s30  ;;  %v4896_v28 = vmul.f32 %v5805_v62, %v5804_v34 }
0x14c0   : > { %v2150_v59 = vperm.slane %v4896_v28, 2  ;;  %v2171_v34 = vperm.slane %v4896_v28, 3 }
0x14c6   : > { %2075 = vperm.xlu2 %3406, %v5799_v6   ;;  %2064 = vrot.lane.b32.xlu1 %v2056_v16, %s3477_s30  ;;  %v5807_v16 = vmov 35  }
0x1518   : > { %v4869_v5 = vpop.permute.xlu2 %2062 }
0x1520   : > { %v2076_v23 = vpop.permute.xlu2 %2075 }
0x1521   : > { %v2081_v35 = vmul.f32 %v2078_v60, %v2076_v23  ;;  %v2082_v21 = vmul.f32 %v2079_v45, %v2076_v23  ;;  %v2083_v55 = vmul.f32 %v2080_v52, %v2076_v23  ;;  %v3521_v60 = vmov 36  }
0x1522   : > { %v3522_v45 = vmov 37   ;;  %v3523_v52 = vmov 38   ;;  %v3524_v23 = vmov 39  }
0x1523   : > { %2091 = vrot.lane.b32.xlu2 %v2083_v55, %s3477_s30  ;;  %2087 = vrot.lane.b32.xlu0 %v2081_v35, %s3477_s30  ;;  %v3525_v35 = vmov 40   ;;  %v2128_v55 = vperm.slane %v4891_v18, 1 }
0x1524   : > { %2089 = vrot.lane.b32.xlu1 %v2082_v21, %s3477_s30 }
0x152b   : > { %2104 = vperm.xlu0 %3407, %v5799_v6  }
0x1530   : > { %v2061_v57 = vpop.permute.xlu1 %2060 }
0x1531   : > { %v2066_v25 = vsel %vm351_vm1, %v2061_v57, %v4869_v5  ;;  %v2129_v57 = vperm.slane %v4896_v28, 1 }
0x1532   : > { %v2071_v33 = vadd.f32 %v2066_v25, %v2044_v3  ;;  %v2108_v3 = vperm.slane %v4896_v28, 0 }
0x1538   : > { %v4878_v38 = vpop.permute.xlu1 %2064 }
0x1595   : > { %v2088_v24 = vpop.permute.xlu0 %2087 }
0x1596   : > { %v4882_v54 = vpop.permute.xlu1 %2089 }
0x1597   : > { %v2093_v20 = vsel %vm351_vm1, %v2088_v24, %v4882_v54 }
0x1598   : > { %v4886_v11 = vadd.f32 %v2093_v20, %v2071_v33  ;;  %v2149_v20 = vperm.slane %v4891_v18, 2 }
0x159d   : > { %v2105_v49 = vpop.permute.xlu0 %2104 }
0x159e   : > { %v2109_v37 = vmul.f32 %v2107_v46, %v2105_v49  ;;  %v2110_v26 = vmul.f32 %v2108_v3, %v2105_v49 }
0x15a0   : > { %2115 = vrot.lane.b32.xlu2 %v2110_v26, %s3473_s27  ;;  %2113 = vrot.lane.b32.xlu1 %v2109_v37, %s3473_s27  ;;  %v2191_v37 = vperm.slane %v4891_v18, 4  ;;  %v2192_v26 = vperm.slane %v4896_v28, 4 }
0x15a8   : > { %2125 = vperm.xlu1 %3408, %v5799_v6  }
0x15b0   : > { %3409 = vset.pattern.permute.xlu1 %v5806_v41 }
0x15b1   : > { %2146 = vperm.xlu1 %3409, %v5799_v6  }
0x15b9   : > { %3410 = vset.pattern.permute.xlu1 %v5807_v16 }
0x15ba   : > { %2167 = vperm.xlu1 %3410, %v5799_v6  }
0x15c2   : > { %3411 = vset.pattern.permute.xlu1 %v3521_v60 }
0x15c3   : > { %2188 = vperm.xlu1 %3411, %v5799_v6  }
0x15cb   : > { %3412 = vset.pattern.permute.xlu1 %v3522_v45  ;;  %v2212_v45 = vperm.slane %v4891_v18, 5 }
0x15cc   : > { %2209 = vperm.xlu1 %3412, %v5799_v6  }
0x15d4   : > { %3413 = vset.pattern.permute.xlu1 %v3523_v52  ;;  %v2213_v52 = vperm.slane %v4896_v28, 5 }
0x15d5   : > { %2230 = vperm.xlu1 %3413, %v5799_v6  }
0x15dd   : > { %3414 = vset.pattern.permute.xlu1 %v3524_v23  ;;  %v5808_v23 = vld [vmem:[#allocation6_spill] sm:$0xff] }
0x15de   : > { %2251 = vperm.xlu1 %3414, %v5799_v6  }
0x15e6   : > { %3415 = vset.pattern.permute.xlu1 %v3525_v35  ;;  %v4934_v35 = vmul.f32 %v5805_v62, %v5808_v23 }
0x15e7   : > { %2278 = vperm.xlu1 %3415, %v5799_v6  }
0x15e8   : > { %v1359_v62 = vperm.slane %v4934_v35, 1 }
0x1612   : > { %v4912_v21 = vpop.permute.xlu1 %2113 }
0x161a   : > { %v2126_v25 = vpop.permute.xlu1 %2125 }
0x161b   : > { %v2130_v24 = vmul.f32 %v2128_v55, %v2126_v25  ;;  %v2131_v33 = vmul.f32 %v2129_v57, %v2126_v25  ;;  %v3526_v57 = vmov 41   ;;  %v4936_v25 = vld [vmem:[#allocation2 + $0x10] sm:$0xff] }
0x161c   : > { %3416 = vset.pattern.permute.xlu2 %v3526_v57 }
0x161d   : > { %2136 = vrot.lane.b32.xlu0 %v2131_v33, %s3473_s27  ;;  %2134 = vrot.lane.b32.xlu2 %v2130_v24, %s3473_s27  ;;  %v5809_v24 = vld [vmem:[#allocation75_spill] sm:$0xff] }
0x161e   : > { %v4940_v33 = vmul.f32 %v4936_v25, %v5809_v24 }
0x1623   : > { %v2147_v15 = vpop.permute.xlu1 %2146 }
0x1624   : > { %v2151_v14 = vmul.f32 %v2149_v20, %v2147_v15  ;;  %v2152_v6 = vmul.f32 %v2150_v59, %v2147_v15  ;;  %v1346_v15 = vperm.slane %v4934_v35, 0 }
0x1626   : > { %2157 = vrot.lane.b32.xlu0 %v2152_v6, %s3473_s27  ;;  %2155 = vrot.lane.b32.xlu2 %v2151_v14, %s3473_s27  ;;  %v1345_v14 = vperm.slane %v4940_v33, 0  ;;  %v1358_v6 = vperm.slane %v4940_v33, 1 }
0x162c   : > { %v2168_v46 = vpop.permute.xlu1 %2167 }
0x162d   : > { %v2172_v3 = vmul.f32 %v2170_v51, %v2168_v46  ;;  %v2173_v49 = vmul.f32 %v2171_v34, %v2168_v46  ;;  %v1349_v51 = vmul.f32 %v1346_v15, %v4483_v43  ;;  %v1362_v34 = vmul.f32 %v1359_v62, %v4439_v61 }
0x162e   : > { %v1348_v46 = vmul.f32 %v1345_v14, %v4483_v43  ;;  %v5810_v43 = vld [vmem:[#allocation18_spill] sm:$0xff]  ;;  %v1398_v15 = vperm.slane %v4934_v35, 4  ;;  %v1397_v14 = vperm.slane %v4940_v33, 4 }
0x162f   : > { %2178 = vrot.lane.b32.xlu0 %v2173_v49, %s3473_s27  ;;  %2176 = vrot.lane.b32.xlu2 %v2172_v3, %s3473_s27  ;;  %v1361_v3 = vmul.f32 %v1358_v6, %v4439_v61  ;;  %v1372_v49 = vperm.slane %v4934_v35, 2 }
0x1631   : > { %v1364_v57 = vadd.f32 %v1361_v3, %v1348_v46  ;;  %v1375_v24 = vmul.f32 %v1372_v49, %v5810_v43  ;;  %v2254_v46 = vperm.slane %v4891_v18, 7  ;;  %v2255_v3 = vperm.slane %v4896_v28, 7 }
0x1632   : > { %v1401_v49 = vmul.f32 %v1398_v15, %v4469_v58 }
0x1635   : > { %v2189_v41 = vpop.permute.xlu1 %2188 }
0x1636   : > { %v2193_v16 = vmul.f32 %v2191_v37, %v2189_v41  ;;  %v2194_v60 = vmul.f32 %v2192_v26, %v2189_v41  ;;  %v2233_v37 = vperm.slane %v4891_v18, 6  ;;  %v2234_v26 = vperm.slane %v4896_v28, 6 }
0x1637   : > { %v1371_v41 = vperm.slane %v4940_v33, 2  ;;  %v1410_v18 = vperm.slane %v4940_v33, 5  ;;  %v1423_v28 = vperm.slane %v4940_v33, 6 }
0x1638   : > { %2199 = vrot.lane.b32.xlu0 %v2194_v60, %s3473_s27  ;;  %2197 = vrot.lane.b32.xlu2 %v2193_v16, %s3473_s27  ;;  %v1365_v60 = vadd.f32 %v1362_v34, %v1349_v51 }
0x163a   : > { %v1378_v62 = vadd.f32 %v1375_v24, %v1365_v60  ;;  %v1424_v60 = vperm.slane %v4934_v35, 6  ;;  %v5812_v24 = vld [vmem:[#allocation24_spill] sm:$0xff] }
0x163e   : > { %v2210_v55 = vpop.permute.xlu1 %2209 }
0x163f   : > { %v2214_v20 = vmul.f32 %v2212_v45, %v2210_v55  ;;  %v2215_v59 = vmul.f32 %v2213_v52, %v2210_v55  ;;  %v1385_v45 = vperm.slane %v4934_v35, 3  ;;  %v1384_v55 = vperm.slane %v4940_v33, 3 }
0x1641   : > { %2220 = vrot.lane.b32.xlu0 %v2215_v59, %s3473_s27  ;;  %2218 = vrot.lane.b32.xlu2 %v2214_v20, %s3473_s27  ;;  %v1388_v61 = vmul.f32 %v1385_v45, %v4441_v22  ;;  %v1374_v20 = vmul.f32 %v1371_v41, %v5810_v43  ;;  %v1387_v59 = vmul.f32 %v1384_v55, %v4441_v22  ;;  %v1411_v22 = vperm.slane %v4934_v35, 5 }
0x1642   : > { %v1427_v43 = vmul.f32 %v1424_v60, %v4443_v30 }
0x1643   : > { %v1377_v6 = vadd.f32 %v1374_v20, %v1364_v57  ;;  %v1391_v51 = vadd.f32 %v1388_v61, %v1378_v62  ;;  %v4986_v61 = vmul.f32 %v4936_v25, %v5812_v24  ;;  %v4988_v20 = vld [vmem:[#allocation2 + $0x18] sm:$0xff]  ;;  %v1413_v62 = vmul.f32 %v1410_v18, %v4485_v32  ;;  %v5814_v18 = vld [vmem:[#allocation37_spill] sm:$0xff] }
0x1644   : > { %v5816_v24 = vld [vmem:[#allocation33_spill] sm:$0xff] }
0x1645   : > { %v1390_v34 = vadd.f32 %v1387_v59, %v1377_v6  ;;  %v1404_v45 = vadd.f32 %v1401_v49, %v1391_v51  ;;  %v5813_v59 = vld [vmem:[#allocation28_spill] sm:$0xff]  ;;  %v2281_v49 = vperm.slane %v4986_v61, 0 }
0x1646   : > { %v4992_v15 = vmul.f32 %v4988_v20, %v5813_v59 }
0x1647   : > { %v2231_v16 = vpop.permute.xlu1 %2230 }
0x1648   : > { %v2235_v52 = vmul.f32 %v2233_v37, %v2231_v16  ;;  %v2236_v23 = vmul.f32 %v2234_v26, %v2231_v16  ;;  %v1400_v26 = vmul.f32 %v1397_v14, %v4469_v58  ;;  %v1414_v58 = vmul.f32 %v1411_v22, %v4485_v32 }
0x1649   : > { %v1426_v14 = vmul.f32 %v1423_v28, %v4443_v30 }
0x164a   : > { %2241 = vrot.lane.b32.xlu0 %v2236_v23, %s3473_s27  ;;  %2239 = vrot.lane.b32.xlu2 %v2235_v52, %s3473_s27  ;;  %v4972_v52 = vld [vmem:[#allocation2 + $0x8] sm:$0xff]  ;;  %v5811_v23 = vld [vmem:[#allocation27_spill] sm:$0xff]  ;;  %v1403_v57 = vadd.f32 %v1400_v26, %v1390_v34  ;;  %v1417_v6 = vadd.f32 %v1414_v58, %v1404_v45  ;;  %v1436_v26 = vperm.slane %v4940_v33, 7 }
0x164b   : > { %v4976_v55 = vmul.f32 %v4972_v52, %v5811_v23 }
0x164c   : > { %v1416_v51 = vadd.f32 %v1413_v62, %v1403_v57  ;;  %v1439_v45 = vmul.f32 %v1436_v26, %v4471_v40  ;;  %v5815_v57 = vld [vmem:[#allocation21_spill] sm:$0xff] }
0x164d   : > { %v2283_v34 = vperm.slane %v4976_v55, 0  ;;  %v1494_v58 = vsel %vm378_vm2, %v4713_v44, %v5815_v57 }
0x1650   : > { %v2252_v37 = vpop.permute.xlu1 %2251 }
0x1651   : > { %v2256_v41 = vmul.f32 %v2254_v46, %v2252_v37  ;;  %v2257_v16 = vmul.f32 %v2255_v3, %v2252_v37  ;;  %v1437_v46 = vperm.slane %v4934_v35, 7  ;;  %v1430_v3 = vadd.f32 %v1427_v43, %v1417_v6 }
0x1652   : > { %v2282_v37 = vperm.slane %v4992_v15, 0  ;;  %v1467_v35 = vsel %vm378_vm2, %v4487_v7, %v5814_v18  ;;  %v1521_v7 = vsel %vm378_vm2, %v4501_v4, %v5816_v24 }
0x1653   : > { %2262 = vrot.lane.b32.xlu0 %v2257_v16, %s3473_s27  ;;  %2260 = vrot.lane.b32.xlu2 %v2256_v41, %s3473_s27  ;;  %v1429_v41 = vadd.f32 %v1426_v14, %v1416_v51  ;;  %v1440_v22 = vmul.f32 %v1437_v46, %v4471_v40  ;;  %v5817_v14 = vld [vmem:[#allocation20_spill] sm:$0xff]  ;;  %v5818_v46 = vld [vmem:[#allocation43_spill] sm:$0xff] }
0x1654   : > { %v1548_v6 = vsel %vm378_vm2, %v4719_v13, %v5817_v14  ;;  %v1575_v44 = vsel %vm378_vm2, %v4523_v8, %v5818_v46 }
0x1655   : > { %v1443_v23 = vadd.f32 %v1440_v22, %v1430_v3  ;;  %v1442_v28 = vadd.f32 %v1439_v45, %v1429_v41  ;;  %v2092_v41 = vpop.permute.xlu2 %2091  ;;  %v5820_v22 = vld [vmem:[#allocation31_spill] sm:$0xff] }
0x1656   : > { %v1629_v8 = vsel %vm378_vm2, %v4545_v42, %v5820_v22 }
0x1657   : > { %v1473_v33 = vadd.f32 %v5814_v18, %v1443_v23  ;;  %v1472_v43 = vadd.f32 %v1467_v35, %v1442_v28  ;;  %v5822_v35 = vld [vmem:[#allocation46_spill] sm:$0xff] }
0x1659   : > { %v2279_v16 = vpop.permute.xlu1 %2278  ;;  %v1500_v40 = vadd.f32 %v5815_v57, %v1473_v33  ;;  %v1499_v59 = vadd.f32 %v1494_v58, %v1472_v43  ;;  %v5823_v57 = vld [vmem:[#allocation26_spill] sm:$0xff] }
0x165a   : > { %v2284_v32 = vmul.f32 %v2281_v49, %v2279_v16  ;;  %v2285_v60 = vmul.f32 %v2282_v37, %v2279_v16  ;;  %v2286_v30 = vmul.f32 %v2283_v34, %v2279_v16  ;;  %v5028_v49 = vld [vmem:[%s5471_s3] sm:$0xff]  ;;  %v5819_v37 = vld [vmem:[#allocation23_spill] sm:$0xff]  ;;  %v1713_v42 = vsel %vm503_vm8, %v4747_v56, %v5823_v57 }
0x165b   : > { %v1527_v62 = vadd.f32 %v5816_v24, %v1500_v40  ;;  %v1526_v51 = vadd.f32 %v1521_v7, %v1499_v59  ;;  %v1602_v13 = vsel %vm378_vm2, %v4732_v29, %v5819_v37  ;;  %v1686_v29 = vsel %vm503_vm8, %v4579_v31, %v5822_v35  ;;  %v5824_v24 = vld [vmem:[#allocation36_spill] sm:$0xff] }
0x165c   : > { %2294 = vrot.lane.b32.xlu1 %v2286_v30, %s3500_s15  ;;  %2292 = vrot.lane.b32.xlu0 %v2285_v60, %s3500_s15  ;;  %v5821_v30 = vld [vmem:[#allocation22_spill] sm:$0xff] }
0x165d   : > { %2290 = vrot.lane.b32.xlu2 %v2284_v32, %s3500_s15  ;;  %v1554_v34 = vadd.f32 %v5817_v14, %v1527_v62  ;;  %v1553_v3 = vadd.f32 %v1548_v6, %v1526_v51  ;;  %v1656_v45 = vsel %vm378_vm2, %v4741_v0, %v5821_v30  ;;  %v2116_v43 = vpop.permute.xlu2 %2115  ;;  %v1740_v0 = vsel %vm503_vm8, %v4601_v19, %v5824_v24  ;;  %v5825_v62 = vld [vmem:[#allocation25_spill] sm:$0xff] }
0x165e   : > { %v1767_v31 = vsel %vm503_vm8, %v4755_v1, %v5825_v62  ;;  %v5826_v51 = vld [vmem:[#allocation45_spill] sm:$0xff] }
0x165f   : > { %v1581_v4 = vadd.f32 %v5818_v46, %v1554_v34  ;;  %v1580_v26 = vadd.f32 %v1575_v44, %v1553_v3  ;;  %v1794_v56 = vsel %vm503_vm8, %v4623_v10, %v5826_v51  ;;  %v5827_v44 = vld [vmem:[#allocation29_spill] sm:$0xff] }
0x1660   : > { %v1821_v19 = vsel %vm503_vm8, %v4770_v9, %v5827_v44 }
0x1661   : > { %v1608_v16 = vadd.f32 %v5819_v37, %v1581_v4  ;;  %v1607_v32 = vadd.f32 %v1602_v13, %v1580_v26  ;;  %v5828_v13 = vld [vmem:[#allocation39_spill] sm:$0xff] }
0x1662   : > { %v1848_v1 = vsel %vm503_vm8, %v4645_v17, %v5828_v13 }
0x1663   : > { %v1635_v60 = vadd.f32 %v5820_v22, %v1608_v16  ;;  %v1634_v23 = vadd.f32 %v1629_v8, %v1607_v32  ;;  %v5829_v22 = vld [vmem:[#allocation35_spill] sm:$0xff] }
0x1664   : > { %v1875_v10 = vsel %vm503_vm8, %v4775_v27, %v5829_v22  ;;  %v1959_v27 = vsel %vm351_vm1, %v4701_v36, %v4806_v50  ;;  %v2040_v36 = vsel %vm351_vm1, %v4856_v53, %v4867_v47 }
0x1665   : > { %2305 = vperm.xlu2 %3416, %v5028_v49   ;;  %v1662_v18 = vadd.f32 %v5821_v30, %v1635_v60  ;;  %v1661_v28 = vadd.f32 %v1656_v45, %v1634_v23  ;;  %v5830_v60 = vld [vmem:[#allocation50_spill] sm:$0xff] }
0x1666   : > { %v1905_v9 = vsel %vm351_vm1, %v4679_v12, %v5830_v60  ;;  %v5831_v23 = vld [vmem:[#allocation38_spill] sm:$0xff] }
0x1667   : > { %v1692_v33 = vadd.f32 %v5822_v35, %v1662_v18  ;;  %v1691_v58 = vadd.f32 %v1686_v29, %v1661_v28  ;;  %v1932_v17 = vsel %vm351_vm1, %v4786_v2, %v5831_v23  ;;  %v2013_v2 = vsel %vm351_vm1, %v4757_v39, %v4847_v63 }
0x1668   : > { %v2094_v39 = vsel %vm351_vm1, %v4882_v54, %v2092_v41 }
0x1669   : > { %v1719_v40 = vadd.f32 %v5823_v57, %v1692_v33  ;;  %v1718_v7 = vadd.f32 %v1713_v42, %v1691_v58  ;;  %v5832_v57 = vld [vmem:[#allocation49_spill] sm:$0xff] }
0x166a   : > { %v1986_v12 = vsel %vm351_vm1, %v4820_v48, %v5832_v57  ;;  %v2067_v48 = vsel %vm351_vm1, %v4869_v5, %v4878_v38 }
0x166b   : > { %v1746_v59 = vadd.f32 %v5824_v24, %v1719_v40  ;;  %v1745_v14 = vadd.f32 %v1740_v0, %v1718_v7 }
0x166d   : > { %v1773_v6 = vadd.f32 %v5825_v62, %v1746_v59  ;;  %v1772_v34 = vadd.f32 %v1767_v31, %v1745_v14  ;;  %v2117_v14 = vsel %vm282_vm7, %v4912_v21, %v2116_v43 }
0x166f   : > { %v1800_v46 = vadd.f32 %v5826_v51, %v1773_v6  ;;  %v1799_v3 = vadd.f32 %v1794_v56, %v1772_v34 }
0x1671   : > { %v1827_v37 = vadd.f32 %v5827_v44, %v1800_v46  ;;  %v1826_v26 = vadd.f32 %v1821_v19, %v1799_v3 }
0x1673   : > { %v1854_v16 = vadd.f32 %v5828_v13, %v1827_v37  ;;  %v1853_v8 = vadd.f32 %v1848_v1, %v1826_v26 }
0x1675   : > { %v1881_v32 = vadd.f32 %v5829_v22, %v1854_v16  ;;  %v1880_v30 = vadd.f32 %v1875_v10, %v1853_v8 }
0x1677   : > { %v2135_v4 = vpop.permute.xlu2 %2134  ;;  %v1911_v45 = vadd.f32 %v5830_v60, %v1881_v32  ;;  %v1910_v18 = vadd.f32 %v1905_v9, %v1880_v30  ;;  %v3527_v32 = vmov 42  }
0x1678   : > { %3417 = vset.pattern.permute.xlu0 %v3527_v32 }
0x1679   : > { %v1938_v35 = vadd.f32 %v5831_v23, %v1911_v45  ;;  %v1937_v28 = vadd.f32 %v1932_v17, %v1910_v18 }
0x167b   : > { %v1965_v33 = vadd.f32 %v4806_v50, %v1938_v35  ;;  %v1964_v42 = vadd.f32 %v1959_v27, %v1937_v28 }
0x167d   : > { %v1992_v58 = vadd.f32 %v5832_v57, %v1965_v33  ;;  %v1991_v40 = vadd.f32 %v1986_v12, %v1964_v42 }
0x167f   : > { %v2019_v24 = vadd.f32 %v4847_v63, %v1992_v58  ;;  %v2018_v0 = vadd.f32 %v2013_v2, %v1991_v40  ;;  %v2308_v58 = vperm.slane %v4986_v61, 1  ;;  %v2309_v2 = vperm.slane %v4992_v15, 1 }
0x1680   : > { %v2156_v29 = vpop.permute.xlu2 %2155  ;;  %v2310_v40 = vperm.slane %v4976_v55, 1 }
0x1681   : > { %v2046_v50 = vadd.f32 %v4867_v47, %v2019_v24  ;;  %v2045_v7 = vadd.f32 %v2040_v36, %v2018_v0 }
0x1683   : > { %v2073_v62 = vadd.f32 %v4878_v38, %v2046_v50  ;;  %v2072_v31 = vadd.f32 %v2067_v48, %v2045_v7 }
0x1685   : > { %v2100_v63 = vadd.f32 %v2092_v41, %v2073_v62  ;;  %v2099_v53 = vadd.f32 %v2094_v39, %v2072_v31  ;;  %v2121_v41 = vadd.f32 %v4912_v21, %v4886_v11 }
0x1687   : > { %v2123_v6 = vadd.f32 %v2116_v43, %v2100_v63  ;;  %v2122_v51 = vadd.f32 %v2117_v14, %v2099_v53  ;;  %v2142_v13 = vadd.f32 %v2135_v4, %v2121_v41  ;;  %v3528_v14 = vmov 43  }
0x1688   : > { %3418 = vset.pattern.permute.xlu2 %v3528_v14  ;;  %v3529_v41 = vmov 44  }
0x1689   : > { %v2177_v59 = vpop.permute.xlu2 %2176  ;;  %v2163_v16 = vadd.f32 %v2156_v29, %v2142_v13 }
0x168b   : > { %v2184_v10 = vadd.f32 %v2177_v59, %v2163_v16 }
0x168f   : > { %v2137_v47 = vpop.permute.xlu0 %2136 }
0x1690   : > { %v2138_v56 = vsel %vm282_vm7, %v2135_v4, %v2137_v47  ;;  %v2144_v34 = vadd.f32 %v2137_v47, %v2123_v6 }
0x1691   : > { %v2143_v5 = vadd.f32 %v2138_v56, %v2122_v51 }
0x1692   : > { %v2198_v46 = vpop.permute.xlu2 %2197 }
0x1693   : > { %v2205_v8 = vadd.f32 %v2198_v46, %v2184_v10 }
0x1698   : > { %v2158_v44 = vpop.permute.xlu0 %2157 }
0x1699   : > { %v2159_v38 = vsel %vm282_vm7, %v2156_v29, %v2158_v44  ;;  %v2165_v19 = vadd.f32 %v2158_v44, %v2144_v34 }
0x169a   : > { %v2164_v3 = vadd.f32 %v2159_v38, %v2143_v5  ;;  %v2335_v5 = vperm.slane %v4986_v61, 2 }
0x169b   : > { %v2219_v54 = vpop.permute.xlu2 %2218 }
0x169c   : > { %v2226_v60 = vadd.f32 %v2219_v54, %v2205_v8 }
0x16a1   : > { %v2179_v37 = vpop.permute.xlu0 %2178 }
0x16a2   : > { %v2180_v43 = vsel %vm282_vm7, %v2177_v59, %v2179_v37  ;;  %v2186_v1 = vadd.f32 %v2179_v37, %v2165_v19 }
0x16a3   : > { %v2185_v26 = vadd.f32 %v2180_v43, %v2164_v3  ;;  %v2337_v3 = vperm.slane %v4976_v55, 2  ;;  %v2362_v43 = vperm.slane %v4986_v61, 3 }
0x16a4   : > { %v2240_v22 = vpop.permute.xlu2 %2239 }
0x16a5   : > { %v2247_v23 = vadd.f32 %v2240_v22, %v2226_v60 }
0x16aa   : > { %v2200_v9 = vpop.permute.xlu0 %2199 }
0x16ab   : > { %v2201_v30 = vsel %vm282_vm7, %v2198_v46, %v2200_v9  ;;  %v2207_v45 = vadd.f32 %v2200_v9, %v2186_v1  ;;  %v2336_v46 = vperm.slane %v4992_v15, 2  ;;  %v2363_v1 = vperm.slane %v4992_v15, 3 }
0x16ac   : > { %v2206_v17 = vadd.f32 %v2201_v30, %v2185_v26  ;;  %v2364_v26 = vperm.slane %v4976_v55, 3 }
0x16ad   : > { %v2261_v11 = vpop.permute.xlu2 %2260 }
0x16ae   : > { %v2268_v21 = vadd.f32 %v2261_v11, %v2247_v23 }
0x16b3   : > { %v2221_v4 = vpop.permute.xlu0 %2220 }
0x16b4   : > { %v2222_v18 = vsel %vm282_vm7, %v2219_v54, %v2221_v4  ;;  %v2228_v35 = vadd.f32 %v2221_v4, %v2207_v45 }
0x16b5   : > { %v2227_v27 = vadd.f32 %v2222_v18, %v2206_v17 }
0x16b7   : > { %v2291_v29 = vpop.permute.xlu2 %2290 }
0x16b8   : > { %v2301_v28 = vadd.f32 %v2291_v29, %v2268_v21 }
0x16bc   : > { %v2242_v33 = vpop.permute.xlu0 %2241 }
0x16bd   : > { %v2243_v57 = vsel %vm282_vm7, %v2240_v22, %v2242_v33  ;;  %v2249_v12 = vadd.f32 %v2242_v33, %v2228_v35  ;;  %v3530_v35 = vmov 45  }
0x16be   : > { %v2248_v42 = vadd.f32 %v2243_v57, %v2227_v27 }
0x16bf   : > { %v2306_v24 = vpop.permute.xlu2 %2305 }
0x16c0   : > { %v2311_v36 = vmul.f32 %v2308_v58, %v2306_v24  ;;  %v2312_v0 = vmul.f32 %v2309_v2, %v2306_v24  ;;  %v2313_v50 = vmul.f32 %v2310_v40, %v2306_v24  ;;  %v2391_v24 = vperm.slane %v4976_v55, 4 }
0x16c2   : > { %2321 = vrot.lane.b32.xlu2 %v2313_v50, %s3500_s15  ;;  %2319 = vrot.lane.b32.xlu1 %v2312_v0, %s3500_s15  ;;  %v3531_v0 = vmov 46  }
0x16c3   : > { %2317 = vrot.lane.b32.xlu0 %v2311_v36, %s3500_s15 }
0x16c5   : > { %v2263_v48 = vpop.permute.xlu0 %2262 }
0x16c6   : > { %v2264_v7 = vsel %vm282_vm7, %v2261_v11, %v2263_v48  ;;  %v2270_v59 = vadd.f32 %v2263_v48, %v2249_v12  ;;  %v2389_v12 = vperm.slane %v4986_v61, 4 }
0x16c7   : > { %v2269_v62 = vadd.f32 %v2264_v7, %v2248_v42  ;;  %v2390_v42 = vperm.slane %v4992_v15, 4  ;;  %v2416_v7 = vperm.slane %v4986_v61, 5 }
0x16cb   : > { %2332 = vperm.xlu0 %3417, %v5028_v49  }
0x16ce   : > { %v2293_v39 = vpop.permute.xlu0 %2292  ;;  %v2295_v53 = vpop.permute.xlu1 %2294 }
0x16cf   : > { %v2296_v31 = vsel %vm842_vm9, %v2291_v29, %v2293_v39  ;;  %v2297_v45 = vsel %vm842_vm9, %v2293_v39, %v2295_v53 }
0x16d0   : > { %v2302_v63 = vadd.f32 %v2296_v31, %v2269_v62  ;;  %v2303_v17 = vadd.f32 %v2297_v45, %v2270_v59  ;;  %v2417_v59 = vperm.slane %v4992_v15, 5  ;;  %v2418_v62 = vperm.slane %v4976_v55, 5 }
0x16d1   : > { %v2472_v45 = vperm.slane %v4976_v55, 7 }
0x16d3   : > { %3419 = vset.pattern.permute.xlu0 %v3529_v41 }
0x171c   : > { %v2322_v37 = vpop.permute.xlu2 %2321 }
0x1734   : > { %v2320_v6 = vpop.permute.xlu1 %2319 }
0x1735   : > { %v2318_v51 = vpop.permute.xlu0 %2317  ;;  %v2324_v23 = vsel %vm842_vm9, %v2320_v6, %v2322_v37 }
0x1736   : > { %v2323_v47 = vsel %vm842_vm9, %v2318_v51, %v2320_v6  ;;  %v2328_v56 = vadd.f32 %v2318_v51, %v2301_v28  ;;  %v2330_v11 = vadd.f32 %v2324_v23, %v2303_v17 }
0x1737   : > { %v2329_v34 = vadd.f32 %v2323_v47, %v2302_v63 }
0x173d   : > { %v2333_v44 = vpop.permute.xlu0 %2332 }
0x173e   : > { %v2338_v38 = vmul.f32 %v2335_v5, %v2333_v44  ;;  %v2339_v19 = vmul.f32 %v2336_v46, %v2333_v44  ;;  %v2340_v54 = vmul.f32 %v2337_v3, %v2333_v44 }
0x1740   : > { %2346 = vrot.lane.b32.xlu2 %v2339_v19, %s3500_s15  ;;  %2344 = vrot.lane.b32.xlu1 %v2338_v38, %s3500_s15  ;;  %v3532_v38 = vmov 47  }
0x1748   : > { %2359 = vperm.xlu2 %3418, %v5028_v49   ;;  %2348 = vrot.lane.b32.xlu1 %v2340_v54, %s3500_s15 }
0x1750   : > { %3420 = vset.pattern.permute.xlu2 %v3530_v35 }
0x179a   : > { %v2347_v13 = vpop.permute.xlu2 %2346 }
0x17a2   : > { %v2360_v16 = vpop.permute.xlu2 %2359 }
0x17a3   : > { %v2365_v22 = vmul.f32 %v2362_v43, %v2360_v16  ;;  %v2366_v10 = vmul.f32 %v2363_v1, %v2360_v16  ;;  %v2367_v8 = vmul.f32 %v2364_v26, %v2360_v16  ;;  %v2444_v43 = vperm.slane %v4992_v15, 6 }
0x17a5   : > { %2375 = vrot.lane.b32.xlu2 %v2367_v8, %s3500_s15  ;;  %2371 = vrot.lane.b32.xlu0 %v2365_v22, %s3500_s15  ;;  %v2445_v22 = vperm.slane %v4976_v55, 6  ;;  %v3533_v8 = vmov 48  }
0x17a6   : > { %2373 = vrot.lane.b32.xlu1 %v2366_v10, %s3500_s15 }
0x17ad   : > { %2386 = vperm.xlu0 %3419, %v5028_v49  }
0x17b2   : > { %v2345_v32 = vpop.permute.xlu1 %2344 }
0x17b3   : > { %v2350_v60 = vsel %vm842_vm9, %v2345_v32, %v2347_v13  ;;  %v2355_v9 = vadd.f32 %v2345_v32, %v2328_v56 }
0x17b4   : > { %v2356_v30 = vadd.f32 %v2350_v60, %v2329_v34 }
0x17b5   : > { %3421 = vset.pattern.permute.xlu0 %v3531_v0 }
0x17ba   : > { %v2349_v21 = vpop.permute.xlu1 %2348 }
0x17bb   : > { %v2351_v4 = vsel %vm842_vm9, %v2347_v13, %v2349_v21  ;;  %v2443_v13 = vperm.slane %v4986_v61, 6 }
0x17bc   : > { %v2357_v18 = vadd.f32 %v2351_v4, %v2330_v11 }
0x17ff   : > { %v2376_v50 = vpop.permute.xlu2 %2375 }
0x1817   : > { %v2372_v27 = vpop.permute.xlu0 %2371 }
0x1818   : > { %v2382_v29 = vadd.f32 %v2372_v27, %v2355_v9  ;;  %v2374_v28 = vpop.permute.xlu1 %2373  ;;  %v2470_v9 = vperm.slane %v4986_v61, 7 }
0x1819   : > { %v2377_v33 = vsel %vm842_vm9, %v2372_v27, %v2374_v28  ;;  %v2378_v56 = vsel %vm842_vm9, %v2374_v28, %v2376_v50 }
0x181a   : > { %v2383_v57 = vadd.f32 %v2377_v33, %v2356_v30  ;;  %v2384_v34 = vadd.f32 %v2378_v56, %v2357_v18  ;;  %v2471_v30 = vperm.slane %v4992_v15, 7  ;;  %v3534_v33 = vmov 49  }
0x181f   : > { %v2387_v58 = vpop.permute.xlu0 %2386 }
0x1820   : > { %v2392_v2 = vmul.f32 %v2389_v12, %v2387_v58  ;;  %v2393_v40 = vmul.f32 %v2390_v42, %v2387_v58  ;;  %v2394_v36 = vmul.f32 %v2391_v24, %v2387_v58 }
0x1822   : > { %2400 = vrot.lane.b32.xlu2 %v2393_v40, %s3500_s15  ;;  %2398 = vrot.lane.b32.xlu1 %v2392_v2, %s3500_s15  ;;  %v5833_v40 = vld [vmem:[#allocation40_spill] sm:$0xff] }
0x1823   : > { %v5183_v24 = vmul.f32 %v4936_v25, %v5833_v40 }
0x1825   : > { %v2500_v50 = vperm.slane %v5183_v24, 0 }
0x182a   : > { %2413 = vperm.xlu2 %3420, %v5028_v49   ;;  %2402 = vrot.lane.b32.xlu1 %v2394_v36, %s3500_s15  ;;  %v5834_v36 = vld [vmem:[#allocation42_spill] sm:$0xff] }
0x182b   : > { %v5187_v0 = vmul.f32 %v4988_v20, %v5834_v36 }
0x1832   : > { %3422 = vset.pattern.permute.xlu2 %v3532_v38 }
0x187c   : > { %v2401_v48 = vpop.permute.xlu2 %2400 }
0x1884   : > { %v2414_v39 = vpop.permute.xlu2 %2413 }
0x1885   : > { %v2419_v31 = vmul.f32 %v2416_v7, %v2414_v39  ;;  %v2420_v63 = vmul.f32 %v2417_v59, %v2414_v39  ;;  %v2421_v14 = vmul.f32 %v2418_v62, %v2414_v39  ;;  %v5835_v39 = vld [vmem:[#allocation41_spill] sm:$0xff] }
0x1887   : > { %2429 = vrot.lane.b32.xlu2 %v2421_v14, %s3500_s15  ;;  %2425 = vrot.lane.b32.xlu0 %v2419_v31, %s3500_s15  ;;  %v5193_v31 = vmul.f32 %v4972_v52, %v5835_v39  ;;  %v3535_v14 = vmov 50  }
0x1888   : > { %2427 = vrot.lane.b32.xlu1 %v2420_v63, %s3500_s15 }
0x1889   : > { %v2502_v25 = vperm.slane %v5193_v31, 0  ;;  %v2529_v56 = vperm.slane %v5193_v31, 1 }
0x188f   : > { %2440 = vperm.xlu0 %3421, %v5028_v49  }
0x1894   : > { %v2399_v53 = vpop.permute.xlu1 %2398 }
0x1895   : > { %v2404_v6 = vsel %vm842_vm9, %v2399_v53, %v2401_v48  ;;  %v2409_v51 = vadd.f32 %v2399_v53, %v2382_v29 }
0x1896   : > { %v2410_v47 = vadd.f32 %v2404_v6, %v2383_v57 }
0x1897   : > { %3423 = vset.pattern.permute.xlu0 %v3533_v8 }
0x189c   : > { %v2403_v5 = vpop.permute.xlu1 %2402 }
0x189d   : > { %v2405_v46 = vsel %vm842_vm9, %v2401_v48, %v2403_v5  ;;  %v2501_v48 = vperm.slane %v5187_v0, 0 }
0x189e   : > { %v2411_v44 = vadd.f32 %v2405_v46, %v2384_v34 }
0x18e1   : > { %v2430_v32 = vpop.permute.xlu2 %2429 }
0x18f9   : > { %v2426_v19 = vpop.permute.xlu0 %2425 }
0x18fa   : > { %v2436_v3 = vadd.f32 %v2426_v19, %v2409_v51  ;;  %v2428_v54 = vpop.permute.xlu1 %2427  ;;  %v2527_v51 = vperm.slane %v5183_v24, 1 }
0x18fb   : > { %v2431_v41 = vsel %vm842_vm9, %v2426_v19, %v2428_v54  ;;  %v2432_v15 = vsel %vm842_vm9, %v2428_v54, %v2430_v32 }
0x18fc   : > { %v2437_v37 = vadd.f32 %v2431_v41, %v2410_v47  ;;  %v2438_v55 = vadd.f32 %v2432_v15, %v2411_v44  ;;  %v2528_v47 = vperm.slane %v5187_v0, 1  ;;  %v2583_v15 = vperm.slane %v5193_v31, 3 }
0x1901   : > { %v2441_v1 = vpop.permute.xlu0 %2440 }
0x1902   : > { %v2446_v26 = vmul.f32 %v2443_v13, %v2441_v1  ;;  %v2447_v16 = vmul.f32 %v2444_v43, %v2441_v1  ;;  %v2448_v10 = vmul.f32 %v2445_v22, %v2441_v1 }
0x1904   : > { %2454 = vrot.lane.b32.xlu2 %v2447_v16, %s3500_s15  ;;  %2452 = vrot.lane.b32.xlu1 %v2446_v26, %s3500_s15  ;;  %v3536_v26 = vmov 51  }
0x190c   : > { %2467 = vperm.xlu2 %3422, %v5028_v49   ;;  %2456 = vrot.lane.b32.xlu1 %v2448_v10, %s3500_s15 }
0x1914   : > { %3424 = vset.pattern.permute.xlu2 %v3534_v33 }
0x195e   : > { %v2455_v60 = vpop.permute.xlu2 %2454 }
0x1966   : > { %v2468_v23 = vpop.permute.xlu2 %2467 }
0x1967   : > { %v2473_v17 = vmul.f32 %v2470_v9, %v2468_v23  ;;  %v2474_v11 = vmul.f32 %v2471_v30, %v2468_v23  ;;  %v2475_v21 = vmul.f32 %v2472_v45, %v2468_v23  ;;  %v2555_v9 = vperm.slane %v5187_v0, 2 }
0x1969   : > { %2483 = vrot.lane.b32.xlu2 %v2475_v21, %s3500_s15  ;;  %2479 = vrot.lane.b32.xlu0 %v2473_v17, %s3500_s15  ;;  %v2556_v17 = vperm.slane %v5193_v31, 2  ;;  %v3537_v21 = vmov 52  }
0x196a   : > { %2481 = vrot.lane.b32.xlu1 %v2474_v11, %s3500_s15 }
0x1971   : > { %2497 = vperm.xlu0 %3423, %v5028_v49  }
0x1976   : > { %v2453_v4 = vpop.permute.xlu1 %2452 }
0x1977   : > { %v2458_v18 = vsel %vm842_vm9, %v2453_v4, %v2455_v60  ;;  %v2463_v61 = vadd.f32 %v2453_v4, %v2436_v3 }
0x1978   : > { %v2464_v35 = vadd.f32 %v2458_v18, %v2437_v37 }
0x1979   : > { %3425 = vset.pattern.permute.xlu0 %v3535_v14  ;;  %v2609_v14 = vperm.slane %v5187_v0, 4 }
0x197e   : > { %v2457_v27 = vpop.permute.xlu1 %2456 }
0x197f   : > { %v2459_v29 = vsel %vm842_vm9, %v2455_v60, %v2457_v27  ;;  %v2554_v60 = vperm.slane %v5183_v24, 2 }
0x1980   : > { %v2465_v28 = vadd.f32 %v2459_v29, %v2438_v55 }
0x19c3   : > { %v2484_v53 = vpop.permute.xlu2 %2483 }
0x19db   : > { %v2480_v57 = vpop.permute.xlu0 %2479 }
0x19dc   : > { %v2490_v12 = vadd.f32 %v2480_v57, %v2463_v61  ;;  %v2482_v42 = vpop.permute.xlu1 %2481  ;;  %v2581_v61 = vperm.slane %v5183_v24, 3 }
0x19dd   : > { %v2485_v58 = vsel %vm842_vm9, %v2480_v57, %v2482_v42  ;;  %v2486_v41 = vsel %vm842_vm9, %v2482_v42, %v2484_v53 }
0x19de   : > { %v2491_v2 = vadd.f32 %v2485_v58, %v2464_v35  ;;  %v2492_v37 = vadd.f32 %v2486_v41, %v2465_v28  ;;  %v2582_v35 = vperm.slane %v5187_v0, 3 }
0x19e3   : > { %v2498_v7 = vpop.permute.xlu0 %2497 }
0x19e4   : > { %v2503_v59 = vmul.f32 %v2500_v50, %v2498_v7  ;;  %v2504_v62 = vmul.f32 %v2501_v48, %v2498_v7  ;;  %v2505_v63 = vmul.f32 %v2502_v25, %v2498_v7  ;;  %v3538_v48 = vmov 53  }
0x19e6   : > { %2511 = vrot.lane.b32.xlu2 %v2504_v62, %s3506_s17  ;;  %2509 = vrot.lane.b32.xlu1 %v2503_v59, %s3506_s17 }
0x19ee   : > { %2524 = vperm.xlu2 %3424, %v5028_v49   ;;  %2513 = vrot.lane.b32.xlu1 %v2505_v63, %s3506_s17  ;;  %v2608_v63 = vperm.slane %v5183_v24, 4 }
0x19f6   : > { %3426 = vset.pattern.permute.xlu2 %v3536_v26 }
0x1a40   : > { %v2512_v6 = vpop.permute.xlu2 %2511 }
0x1a48   : > { %v2525_v34 = vpop.permute.xlu2 %2524 }
0x1a49   : > { %v2530_v5 = vmul.f32 %v2527_v51, %v2525_v34  ;;  %v2531_v46 = vmul.f32 %v2528_v47, %v2525_v34  ;;  %v2532_v44 = vmul.f32 %v2529_v56, %v2525_v34  ;;  %v2610_v47 = vperm.slane %v5193_v31, 4 }
0x1a4a   : > { %v3539_v34 = vmov 54  }
0x1a4b   : > { %2540 = vrot.lane.b32.xlu2 %v2532_v44, %s3506_s17  ;;  %2536 = vrot.lane.b32.xlu0 %v2530_v5, %s3506_s17  ;;  %v2635_v44 = vperm.slane %v5183_v24, 5 }
0x1a4c   : > { %2538 = vrot.lane.b32.xlu1 %v2531_v46, %s3506_s17 }
0x1a53   : > { %2551 = vperm.xlu0 %3425, %v5028_v49  }
0x1a58   : > { %v2510_v38 = vpop.permute.xlu1 %2509 }
0x1a59   : > { %v2515_v19 = vsel %vm967_vm10, %v2510_v38, %v2512_v6  ;;  %v2520_v3 = vadd.f32 %v2510_v38, %v2490_v12  ;;  %v2636_v38 = vperm.slane %v5187_v0, 5 }
0x1a5a   : > { %v2521_v54 = vadd.f32 %v2515_v19, %v2491_v2  ;;  %v2637_v19 = vperm.slane %v5193_v31, 5 }
0x1a5b   : > { %3427 = vset.pattern.permute.xlu0 %v3537_v21  ;;  %v2663_v21 = vperm.slane %v5187_v0, 6 }
0x1a60   : > { %v2514_v13 = vpop.permute.xlu1 %2513 }
0x1a61   : > { %v2516_v43 = vsel %vm967_vm10, %v2512_v6, %v2514_v13 }
0x1a62   : > { %v2522_v1 = vadd.f32 %v2516_v43, %v2492_v37 }
0x1aa5   : > { %v2541_v4 = vpop.permute.xlu2 %2540 }
0x1abd   : > { %v2537_v16 = vpop.permute.xlu0 %2536 }
0x1abe   : > { %v2547_v22 = vadd.f32 %v2537_v16, %v2520_v3  ;;  %v2539_v10 = vpop.permute.xlu1 %2538 }
0x1abf   : > { %v2542_v8 = vsel %vm967_vm10, %v2537_v16, %v2539_v10  ;;  %v2543_v58 = vsel %vm967_vm10, %v2539_v10, %v2541_v4 }
0x1ac0   : > { %v2548_v32 = vadd.f32 %v2542_v8, %v2521_v54  ;;  %v2549_v2 = vadd.f32 %v2543_v58, %v2522_v1 }
0x1ac5   : > { %v2552_v30 = vpop.permute.xlu0 %2551 }
0x1ac6   : > { %v2557_v45 = vmul.f32 %v2554_v60, %v2552_v30  ;;  %v2558_v23 = vmul.f32 %v2555_v9, %v2552_v30  ;;  %v2559_v11 = vmul.f32 %v2556_v17, %v2552_v30  ;;  %v3540_v60 = vmov 55  }
0x1ac8   : > { %2565 = vrot.lane.b32.xlu2 %v2558_v23, %s3506_s17  ;;  %2563 = vrot.lane.b32.xlu1 %v2557_v45, %s3506_s17 }
0x1ad0   : > { %2578 = vperm.xlu2 %3426, %v5028_v49   ;;  %2567 = vrot.lane.b32.xlu1 %v2559_v11, %s3506_s17  ;;  %v2662_v11 = vperm.slane %v5183_v24, 6 }
0x1ad8   : > { %3428 = vset.pattern.permute.xlu2 %v3538_v48 }
0x1b22   : > { %v2566_v18 = vpop.permute.xlu2 %2565 }
0x1b2a   : > { %v2579_v55 = vpop.permute.xlu2 %2578 }
0x1b2b   : > { %v2584_v27 = vmul.f32 %v2581_v61, %v2579_v55  ;;  %v2585_v29 = vmul.f32 %v2582_v35, %v2579_v55  ;;  %v2586_v28 = vmul.f32 %v2583_v15, %v2579_v55  ;;  %v2664_v35 = vperm.slane %v5193_v31, 6 }
0x1b2c   : > { %v3541_v55 = vmov 56  }
0x1b2d   : > { %2594 = vrot.lane.b32.xlu2 %v2586_v28, %s3506_s17  ;;  %2590 = vrot.lane.b32.xlu0 %v2584_v27, %s3506_s17  ;;  %v2689_v28 = vperm.slane %v5183_v24, 7 }
0x1b2e   : > { %2592 = vrot.lane.b32.xlu1 %v2585_v29, %s3506_s17 }
0x1b35   : > { %2605 = vperm.xlu0 %3427, %v5028_v49  }
0x1b3a   : > { %v2564_v33 = vpop.permute.xlu1 %2563 }
0x1b3b   : > { %v2569_v57 = vsel %vm967_vm10, %v2564_v33, %v2566_v18  ;;  %v2574_v12 = vadd.f32 %v2564_v33, %v2547_v22  ;;  %v2690_v33 = vperm.slane %v5187_v0, 7 }
0x1b3c   : > { %v2575_v42 = vadd.f32 %v2569_v57, %v2548_v32  ;;  %v2691_v57 = vperm.slane %v5193_v31, 7 }
0x1b3d   : > { %3429 = vset.pattern.permute.xlu0 %v3539_v34 }
0x1b42   : > { %v2568_v40 = vpop.permute.xlu1 %2567 }
0x1b43   : > { %v2570_v36 = vsel %vm967_vm10, %v2566_v18, %v2568_v40 }
0x1b44   : > { %v2576_v50 = vadd.f32 %v2570_v36, %v2549_v2 }
0x1b87   : > { %v2595_v5 = vpop.permute.xlu2 %2594 }
0x1b9f   : > { %v2591_v7 = vpop.permute.xlu0 %2590 }
0x1ba0   : > { %v2601_v59 = vadd.f32 %v2591_v7, %v2574_v12  ;;  %v2593_v62 = vpop.permute.xlu1 %2592 }
0x1ba1   : > { %v2596_v39 = vsel %vm967_vm10, %v2591_v7, %v2593_v62  ;;  %v2597_v16 = vsel %vm967_vm10, %v2593_v62, %v2595_v5  ;;  %v3542_v62 = vmov 57  }
0x1ba2   : > { %v2602_v25 = vadd.f32 %v2596_v39, %v2575_v42  ;;  %v2603_v22 = vadd.f32 %v2597_v16, %v2576_v50 }
0x1ba7   : > { %v2606_v53 = vpop.permute.xlu0 %2605 }
0x1ba8   : > { %v2611_v6 = vmul.f32 %v2608_v63, %v2606_v53  ;;  %v2612_v51 = vmul.f32 %v2609_v14, %v2606_v53  ;;  %v2613_v56 = vmul.f32 %v2610_v47, %v2606_v53 }
0x1baa   : > { %2619 = vrot.lane.b32.xlu2 %v2612_v51, %s3506_s17  ;;  %2617 = vrot.lane.b32.xlu1 %v2611_v6, %s3506_s17  ;;  %v5265_v6 = vld [vmem:[#allocation2 + $0x10] sm:$0xff]  ;;  %v5836_v51 = vld [vmem:[#allocation52_spill] sm:$0xff] }
0x1bab   : > { %v5269_v47 = vmul.f32 %v5265_v6, %v5836_v51 }
0x1bad   : > { %v2719_v5 = vperm.slane %v5269_v47, 0 }
0x1bb2   : > { %2632 = vperm.xlu2 %3428, %v5028_v49   ;;  %2621 = vrot.lane.b32.xlu1 %v2613_v56, %s3506_s17  ;;  %v5837_v56 = vld [vmem:[#allocation54_spill] sm:$0xff] }
0x1bb3   : > { %v5273_v34 = vmul.f32 %v4988_v20, %v5837_v56  ;;  %v3543_v20 = vmov 58  }
0x1bba   : > { %3430 = vset.pattern.permute.xlu2 %v3540_v60 }
0x1c04   : > { %v2620_v46 = vpop.permute.xlu2 %2619 }
0x1c0c   : > { %v2633_v3 = vpop.permute.xlu2 %2632 }
0x1c0d   : > { %v2638_v54 = vmul.f32 %v2635_v44, %v2633_v3  ;;  %v2639_v41 = vmul.f32 %v2636_v38, %v2633_v3  ;;  %v2640_v37 = vmul.f32 %v2637_v19, %v2633_v3  ;;  %v5838_v3 = vld [vmem:[#allocation53_spill] sm:$0xff] }
0x1c0f   : > { %2648 = vrot.lane.b32.xlu2 %v2640_v37, %s3506_s17  ;;  %2644 = vrot.lane.b32.xlu0 %v2638_v54, %s3506_s17  ;;  %v5279_v54 = vmul.f32 %v4972_v52, %v5838_v3  ;;  %v2747_v52 = vperm.slane %v5273_v34, 1  ;;  %v2827_v3 = vperm.slane %v5269_v47, 4 }
0x1c10   : > { %2646 = vrot.lane.b32.xlu1 %v2639_v41, %s3506_s17 }
0x1c11   : > { %v2721_v41 = vperm.slane %v5279_v54, 0 }
0x1c17   : > { %2659 = vperm.xlu0 %3429, %v5028_v49  }
0x1c1c   : > { %v2618_v13 = vpop.permute.xlu1 %2617 }
0x1c1d   : > { %v2623_v43 = vsel %vm967_vm10, %v2618_v13, %v2620_v46  ;;  %v2628_v1 = vadd.f32 %v2618_v13, %v2601_v59 }
0x1c1e   : > { %v2629_v26 = vadd.f32 %v2623_v43, %v2602_v25 }
0x1c1f   : > { %3431 = vset.pattern.permute.xlu0 %v3541_v55 }
0x1c24   : > { %v2622_v10 = vpop.permute.xlu1 %2621 }
0x1c25   : > { %v2624_v8 = vsel %vm967_vm10, %v2620_v46, %v2622_v10  ;;  %v2720_v46 = vperm.slane %v5273_v34, 0 }
0x1c26   : > { %v2630_v32 = vadd.f32 %v2624_v8, %v2603_v22 }
0x1c69   : > { %v2649_v27 = vpop.permute.xlu2 %2648 }
0x1c81   : > { %v2645_v9 = vpop.permute.xlu0 %2644 }
0x1c82   : > { %v2655_v30 = vadd.f32 %v2645_v9, %v2628_v1  ;;  %v2647_v45 = vpop.permute.xlu1 %2646  ;;  %v2746_v1 = vperm.slane %v5269_v47, 1 }
0x1c83   : > { %v2650_v23 = vsel %vm967_vm10, %v2645_v9, %v2647_v45  ;;  %v2651_v0 = vsel %vm967_vm10, %v2647_v45, %v2649_v27  ;;  %v2773_v27 = vperm.slane %v5269_v47, 2 }
0x1c84   : > { %v2656_v17 = vadd.f32 %v2650_v23, %v2629_v26  ;;  %v2657_v31 = vadd.f32 %v2651_v0, %v2630_v32  ;;  %v2748_v26 = vperm.slane %v5279_v54, 1 }
0x1c89   : > { %v2660_v4 = vpop.permute.xlu0 %2659 }
0x1c8a   : > { %v2665_v18 = vmul.f32 %v2662_v11, %v2660_v4  ;;  %v2666_v61 = vmul.f32 %v2663_v21, %v2660_v4  ;;  %v2667_v15 = vmul.f32 %v2664_v35, %v2660_v4  ;;  %v3544_v4 = vmov 59  }
0x1c8c   : > { %2673 = vrot.lane.b32.xlu2 %v2666_v61, %s3506_s17  ;;  %2671 = vrot.lane.b32.xlu1 %v2665_v18, %s3506_s17 }
0x1c94   : > { %2686 = vperm.xlu2 %3430, %v5028_v49   ;;  %2675 = vrot.lane.b32.xlu1 %v2667_v15, %s3506_s17 }
0x1c9c   : > { %3432 = vset.pattern.permute.xlu2 %v3542_v62 }
0x1ce6   : > { %v2674_v29 = vpop.permute.xlu2 %2673 }
0x1cee   : > { %v2687_v12 = vpop.permute.xlu2 %2686 }
0x1cef   : > { %v2692_v42 = vmul.f32 %v2689_v28, %v2687_v12  ;;  %v2693_v58 = vmul.f32 %v2690_v33, %v2687_v12  ;;  %v2694_v2 = vmul.f32 %v2691_v57, %v2687_v12  ;;  %v2775_v12 = vperm.slane %v5279_v54, 2 }
0x1cf1   : > { %2702 = vrot.lane.b32.xlu2 %v2694_v2, %s3506_s17  ;;  %2698 = vrot.lane.b32.xlu0 %v2692_v42, %s3506_s17 }
0x1cf2   : > { %2700 = vrot.lane.b32.xlu1 %v2693_v58, %s3506_s17  ;;  %v3545_v58 = vmov 60  }
0x1cf9   : > { %2716 = vperm.xlu0 %3431, %v5028_v49  }
0x1cfe   : > { %v2672_v40 = vpop.permute.xlu1 %2671 }
0x1cff   : > { %v2677_v36 = vsel %vm967_vm10, %v2672_v40, %v2674_v29  ;;  %v2682_v24 = vadd.f32 %v2672_v40, %v2655_v30 }
0x1d00   : > { %v2683_v50 = vadd.f32 %v2677_v36, %v2656_v17  ;;  %v2800_v36 = vperm.slane %v5269_v47, 3 }
0x1d01   : > { %3433 = vset.pattern.permute.xlu0 %v3543_v20 }
0x1d06   : > { %v2676_v48 = vpop.permute.xlu1 %2675 }
0x1d07   : > { %v2678_v7 = vsel %vm967_vm10, %v2674_v29, %v2676_v48  ;;  %v2774_v29 = vperm.slane %v5273_v34, 2 }
0x1d08   : > { %v2684_v59 = vadd.f32 %v2678_v7, %v2657_v31 }
0x1d4b   : > { %v2703_v13 = vpop.permute.xlu2 %2702 }
0x1d63   : > { %v2699_v39 = vpop.permute.xlu0 %2698 }
0x1d64   : > { %v2709_v25 = vadd.f32 %v2699_v39, %v2682_v24  ;;  %v2701_v63 = vpop.permute.xlu1 %2700  ;;  %v2801_v24 = vperm.slane %v5273_v34, 3 }
0x1d65   : > { %v2704_v14 = vsel %vm967_vm10, %v2699_v39, %v2701_v63  ;;  %v2705_v45 = vsel %vm967_vm10, %v2701_v63, %v2703_v13 }
0x1d66   : > { %v2710_v53 = vadd.f32 %v2704_v14, %v2683_v50  ;;  %v2711_v23 = vadd.f32 %v2705_v45, %v2684_v59  ;;  %v2802_v50 = vperm.slane %v5279_v54, 3 }
0x1d6b   : > { %v2717_v44 = vpop.permute.xlu0 %2716 }
0x1d6c   : > { %v2722_v38 = vmul.f32 %v2719_v5, %v2717_v44  ;;  %v2723_v19 = vmul.f32 %v2720_v46, %v2717_v44  ;;  %v2724_v37 = vmul.f32 %v2721_v41, %v2717_v44  ;;  %v3546_v5 = vmov 61  }
0x1d6d   : > { %v2828_v41 = vperm.slane %v5273_v34, 4 }
0x1d6e   : > { %2730 = vrot.lane.b32.xlu2 %v2723_v19, %s3512_s19  ;;  %2728 = vrot.lane.b32.xlu1 %v2722_v38, %s3512_s19 }
0x1d76   : > { %2743 = vperm.xlu2 %3432, %v5028_v49   ;;  %2732 = vrot.lane.b32.xlu1 %v2724_v37, %s3512_s19 }
0x1d7e   : > { %3434 = vset.pattern.permute.xlu2 %v3544_v4 }
0x1dc8   : > { %v2731_v43 = vpop.permute.xlu2 %2730 }
0x1dd0   : > { %v2744_v16 = vpop.permute.xlu2 %2743 }
0x1dd1   : > { %v2749_v22 = vmul.f32 %v2746_v1, %v2744_v16  ;;  %v2750_v10 = vmul.f32 %v2747_v52, %v2744_v16  ;;  %v2751_v8 = vmul.f32 %v2748_v26, %v2744_v16  ;;  %v5323_v52 = vld [vmem:[%s5471_s3] sm:$0xff]  ;;  %v3547_v26 = vmov 62  }
0x1dd3   : > { %2759 = vrot.lane.b32.xlu2 %v2751_v8, %s3512_s19  ;;  %2755 = vrot.lane.b32.xlu0 %v2749_v22, %s3512_s19  ;;  %v2855_v8 = vperm.slane %v5273_v34, 5 }
0x1dd4   : > { %2757 = vrot.lane.b32.xlu1 %v2750_v10, %s3512_s19  ;;  %v2854_v10 = vperm.slane %v5269_v47, 5 }
0x1ddb   : > { %2770 = vperm.xlu0 %3433, %v5028_v49  }
0x1de0   : > { %v2729_v32 = vpop.permute.xlu1 %2728 }
0x1de1   : > { %v2734_v60 = vsel %vm1092_vm11, %v2729_v32, %v2731_v43  ;;  %v2739_v9 = vadd.f32 %v2729_v32, %v2709_v25  ;;  %v2856_v32 = vperm.slane %v5279_v54, 5 }
0x1de2   : > { %v2740_v30 = vadd.f32 %v2734_v60, %v2710_v53 }
0x1de3   : > { %3435 = vset.pattern.permute.xlu0 %v3545_v58  ;;  %v2882_v58 = vperm.slane %v5273_v34, 6 }
0x1de8   : > { %v2733_v17 = vpop.permute.xlu1 %2732 }
0x1de9   : > { %v2735_v11 = vsel %vm1092_vm11, %v2731_v43, %v2733_v17  ;;  %v2829_v43 = vperm.slane %v5279_v54, 4 }
0x1dea   : > { %v2741_v21 = vadd.f32 %v2735_v11, %v2711_v23 }
0x1e2d   : > { %v2760_v2 = vpop.permute.xlu2 %2759 }
0x1e45   : > { %v2756_v18 = vpop.permute.xlu0 %2755 }
0x1e46   : > { %v2766_v61 = vadd.f32 %v2756_v18, %v2739_v9  ;;  %v2758_v35 = vpop.permute.xlu1 %2757 }
0x1e47   : > { %v2761_v15 = vsel %vm1092_vm11, %v2756_v18, %v2758_v35  ;;  %v2762_v63 = vsel %vm1092_vm11, %v2758_v35, %v2760_v2 }
0x1e48   : > { %v2767_v55 = vadd.f32 %v2761_v15, %v2740_v30  ;;  %v2768_v14 = vadd.f32 %v2762_v63, %v2741_v21 }
0x1e4d   : > { %v2771_v28 = vpop.permute.xlu0 %2770 }
0x1e4e   : > { %v2776_v33 = vmul.f32 %v2773_v27, %v2771_v28  ;;  %v2777_v57 = vmul.f32 %v2774_v29, %v2771_v28  ;;  %v2778_v42 = vmul.f32 %v2775_v12, %v2771_v28  ;;  %v3549_v27 = vmov 64  }
0x1e4f   : > { %3439 = vset.pattern.permute.xlu1 %v3549_v27 }
0x1e50   : > { %2784 = vrot.lane.b32.xlu2 %v2777_v57, %s3512_s19  ;;  %2782 = vrot.lane.b32.xlu1 %v2776_v33, %s3512_s19 }
0x1e58   : > { %2797 = vperm.xlu2 %3434, %v5028_v49   ;;  %2786 = vrot.lane.b32.xlu1 %v2778_v42, %s3512_s19  ;;  %v2881_v42 = vperm.slane %v5269_v47, 6 }
0x1e60   : > { %3436 = vset.pattern.permute.xlu2 %v3546_v5 }
0x1eaa   : > { %v2785_v40 = vpop.permute.xlu2 %2784 }
0x1eb2   : > { %v2798_v0 = vpop.permute.xlu2 %2797 }
0x1eb3   : > { %v2803_v31 = vmul.f32 %v2800_v36, %v2798_v0  ;;  %v2804_v48 = vmul.f32 %v2801_v24, %v2798_v0  ;;  %v2805_v7 = vmul.f32 %v2802_v50, %v2798_v0  ;;  %v2883_v24 = vperm.slane %v5279_v54, 6 }
0x1eb4   : > { %v3550_v0 = vmov 65  }
0x1eb5   : > { %2813 = vrot.lane.b32.xlu2 %v2805_v7, %s3512_s19  ;;  %2809 = vrot.lane.b32.xlu0 %v2803_v31, %s3512_s19  ;;  %v3551_v31 = vmov 67   ;;  %v3553_v7 = vmov 69  }
0x1eb6   : > { %2811 = vrot.lane.b32.xlu1 %v2804_v48, %s3512_s19  ;;  %v3552_v48 = vmov 68  }
0x1ebd   : > { %2824 = vperm.xlu0 %3435, %v5028_v49  }
0x1ec2   : > { %v2783_v59 = vpop.permute.xlu1 %2782 }
0x1ec3   : > { %v2788_v62 = vsel %vm1092_vm11, %v2783_v59, %v2785_v40  ;;  %v2793_v39 = vadd.f32 %v2783_v59, %v2766_v61  ;;  %v3554_v59 = vmov 70  }
0x1ec4   : > { %v2794_v25 = vadd.f32 %v2788_v62, %v2767_v55  ;;  %v3548_v55 = vmov 63   ;;  %v5839_v62 = vmov 0  }
0x1ec5   : > { %3437 = vset.pattern.permute.xlu0 %v3547_v26  ;;  %v5841_v26 = vld [vmem:[#allocation68_spill] sm:$0xff] }
0x1eca   : > { %v2787_v53 = vpop.permute.xlu1 %2786 }
0x1ecb   : > { %v2789_v51 = vsel %vm1092_vm11, %v2785_v40, %v2787_v53  ;;  %v2909_v53 = vperm.slane %v5273_v34, 7  ;;  %v3556_v34 = vmov 71  }
0x1ecc   : > { %v2795_v56 = vadd.f32 %v2789_v51, %v2768_v14  ;;  %v2908_v14 = vperm.slane %v5269_v47, 7  ;;  %v2910_v51 = vperm.slane %v5279_v54, 7 }
0x1f0f   : > { %v2814_v16 = vpop.permute.xlu2 %2813 }
0x1f27   : > { %v2810_v46 = vpop.permute.xlu0 %2809 }
0x1f28   : > { %v2820_v44 = vadd.f32 %v2810_v46, %v2793_v39  ;;  %v2812_v38 = vpop.permute.xlu1 %2811  ;;  %v3555_v39 = vmov 66  }
0x1f29   : > { %v2815_v19 = vsel %vm1092_vm11, %v2810_v46, %v2812_v38  ;;  %v2816_v4 = vsel %vm1092_vm11, %v2812_v38, %v2814_v16  ;;  %v5370_v16 = vmul.f32 %v5265_v6, %v5841_v26 }
0x1f2a   : > { %v2821_v49 = vadd.f32 %v2815_v19, %v2794_v25  ;;  %v2822_v18 = vadd.f32 %v2816_v4, %v2795_v56 }
0x1f2b   : > { %v3127_v26 = vperm.slane %v5370_v16, 7 }
0x1f2f   : > { %v2825_v37 = vpop.permute.xlu0 %2824 }
0x1f30   : > { %v2830_v20 = vmul.f32 %v2827_v3, %v2825_v37  ;;  %v2831_v13 = vmul.f32 %v2828_v41, %v2825_v37  ;;  %v2832_v1 = vmul.f32 %v2829_v43, %v2825_v37  ;;  %v5840_v43 = vld [vmem:[#allocation69_spill] sm:$0xff] }
0x1f32   : > { %2838 = vrot.lane.b32.xlu2 %v2831_v13, %s3512_s19  ;;  %2836 = vrot.lane.b32.xlu1 %v2830_v20, %s3512_s19  ;;  %v3461_v13 = vld [vmem:[#allocation2 + $0x8] sm:$0xff] }
0x1f3a   : > { %2851 = vperm.xlu2 %3436, %v5323_v52   ;;  %2840 = vrot.lane.b32.xlu1 %v2832_v1, %s3512_s19  ;;  %v5366_v1 = vmul.f32 %v3461_v13, %v5840_v43 }
0x1f3c   : > { %v3129_v43 = vperm.slane %v5366_v1, 7 }
0x1f42   : > { %3438 = vset.pattern.permute.xlu2 %v3548_v55 }
0x1f8c   : > { %v2839_v22 = vpop.permute.xlu2 %2838 }
0x1f94   : > { %v2852_v60 = vpop.permute.xlu2 %2851 }
0x1f95   : > { %v2857_v9 = vmul.f32 %v2854_v10, %v2852_v60  ;;  %v2858_v30 = vmul.f32 %v2855_v8, %v2852_v60  ;;  %v2859_v45 = vmul.f32 %v2856_v32, %v2852_v60  ;;  %v5842_v10 = vld [vmem:[#allocation70_spill] sm:$0xff]  ;;  %v2940_v60 = vperm.slane %v5366_v1, 0 }
0x1f97   : > { %2867 = vrot.lane.b32.xlu2 %v2859_v45, %s3512_s19  ;;  %2863 = vrot.lane.b32.xlu0 %v2857_v9, %s3512_s19 }
0x1f98   : > { %2865 = vrot.lane.b32.xlu1 %v2858_v30, %s3512_s19 }
0x1f9f   : > { %2878 = vperm.xlu0 %3437, %v5323_v52  }
0x1fa4   : > { %v2837_v23 = vpop.permute.xlu1 %2836 }
0x1fa5   : > { %v2842_v17 = vsel %vm1092_vm11, %v2837_v23, %v2839_v22  ;;  %v2847_v11 = vadd.f32 %v2837_v23, %v2820_v44 }
0x1fa6   : > { %v2848_v21 = vadd.f32 %v2842_v17, %v2821_v49 }
0x1fa7   : > { %3441 = vset.pattern.permute.xlu0 %v3555_v39  ;;  %v3048_v39 = vperm.slane %v5366_v1, 4 }
0x1fac   : > { %v2841_v61 = vpop.permute.xlu1 %2840 }
0x1fad   : > { %v2843_v35 = vsel %vm1092_vm11, %v2839_v22, %v2841_v61  ;;  %v3462_v22 = vld [vmem:[#allocation2 + $0x18] sm:$0xff] }
0x1fae   : > { %v2849_v15 = vadd.f32 %v2843_v35, %v2822_v18  ;;  %v5373_v8 = vmul.f32 %v3462_v22, %v5842_v10 }
0x1fb0   : > { %v2939_v32 = vperm.slane %v5373_v8, 0  ;;  %v2966_v17 = vperm.slane %v5373_v8, 1  ;;  %v3128_v13 = vperm.slane %v5373_v8, 7 }
0x1ff1   : > { %v2868_v25 = vpop.permute.xlu2 %2867 }
0x2009   : > { %v2864_v29 = vpop.permute.xlu0 %2863 }
0x200a   : > { %v2874_v28 = vadd.f32 %v2864_v29, %v2847_v11  ;;  %v2866_v33 = vpop.permute.xlu1 %2865  ;;  %v2967_v11 = vperm.slane %v5366_v1, 1 }
0x200b   : > { %v2869_v57 = vsel %vm1092_vm11, %v2864_v29, %v2866_v33  ;;  %v2870_v54 = vsel %vm1092_vm11, %v2866_v33, %v2868_v25  ;;  %v3046_v25 = vperm.slane %v5370_v16, 4 }
0x200c   : > { %v2875_v12 = vadd.f32 %v2869_v57, %v2848_v21  ;;  %v2876_v3 = vadd.f32 %v2870_v54, %v2849_v15  ;;  %v2965_v21 = vperm.slane %v5370_v16, 1  ;;  %v2992_v57 = vperm.slane %v5370_v16, 2 }
0x2011   : > { %v2879_v2 = vpop.permute.xlu0 %2878 }
0x2012   : > { %v2884_v40 = vmul.f32 %v2881_v42, %v2879_v2  ;;  %v2885_v36 = vmul.f32 %v2882_v58, %v2879_v2  ;;  %v2886_v50 = vmul.f32 %v2883_v24, %v2879_v2  ;;  %v2994_v42 = vperm.slane %v5366_v1, 2 }
0x2013   : > { %v3020_v24 = vperm.slane %v5373_v8, 3 }
0x2014   : > { %2892 = vrot.lane.b32.xlu2 %v2885_v36, %s3512_s19  ;;  %2890 = vrot.lane.b32.xlu1 %v2884_v40, %s3512_s19 }
0x201c   : > { %2905 = vperm.xlu2 %3438, %v5323_v52   ;;  %2894 = vrot.lane.b32.xlu1 %v2886_v50, %s3512_s19  ;;  %v3021_v50 = vperm.slane %v5366_v1, 3 }
0x2024   : > { %3440 = vset.pattern.permute.xlu2 %v3550_v0  ;;  %2935 = vperm.xlu1 %3439, %v5323_v52   ;;  %v3019_v0 = vperm.slane %v5370_v16, 3 }
0x2025   : > { %2962 = vperm.xlu2 %3440, %v5323_v52  }
0x202c   : > { %3442 = vset.pattern.permute.xlu1 %v3551_v31 }
0x202d   : > { %3443 = vset.pattern.permute.xlu2 %v3552_v48  ;;  %3016 = vperm.xlu1 %3442, %v5323_v52  }
0x202e   : > { %3043 = vperm.xlu2 %3443, %v5323_v52  }
0x2035   : > { %3444 = vset.pattern.permute.xlu1 %v3553_v7 }
0x2036   : > { %3445 = vset.pattern.permute.xlu2 %v3554_v59  ;;  %3070 = vperm.xlu1 %3444, %v5323_v52  }
0x2037   : > { %3097 = vperm.xlu2 %3445, %v5323_v52  }
0x203e   : > { %3447 = vset.pattern.permute.xlu1 %v5839_v62 }
0x206e   : > { %v2893_v63 = vpop.permute.xlu2 %2892 }
0x2076   : > { %v2906_v56 = vpop.permute.xlu2 %2905 }
0x2077   : > { %v2911_v5 = vmul.f32 %v2908_v14, %v2906_v56  ;;  %v2912_v46 = vmul.f32 %v2909_v53, %v2906_v56  ;;  %v2913_v44 = vmul.f32 %v2910_v51, %v2906_v56  ;;  %v3074_v51 = vperm.slane %v5373_v8, 5 }
0x2078   : > { %v3075_v56 = vperm.slane %v5366_v1, 5 }
0x2079   : > { %2921 = vrot.lane.b32.xlu2 %v2913_v44, %s3512_s19  ;;  %2917 = vrot.lane.b32.xlu0 %v2911_v5, %s3512_s19  ;;  %v3073_v5 = vperm.slane %v5370_v16, 5 }
0x207a   : > { %2919 = vrot.lane.b32.xlu1 %v2912_v46, %s3512_s19  ;;  %s251_s19 = scalar_lea.vmem %s5474_s6, %s3243_s16 }
0x207f   : > { %v2963_v6 = vpop.permute.xlu2 %2962 }
0x2080   : > { %v2969_v4 = vmul.f32 %v2966_v17, %v2963_v6  ;;  %v2970_v18 = vmul.f32 %v2967_v11, %v2963_v6  ;;  %v2968_v61 = vmul.f32 %v2965_v21, %v2963_v6 }
0x2081   : > { %2989 = vperm.xlu0 %3441, %v5323_v52  }
0x2086   : > { %v2891_v38 = vpop.permute.xlu1 %2890 }
0x2087   : > { %v2896_v19 = vsel %vm1092_vm11, %v2891_v38, %v2893_v63  ;;  %v2901_v47 = vadd.f32 %v2891_v38, %v2874_v28 }
0x2088   : > { %v2902_v49 = vadd.f32 %v2896_v19, %v2875_v12  ;;  %v2993_v12 = vperm.slane %v5373_v8, 2  ;;  %v3044_v59 = vpop.permute.xlu2 %3043 }
0x2089   : > { %3446 = vset.pattern.permute.xlu0 %v3556_v34  ;;  %v3051_v14 = vmul.f32 %v3048_v39, %v3044_v59  ;;  %v3049_v53 = vmul.f32 %v3046_v25, %v3044_v59  ;;  %v3100_v34 = vperm.slane %v5370_v16, 6 }
0x208a   : > { %3124 = vperm.xlu0 %3446, %v5323_v52   ;;  %v2938_v52 = vperm.slane %v5370_v16, 0 }
0x208e   : > { %v2895_v41 = vpop.permute.xlu1 %2894 }
0x208f   : > { %v2897_v37 = vsel %vm1092_vm11, %v2893_v63, %v2895_v41 }
0x2090   : > { %v5363_v20 = vadd.f32 %v2897_v37, %v2876_v3 }
0x2091   : > { %v3098_v19 = vpop.permute.xlu2 %3097 }
0x2092   : > { %3448 = vset.pattern.permute.xlu0 %v5839_v62  ;;  %v3047_v62 = vperm.slane %v5373_v8, 4  ;;  %v3103_v41 = vmul.f32 %v3100_v34, %v3098_v19 }
0x2094   : > { %v3050_v63 = vmul.f32 %v3047_v62, %v3044_v59 }
0x2096   : > { %v2936_v9 = vpop.permute.xlu1 %2935 }
0x2097   : > { %v2941_v30 = vmul.f32 %v2938_v52, %v2936_v9  ;;  %v2942_v45 = vmul.f32 %v2939_v32, %v2936_v9  ;;  %v2943_v23 = vmul.f32 %v2940_v60, %v2936_v9  ;;  %v257_v32 = vld [vmem:[%s5472_s4] sm:$0xff] }
0x2099   : > { %2951 = vrot.lane.b32.xlu0 %v2943_v23, %s3518_s8  ;;  %2949 = vrot.lane.b32.xlu2 %v2942_v45, %s3518_s8 }
0x209a   : > { %2947 = vrot.lane.b32.xlu1 %v2941_v30, %s3518_s8 }
0x209f   : > { %v3017_v35 = vpop.permute.xlu1 %3016 }
0x20a0   : > { %v3023_v31 = vmul.f32 %v3020_v24, %v3017_v35  ;;  %v3024_v48 = vmul.f32 %v3021_v50, %v3017_v35  ;;  %v3022_v7 = vmul.f32 %v3019_v0, %v3017_v35 }
0x20a1   : > { %2978 = vrot.lane.b32.xlu0 %v2970_v18, %s3518_s8  ;;  %2976 = vrot.lane.b32.xlu2 %v2969_v4, %s3518_s8 }
0x20a2   : > { %2974 = vrot.lane.b32.xlu1 %v2968_v61, %s3518_s8 }
0x20a8   : > { %v3071_v15 = vpop.permute.xlu1 %3070 }
0x20a9   : > { %v3077_v46 = vmul.f32 %v3074_v51, %v3071_v15  ;;  %v3078_v44 = vmul.f32 %v3075_v56, %v3071_v15  ;;  %v3076_v38 = vmul.f32 %v3073_v5, %v3071_v15 }
0x20d3   : > { %v2922_v60 = vpop.permute.xlu2 %2921 }
0x20eb   : > { %v2918_v55 = vpop.permute.xlu0 %2917 }
0x20ec   : > { %v5388_v27 = vadd.f32 %v2918_v55, %v2901_v47  ;;  %v5390_v29 = vpop.permute.xlu1 %2919  ;;  %v3101_v47 = vperm.slane %v5373_v8, 6 }
0x20ed   : > { %v2923_v28 = vsel %vm1092_vm11, %v2918_v55, %v5390_v29 }
0x20ee   : > { %v5394_v33 = vadd.f32 %v2923_v28, %v2902_v49  ;;  %v3102_v49 = vperm.slane %v5366_v1, 6  ;;  %v3104_v54 = vmul.f32 %v3101_v47, %v3098_v19 }
0x20f0   : > { %v3105_v3 = vmul.f32 %v3102_v49, %v3098_v19 }
0x20f3   : > { %v2990_v58 = vpop.permute.xlu0 %2989  ;;  %v2950_v8 = vpop.permute.xlu2 %2949 }
0x20f4   : > { %v2995_v2 = vmul.f32 %v2992_v57, %v2990_v58  ;;  %v2996_v40 = vmul.f32 %v2993_v12, %v2990_v58  ;;  %v2997_v36 = vmul.f32 %v2994_v42, %v2990_v58  ;;  %v2924_v57 = vsel %vm1092_vm11, %v5390_v29, %v2922_v60 }
0x20f5   : > { %v2930_v58 = vadd.f32 %v2924_v57, %v5363_v20 }
0x20f6   : > { %3005 = vrot.lane.b32.xlu0 %v2997_v36, %s3518_s8  ;;  %3003 = vrot.lane.b32.xlu2 %v2996_v40, %s3518_s8 }
0x20f7   : > { %3001 = vrot.lane.b32.xlu1 %v2995_v2, %s3518_s8 }
0x20fb   : > { %v2977_v30 = vpop.permute.xlu2 %2976 }
0x20fc   : > { %v3125_v37 = vpop.permute.xlu0 %3124 }
0x20fd   : > { %v3131_v22 = vmul.f32 %v3128_v13, %v3125_v37  ;;  %v3132_v10 = vmul.f32 %v3129_v43, %v3125_v37  ;;  %v3130_v52 = vmul.f32 %v3127_v26, %v3125_v37 }
0x20fe   : > { %3032 = vrot.lane.b32.xlu0 %v3024_v48, %s3518_s8  ;;  %3030 = vrot.lane.b32.xlu2 %v3023_v31, %s3518_s8 }
0x20ff   : > { %3028 = vrot.lane.b32.xlu1 %v3022_v7, %s3518_s8 }
0x2106   : > { %3059 = vrot.lane.b32.xlu0 %v3051_v14, %s3518_s8  ;;  %3057 = vrot.lane.b32.xlu2 %v3050_v63, %s3518_s8 }
0x2107   : > { %3055 = vrot.lane.b32.xlu1 %v3049_v53, %s3518_s8 }
0x210b   : > { %v2952_v9 = vpop.permute.xlu0 %2951 }
0x210c   : > { %v2948_v1 = vpop.permute.xlu1 %2947  ;;  %v2954_v12 = vsel %vm1217_vm12, %v2950_v8, %v2952_v9 }
0x210d   : > { %v2953_v42 = vsel %vm1217_vm12, %v2948_v1, %v2950_v8  ;;  %v2960_v50 = vadd.f32 %v2954_v12, %v2930_v58  ;;  %v2958_v0 = vadd.f32 %v2948_v1, %v5388_v27 }
0x210e   : > { %3086 = vrot.lane.b32.xlu0 %v3078_v44, %s3518_s8  ;;  %3084 = vrot.lane.b32.xlu2 %v3077_v46, %s3518_s8  ;;  %v2959_v31 = vadd.f32 %v2953_v42, %v5394_v33 }
0x210f   : > { %3082 = vrot.lane.b32.xlu1 %v3076_v38, %s3518_s8 }
0x2113   : > { %v2979_v16 = vpop.permute.xlu0 %2978 }
0x2114   : > { %v2975_v45 = vpop.permute.xlu1 %2974  ;;  %v2981_v40 = vsel %vm1217_vm12, %v2977_v30, %v2979_v16 }
0x2115   : > { %v2980_v36 = vsel %vm1217_vm12, %v2975_v45, %v2977_v30  ;;  %v2987_v59 = vadd.f32 %v2981_v40, %v2960_v50  ;;  %v2985_v62 = vadd.f32 %v2975_v45, %v2958_v0 }
0x2116   : > { %3113 = vrot.lane.b32.xlu0 %v3105_v3, %s3518_s8  ;;  %3111 = vrot.lane.b32.xlu2 %v3104_v54, %s3518_s8  ;;  %v2986_v39 = vadd.f32 %v2980_v36, %v2959_v31 }
0x2117   : > { %3109 = vrot.lane.b32.xlu1 %v3103_v41, %s3518_s8 }
0x211e   : > { %3140 = vrot.lane.b32.xlu0 %v3132_v10, %s3518_s8  ;;  %3138 = vrot.lane.b32.xlu2 %v3131_v22, %s3518_s8 }
0x211f   : > { %3136 = vrot.lane.b32.xlu1 %v3130_v52, %s3518_s8 }
0x2127   : > { %3152 = vperm.xlu1 %3447, %v257_v32  }
0x2150   : > { %v3004_v23 = vpop.permute.xlu2 %3003 }
0x2158   : > { %v3031_v11 = vpop.permute.xlu2 %3030 }
0x2160   : > { %v3058_v18 = vpop.permute.xlu2 %3057 }
0x2168   : > { %v3006_v6 = vpop.permute.xlu0 %3005  ;;  %v3085_v15 = vpop.permute.xlu2 %3084 }
0x2169   : > { %v3002_v17 = vpop.permute.xlu1 %3001  ;;  %v3008_v29 = vsel %vm1217_vm12, %v3004_v23, %v3006_v6 }
0x216a   : > { %v3007_v7 = vsel %vm1217_vm12, %v3002_v17, %v3004_v23  ;;  %v3014_v63 = vadd.f32 %v3008_v29, %v2987_v59  ;;  %v3012_v14 = vadd.f32 %v3002_v17, %v2985_v62 }
0x216b   : > { %v3013_v53 = vadd.f32 %v3007_v7, %v2986_v39 }
0x2170   : > { %v3033_v21 = vpop.permute.xlu0 %3032  ;;  %v3112_v48 = vpop.permute.xlu2 %3111 }
0x2171   : > { %v3029_v4 = vpop.permute.xlu1 %3028  ;;  %v3035_v20 = vsel %vm1217_vm12, %v3031_v11, %v3033_v21 }
0x2172   : > { %v3034_v25 = vsel %vm1217_vm12, %v3029_v4, %v3031_v11  ;;  %v3041_v33 = vadd.f32 %v3035_v20, %v3014_v63  ;;  %v3039_v56 = vadd.f32 %v3029_v4, %v3012_v14 }
0x2173   : > { %v3040_v5 = vadd.f32 %v3034_v25, %v3013_v53 }
0x2178   : > { %v3060_v61 = vpop.permute.xlu0 %3059  ;;  %v3139_v41 = vpop.permute.xlu2 %3138 }
0x2179   : > { %v3056_v35 = vpop.permute.xlu1 %3055  ;;  %v3062_v51 = vsel %vm1217_vm12, %v3058_v18, %v3060_v61 }
0x217a   : > { %v3061_v27 = vsel %vm1217_vm12, %v3056_v35, %v3058_v18  ;;  %v3068_v19 = vadd.f32 %v3062_v51, %v3041_v33  ;;  %v3066_v47 = vadd.f32 %v3056_v35, %v3039_v56 }
0x217b   : > { %v3067_v49 = vadd.f32 %v3061_v27, %v3040_v5 }
0x2180   : > { %v3087_v55 = vpop.permute.xlu0 %3086 }
0x2181   : > { %v3083_v28 = vpop.permute.xlu1 %3082  ;;  %v3089_v46 = vsel %vm1217_vm12, %v3085_v15, %v3087_v55 }
0x2182   : > { %v3088_v44 = vsel %vm1217_vm12, %v3083_v28, %v3085_v15  ;;  %v3095_v37 = vadd.f32 %v3089_v46, %v3068_v19  ;;  %v3093_v13 = vadd.f32 %v3083_v28, %v3066_v47 }
0x2183   : > { %v3094_v43 = vadd.f32 %v3088_v44, %v3067_v49 }
0x2188   : > { %v3114_v2 = vpop.permute.xlu0 %3113 }
0x2189   : > { %v3110_v24 = vpop.permute.xlu1 %3109  ;;  %v3116_v54 = vsel %vm1217_vm12, %v3112_v48, %v3114_v2 }
0x218a   : > { %v3115_v3 = vsel %vm1217_vm12, %v3110_v24, %v3112_v48  ;;  %v3122_v10 = vadd.f32 %v3116_v54, %v3095_v37  ;;  %v3120_v52 = vadd.f32 %v3110_v24, %v3093_v13 }
0x218b   : > { %v3121_v32 = vadd.f32 %v3115_v3, %v3094_v43 }
0x2190   : > { %v3141_v34 = vpop.permute.xlu0 %3140 }
0x2191   : > { %v3137_v38 = vpop.permute.xlu1 %3136  ;;  %v3143_v26 = vsel %vm1217_vm12, %v3139_v41, %v3141_v34 }
0x2192   : > { %v3142_v22 = vsel %vm1217_vm12, %v3137_v38, %v3139_v41  ;;  %v3149_v60 = vadd.f32 %v3143_v26, %v3122_v10  ;;  %v3147_v8 = vadd.f32 %v3137_v38, %v3120_v52 }
0x2193   : > { %v3148_v9 = vadd.f32 %v3142_v22, %v3121_v32 }
0x2199   : > { %v3153_v1 = vpop.permute.xlu1 %3152 }
0x219a   : > { %v3155_v30 = vadd.f32 %v3153_v1, %v3147_v8  ;;  %v3156_v16 = vadd.f32 %v3153_v1, %v3148_v9  ;;  %v3157_v45 = vadd.f32 %v3153_v1, %v3149_v60 }
0x219c   : > { %v3158_v23 = vmax.f32 %v3155_v30, 0.0  ;;  %v3159_v6 = vmax.f32 %v3156_v16, 0.0  ;;  %v3160_v17 = vmax.f32 %v3157_v45, 0.0 }
0x219e   : > { %3168 = vrot.lane.b32.xlu1 %v3160_v17, %s3516_s29  ;;  %3166 = vrot.lane.b32.xlu0 %v3159_v6, %s3516_s29 }
0x219f   : > { %3164 = vrot.lane.b32.xlu2 %v3158_v23, %s3516_s29 }
0x21f9   : > { %v3165_v11 = vpop.permute.xlu2 %3164 }
0x2210   : > { %v3169_v21 = vpop.permute.xlu1 %3168  ;;  %v3167_v4 = vpop.permute.xlu0 %3166 }
0x2211   : > { %v3170_v18 = vsel %vm1190_vm6, %v3165_v11, %v3167_v4  ;;  %v3171_v61 = vsel %vm1190_vm6, %v3167_v4, %v3169_v21 }
0x2212   : > { %3174 = vst [vmem:[%s251_s19] sm:$0xff] %v3170_v18 }
0x2213   : > { %3175 = vst [vmem:[%s251_s19 + $0x8] sm:$0xff] %v3171_v61 }
0x2214 PF: > { %s16_s21 = sadd.s32 1, %s3469_s21  }
0x2215   : > { %p13_p4 = scmp.ge.s32.totalorder %s16_s21, 4  }
0x2217   :  { %15 = sbr.rel (!%p13_p4) target bundleno = 1 (0x1), region = 74 }

</bundles_post_ra>
